<compile_context>
chip_gen: v7x
topology: tpu7x:2x2x1
jax: 0.10.0
libtpu: 0.0.40
codegen_flags: <defaults>
</compile_context>

<pallas_src>
import math
import functools

import jax
import jax.numpy as jnp
from jax.experimental import pallas as pl
from jax.experimental.pallas import tpu as pltpu


def mha_kernel(q_ref, k_ref, v_ref, mask_ref,
               wq_ref, bq_ref, wk_ref, bk_ref, wv_ref, bv_ref,
               wo_ref, bo_ref, out_ref,
               kp_ref, vp_ref, *ctx_scratch,
               h, d_k, exp_dtype):
    qi = pl.program_id(1)

    # --- K/V projections: once per batch element, cached head-major in bf16. ---
    @pl.when(qi == 0)
    def _():
        # TODO(synk): when the key and value inputs are the same tensor (usual
        # self/cross attention), fuse the two projections into one
        # (S, D) @ (D, 2D) matmul with host-side concat of Wk|Wv.
        Kp = (jnp.dot(k_ref[0], wk_ref[...],
                      preferred_element_type=jnp.float32) + bk_ref[...]
              ).astype(jnp.bfloat16)                               # (S, D)
        Vp = (jnp.dot(v_ref[0], wv_ref[...],
                      preferred_element_type=jnp.float32) + bv_ref[...]
              ).astype(jnp.bfloat16)                               # (S, D)
        for hh in range(h):
            lo = hh * d_k
            kp_ref[hh] = Kp[:, lo:lo + d_k]                        # lane-dense tiles
            vp_ref[hh] = Vp[:, lo:lo + d_k]

    # --- Q projection for this query tile (1/sqrt(d_k) pre-folded into wq/bq). ---
    Q = (jnp.dot(q_ref[0], wq_ref[...],
                 preferred_element_type=jnp.float32) + bq_ref[...]
         ).astype(jnp.bfloat16)                                    # (Tq, D)

    # --- Mask hoisted out of the head loop (replacement, matches masked_fill_). ---
    mask_ok = mask_ref[0] != 0                                     # (Tq, S)
    neg_big = jnp.float32(-1e9)

    # --- Per-head attention (h is small & static -> unrolled Python loop). ---
    # TODO(synk): for h > ~8 switch to lax.fori_loop over the head-major caches;
    # for long S add a KV grid axis with online softmax (flash-style) so VMEM
    # scales as O(Tq*D + Tkv*D) instead of O(S*D) (needed on v7x's 64 MiB).
    ctx_heads = []
    for hh in range(h):
        lo = hh * d_k
        Qh = Q[:, lo:lo + d_k]                                     # (Tq, d_k) bf16
        Kh = kp_ref[hh]                                            # (S,  d_k) bf16
        Vh = vp_ref[hh]                                            # (S,  d_k) bf16

        # Q . K^T without an explicit transpose (contract last dims).
        s = jax.lax.dot_general(Qh, Kh, (((1,), (1,)), ((), ())),
                                preferred_element_type=jnp.float32)  # (Tq, S) fp32
        s = jnp.where(mask_ok, s, neg_big)

        # Numerically stable softmax; normalization deferred past the PV matmul
        # so the reciprocal multiply is (Tq, d_k) instead of (Tq, S).
        s = s - jnp.max(s, axis=-1, keepdims=True)
        p = jnp.exp(s.astype(exp_dtype))           # bf16 EUP on v6e/v7x, fp32 on v5e
        rowsum = jnp.sum(p.astype(jnp.float32), axis=-1, keepdims=True)

        ctx_h = jnp.dot(p.astype(jnp.bfloat16), Vh,
                        preferred_element_type=jnp.float32)        # (Tq, d_k) fp32
        ctx_h = ctx_h * pl.reciprocal(rowsum, approx=True)         # fp32 normalize
        if ctx_scratch:
            ctx_scratch[0][:, lo:lo + d_k] = ctx_h.astype(jnp.bfloat16)
        else:
            ctx_heads.append(ctx_h.astype(jnp.bfloat16))

    if ctx_scratch:
        ctx = ctx_scratch[0][...]                                  # (Tq, D) bf16
    else:
        # Heads stay register-resident and feed the MXU directly.
        ctx = jnp.concatenate(ctx_heads, axis=-1)                  # (Tq, D) bf16

    # --- Single fused output projection: (Tq, D) @ (D, D) + bo. ---
    out = jnp.dot(ctx, wo_ref[...],
                  preferred_element_type=jnp.float32) + bo_ref[...]
    out_ref[0] = out.astype(out_ref.dtype)


def _exp_dtype():
    """bf16 softmax exp on chips with a bf16 EUP (v6e/v7x); fp32 elsewhere (v5e)."""
    try:
        kind = jax.devices()[0].device_kind.lower()
    except Exception:
        return jnp.float32
    if "v6" in kind or "v7" in kind or "7x" in kind:
        return jnp.bfloat16
    return jnp.float32


def _vmem_capacity_bytes():
    try:
        return int(pltpu.get_tpu_info().vmem_capacity_bytes)
    except Exception:
        return 64 * 1024 * 1024   # conservative: assume v7x-sized VMEM


def _pick_q_tile(S, tq_max):
    # Clamp to >= 32 sublanes (bf16 needs 16, int8 mask needs 32) unless Tq == S.
    if S <= tq_max:
        return S
    for t in (512, 256, 128, 64, 32):
        if t <= tq_max and S % t == 0:
            return t
    return S   # no friendly divisor -> process the whole sequence per step


def _block_spec(shape, index_map, *, single_buffer):
    """BlockSpec, optionally single-buffered (constant / per-batch blocks)."""
    if single_buffer and hasattr(pl, "Buffered"):
        try:
            return pl.BlockSpec(shape, index_map, pipeline_mode=pl.Buffered(1))
        except TypeError:       # older jax: no pipeline_mode kwarg
            pass
    return pl.BlockSpec(shape, index_map)


def _mha_forward_impl(q, k, v, mask, params, *, h, single_buffer, concat_ctx):
    B, S, D = q.shape
    assert D % h == 0, "d_model is not divisible by h"
    d_k = D // h
    Wq, bq, Wk, bk, Wv, bv, Wo, bo = params

    # Host-side prep: weights -> (in, out) bf16, biases -> (1, D) fp32,
    # activations -> bf16, mask -> int8. Attention scale folded into Wq/bq.
    scale = 1.0 / math.sqrt(d_k)
    wq = (Wq.T * scale).astype(jnp.bfloat16)
    wk, wv, wo = (W.T.astype(jnp.bfloat16) for W in (Wk, Wv, Wo))
    bq2 = (bq * scale)[None, :].astype(jnp.float32)
    bk2, bv2, bo2 = (b[None, :].astype(jnp.float32) for b in (bk, bv, bo))
    qb, kb, vb = (x.astype(jnp.bfloat16) for x in (q, k, v))
    mask_i8 = mask.astype(jnp.int8)

    # Per-generation VMEM budget / max query tile.
    if _vmem_capacity_bytes() >= 100 * 1024 * 1024:   # v5e / v6e: 128 MiB physical
        vmem_limit, tq_max = 96 * 1024 * 1024, 512
    else:                                             # v7x: 64 MiB per TensorCore
        vmem_limit, tq_max = 48 * 1024 * 1024, 256
    Tq = _pick_q_tile(S, tq_max)
    nq = S // Tq

    kernel = functools.partial(mha_kernel, h=h, d_k=d_k, exp_dtype=_exp_dtype())

    # Constant-index weight/bias blocks and the per-batch K/V blocks gain nothing
    # from double buffering -> single-buffer them to reclaim VMEM.
    weight_spec = _block_spec((D, D), lambda b, i: (0, 0), single_buffer=single_buffer)
    bias_spec = _block_spec((1, D), lambda b, i: (0, 0), single_buffer=single_buffer)
    kv_spec = _block_spec((1, S, D), lambda b, i: (b, 0, 0), single_buffer=single_buffer)
    q_spec = pl.BlockSpec((1, Tq, D), lambda b, i: (b, i, 0))
    mask_spec = pl.BlockSpec((1, Tq, S), lambda b, i: (b, i, 0))
    out_spec = pl.BlockSpec((1, Tq, D), lambda b, i: (b, i, 0))

    scratch_shapes = [pltpu.VMEM((h, S, d_k), jnp.bfloat16),   # projected K cache
                      pltpu.VMEM((h, S, d_k), jnp.bfloat16)]   # projected V cache
    if not concat_ctx:
        scratch_shapes.append(pltpu.VMEM((Tq, D), jnp.bfloat16))  # ctx fallback

    # TODO(synk): switch out_shape to bf16 if the consumer tolerates it (halves
    # output writeback DMA); kept fp32 here to match the PyTorch module exactly.
    # TODO(synk): if the mask is causal / padding-length structured, generate the
    # bias in-kernel from iota / a scalar-prefetched length vector instead of
    # streaming a (B, S, S) tensor.
    out = pl.pallas_call(
        kernel,
        out_shape=jax.ShapeDtypeStruct((B, S, D), jnp.float32),
        grid_spec=pltpu.PrefetchScalarGridSpec(
            num_scalar_prefetch=0,
            grid=(B, nq),
            in_specs=[q_spec, kv_spec, kv_spec, mask_spec,
                      weight_spec, bias_spec,
                      weight_spec, bias_spec,
                      weight_spec, bias_spec,
                      weight_spec, bias_spec],
            out_specs=out_spec,
            scratch_shapes=scratch_shapes,
        ),
        compiler_params=pltpu.CompilerParams(
            # Batch is megacore-parallel; query tiles stay sequential per batch
            # because the projected K/V caches are filled at qi == 0.
            # TODO(synk): for B < num_cores, hoist the K/V projection into its own
            # GEMM so the query-tile axis can also be marked "parallel".
            dimension_semantics=("parallel", "arbitrary"),
            vmem_limit_bytes=vmem_limit,
        ),
    )(qb, kb, vb, mask_i8, wq, bq2, wk, bk2, wv, bv2, wo, bo2)
    # Block here so feature-fallback (below) also catches late failures.
    return jax.block_until_ready(out)


def mha_forward(q, k, v, mask, params, *, h):
    """Forward pass of MultiHeadAttentionBlock (eval mode; dropout is identity).

    params are in PyTorch nn.Linear layout: W of shape (out, in), b of shape (out,).
    Prefers single-buffered constant blocks + register-resident head concat; falls
    back gracefully on jax/Mosaic versions lacking pipeline_mode / unaligned concat.
    """
    last_err = None
    for single_buffer, concat_ctx in ((True, True), (False, True),
                                      (True, False), (False, False)):
        try:
            return _mha_forward_impl(q, k, v, mask, params, h=h,
                                     single_buffer=single_buffer,
                                     concat_ctx=concat_ctx)
        except Exception as e:  # feature-support fallback only; last error re-raised
            last_err = e
    raise last_err


def reference_mha(q, k, v, mask, raw_params, *, h):
    """Pure-JAX fp32 reproduction of the PyTorch forward (eval mode)."""
    Wq, bq, Wk, bk, Wv, bv, Wo, bo = raw_params  # W: (out, in), b: (out,)
    B, S, D = q.shape
    d_k = D // h

    Q = q @ Wq.T + bq
    K = k @ Wk.T + bk
    V = v @ Wv.T + bv

    def split(x):
        return x.reshape(B, S, h, d_k).transpose(0, 2, 1, 3)     # (B, h, S, d_k)

    Q, K, V = split(Q), split(K), split(V)
    scores = Q @ K.transpose(0, 1, 3, 2) / math.sqrt(d_k)        # (B, h, S, S)
    scores = jnp.where(mask[:, None, :, :] == 0, -1e9, scores)
    p = jax.nn.softmax(scores, axis=-1)
    x = p @ V                                                    # (B, h, S, d_k)
    x = x.transpose(0, 2, 1, 3).reshape(B, S, D)
    return x @ Wo.T + bo


def init_linear(key, d_model):
    # PyTorch nn.Linear default init: U(-1/sqrt(in), 1/sqrt(in)) for W and b.
    kw, kb = jax.random.split(key)
    bound = 1.0 / math.sqrt(d_model)
    W = jax.random.uniform(kw, (d_model, d_model), jnp.float32, -bound, bound)
    b = jax.random.uniform(kb, (d_model,), jnp.float32, -bound, bound)
    return W, b


if __name__ == "__main__":
    B, S, D, H = 2, 8, 32, 4
    dropout = 0.1  # eval mode -> identity (not applied in the kernel)

    key = jax.random.PRNGKey(0)
    keys = jax.random.split(key, 8)

    Wq, bq = init_linear(keys[0], D)
    Wk, bk = init_linear(keys[1], D)
    Wv, bv = init_linear(keys[2], D)
    Wo, bo = init_linear(keys[3], D)

    q = jax.random.normal(keys[4], (B, S, D), jnp.float32)
    k = jax.random.normal(keys[5], (B, S, D), jnp.float32)
    v = jax.random.normal(keys[6], (B, S, D), jnp.float32)
    # 0/1 mask, 0 = masked position (broadcasts over heads like PyTorch).
    mask = (jax.random.uniform(keys[7], (B, S, S)) > 0.2).astype(jnp.int32)

    raw_params = (Wq, bq, Wk, bk, Wv, bv, Wo, bo)

    out = mha_forward(q, k, v, mask, raw_params, h=H)
    out = jax.block_until_ready(out)

    ref = reference_mha(q, k, v, mask, raw_params, h=H)
    assert out.shape == (B, S, D)
    # bf16 MXU operands / bf16 exp with fp32 accumulation -> loosened tolerance.
    assert jnp.allclose(out, ref, atol=5e-2, rtol=5e-2), "mismatch vs reference"

    print("KERNEL_OK")
</pallas_src>

<mosaic_0001>
module attributes {stable_mosaic.version = 11 : i64} {
  func.func @mha_kernel(%arg0: i32, %arg1: i32, %arg2: memref<1x8x32xbf16, #tpu.memory_space<vmem>>, %arg3: memref<1x8x32xbf16, #tpu.memory_space<vmem>>, %arg4: memref<1x8x32xbf16, #tpu.memory_space<vmem>>, %arg5: memref<1x8x8xi8, #tpu.memory_space<vmem>>, %arg6: memref<32x32xbf16, #tpu.memory_space<vmem>>, %arg7: memref<1x32xf32, #tpu.memory_space<vmem>>, %arg8: memref<32x32xbf16, #tpu.memory_space<vmem>>, %arg9: memref<1x32xf32, #tpu.memory_space<vmem>>, %arg10: memref<32x32xbf16, #tpu.memory_space<vmem>>, %arg11: memref<1x32xf32, #tpu.memory_space<vmem>>, %arg12: memref<32x32xbf16, #tpu.memory_space<vmem>>, %arg13: memref<1x32xf32, #tpu.memory_space<vmem>>, %arg14: memref<1x8x32xf32, #tpu.memory_space<vmem>>, %arg15: memref<4x8x8xbf16, #tpu.memory_space<vmem>>, %arg16: memref<4x8x8xbf16, #tpu.memory_space<vmem>>) attributes {dimension_semantics = [#tpu.dimension_semantics<parallel>, #tpu.dimension_semantics<arbitrary>], iteration_bounds = array<i64: 2, 1>, scalar_prefetch = 0 : i64, scratch_operands = 2 : i64, tpu.core_type = #tpu.core_type<tc>, window_params = [{transform_indices = @transform_0, window_bounds = array<i64: 1, 8, 32>}, {pipeline_mode = #tpu.pipeline_mode<synchronous>, transform_indices = @transform_1, window_bounds = array<i64: 1, 8, 32>}, {pipeline_mode = #tpu.pipeline_mode<synchronous>, transform_indices = @transform_2, window_bounds = array<i64: 1, 8, 32>}, {transform_indices = @transform_3, window_bounds = array<i64: 1, 8, 8>}, {pipeline_mode = #tpu.pipeline_mode<synchronous>, transform_indices = @transform_4, window_bounds = array<i64: 32, 32>}, {pipeline_mode = #tpu.pipeline_mode<synchronous>, transform_indices = @transform_5, window_bounds = array<i64: 1, 32>}, {pipeline_mode = #tpu.pipeline_mode<synchronous>, transform_indices = @transform_6, window_bounds = array<i64: 32, 32>}, {pipeline_mode = #tpu.pipeline_mode<synchronous>, transform_indices = @transform_7, window_bounds = array<i64: 1, 32>}, {pipeline_mode = #tpu.pipeline_mode<synchronous>, transform_indices = @transform_8, window_bounds = array<i64: 32, 32>}, {pipeline_mode = #tpu.pipeline_mode<synchronous>, transform_indices = @transform_9, window_bounds = array<i64: 1, 32>}, {pipeline_mode = #tpu.pipeline_mode<synchronous>, transform_indices = @transform_10, window_bounds = array<i64: 32, 32>}, {pipeline_mode = #tpu.pipeline_mode<synchronous>, transform_indices = @transform_11, window_bounds = array<i64: 1, 32>}, {transform_indices = @transform_12, window_bounds = array<i64: 1, 8, 32>}]} {
    %c0_i32 = arith.constant 0 : i32
    %0 = arith.cmpi eq, %arg1, %c0_i32 : i32
    %1 = arith.extui %0 : i1 to i32
    %c0_i32_0 = arith.constant 0 : i32
    %2 = arith.cmpi ne, %1, %c0_i32_0 : i32
    scf.if %2 {
      %c0_59 = arith.constant 0 : index
      %c0_60 = arith.constant 0 : index
      %c0_61 = arith.constant 0 : index
      %108 = vector.load %arg3[%c0_59, %c0_60, %c0_61] : memref<1x8x32xbf16, #tpu.memory_space<vmem>>, vector<1x8x32xbf16>
      %109 = vector.shape_cast %108 : vector<1x8x32xbf16> to vector<8x32xbf16>
      %c0_62 = arith.constant 0 : index
      %c0_63 = arith.constant 0 : index
      %110 = vector.load %arg8[%c0_62, %c0_63] : memref<32x32xbf16, #tpu.memory_space<vmem>>, vector<32x32xbf16>
      %cst_64 = arith.constant dense<0.000000e+00> : vector<8x32xf32>
      %111 = tpu.matmul %109, %110, %cst_64 {dimension_numbers = #tpu.dot_dimension_numbers<[1], [0], [0], [1], [0, 0, 1, 1], [], []>} : vector<8x32xbf16>, vector<32x32xbf16>, vector<8x32xf32> -> vector<8x32xf32>
      %c0_65 = arith.constant 0 : index
      %c0_66 = arith.constant 0 : index
      %112 = vector.load %arg9[%c0_65, %c0_66] : memref<1x32xf32, #tpu.memory_space<vmem>>, vector<1x32xf32>
      %113 = vector.broadcast %112 : vector<1x32xf32> to vector<8x32xf32>
      %114 = arith.addf %111, %113 : vector<8x32xf32>
      %115 = arith.truncf %114 : vector<8x32xf32> to vector<8x32xbf16>
      %c0_67 = arith.constant 0 : index
      %c0_68 = arith.constant 0 : index
      %c0_69 = arith.constant 0 : index
      %116 = vector.load %arg4[%c0_67, %c0_68, %c0_69] : memref<1x8x32xbf16, #tpu.memory_space<vmem>>, vector<1x8x32xbf16>
      %117 = vector.shape_cast %116 : vector<1x8x32xbf16> to vector<8x32xbf16>
      %c0_70 = arith.constant 0 : index
      %c0_71 = arith.constant 0 : index
      %118 = vector.load %arg10[%c0_70, %c0_71] : memref<32x32xbf16, #tpu.memory_space<vmem>>, vector<32x32xbf16>
      %cst_72 = arith.constant dense<0.000000e+00> : vector<8x32xf32>
      %119 = tpu.matmul %117, %118, %cst_72 {dimension_numbers = #tpu.dot_dimension_numbers<[1], [0], [0], [1], [0, 0, 1, 1], [], []>} : vector<8x32xbf16>, vector<32x32xbf16>, vector<8x32xf32> -> vector<8x32xf32>
      %c0_73 = arith.constant 0 : index
      %c0_74 = arith.constant 0 : index
      %120 = vector.load %arg11[%c0_73, %c0_74] : memref<1x32xf32, #tpu.memory_space<vmem>>, vector<1x32xf32>
      %121 = vector.broadcast %120 : vector<1x32xf32> to vector<8x32xf32>
      %122 = arith.addf %119, %121 : vector<8x32xf32>
      %123 = arith.truncf %122 : vector<8x32xf32> to vector<8x32xbf16>
      %124 = vector.extract_strided_slice %115 {offsets = [0, 0], sizes = [8, 8], strides = [1, 1]} : vector<8x32xbf16> to vector<8x8xbf16>
      %c0_75 = arith.constant 0 : index
      %c0_76 = arith.constant 0 : index
      %c0_77 = arith.constant 0 : index
      %125 = vector.load %arg15[%c0_75, %c0_76, %c0_77] : memref<4x8x8xbf16, #tpu.memory_space<vmem>>, vector<1x8x8xbf16>
      %126 = vector.shape_cast %125 : vector<1x8x8xbf16> to vector<8x8xbf16>
      %127 = vector.shape_cast %124 : vector<8x8xbf16> to vector<1x8x8xbf16>
      tpu.vector_store %arg15[%c0_75, %c0_76, %c0_77], %127 {strides = array<i32>} : memref<4x8x8xbf16, #tpu.memory_space<vmem>>, vector<1x8x8xbf16>,
      %128 = vector.extract_strided_slice %123 {offsets = [0, 0], sizes = [8, 8], strides = [1, 1]} : vector<8x32xbf16> to vector<8x8xbf16>
      %c0_78 = arith.constant 0 : index
      %c0_79 = arith.constant 0 : index
      %c0_80 = arith.constant 0 : index
      %129 = vector.load %arg16[%c0_78, %c0_79, %c0_80] : memref<4x8x8xbf16, #tpu.memory_space<vmem>>, vector<1x8x8xbf16>
      %130 = vector.shape_cast %129 : vector<1x8x8xbf16> to vector<8x8xbf16>
      %131 = vector.shape_cast %128 : vector<8x8xbf16> to vector<1x8x8xbf16>
      tpu.vector_store %arg16[%c0_78, %c0_79, %c0_80], %131 {strides = array<i32>} : memref<4x8x8xbf16, #tpu.memory_space<vmem>>, vector<1x8x8xbf16>,
      %132 = vector.extract_strided_slice %115 {offsets = [0, 8], sizes = [8, 8], strides = [1, 1]} : vector<8x32xbf16> to vector<8x8xbf16>
      %c1_81 = arith.constant 1 : index
      %c0_82 = arith.constant 0 : index
      %c0_83 = arith.constant 0 : index
      %133 = vector.load %arg15[%c1_81, %c0_82, %c0_83] : memref<4x8x8xbf16, #tpu.memory_space<vmem>>, vector<1x8x8xbf16>
      %134 = vector.shape_cast %133 : vector<1x8x8xbf16> to vector<8x8xbf16>
      %135 = vector.shape_cast %132 : vector<8x8xbf16> to vector<1x8x8xbf16>
      tpu.vector_store %arg15[%c1_81, %c0_82, %c0_83], %135 {strides = array<i32>} : memref<4x8x8xbf16, #tpu.memory_space<vmem>>, vector<1x8x8xbf16>,
      %136 = vector.extract_strided_slice %123 {offsets = [0, 8], sizes = [8, 8], strides = [1, 1]} : vector<8x32xbf16> to vector<8x8xbf16>
      %c1_84 = arith.constant 1 : index
      %c0_85 = arith.constant 0 : index
      %c0_86 = arith.constant 0 : index
      %137 = vector.load %arg16[%c1_84, %c0_85, %c0_86] : memref<4x8x8xbf16, #tpu.memory_space<vmem>>, vector<1x8x8xbf16>
      %138 = vector.shape_cast %137 : vector<1x8x8xbf16> to vector<8x8xbf16>
      %139 = vector.shape_cast %136 : vector<8x8xbf16> to vector<1x8x8xbf16>
      tpu.vector_store %arg16[%c1_84, %c0_85, %c0_86], %139 {strides = array<i32>} : memref<4x8x8xbf16, #tpu.memory_space<vmem>>, vector<1x8x8xbf16>,
      %140 = vector.extract_strided_slice %115 {offsets = [0, 16], sizes = [8, 8], strides = [1, 1]} : vector<8x32xbf16> to vector<8x8xbf16>
      %c2_87 = arith.constant 2 : index
      %c0_88 = arith.constant 0 : index
      %c0_89 = arith.constant 0 : index
      %141 = vector.load %arg15[%c2_87, %c0_88, %c0_89] : memref<4x8x8xbf16, #tpu.memory_space<vmem>>, vector<1x8x8xbf16>
      %142 = vector.shape_cast %141 : vector<1x8x8xbf16> to vector<8x8xbf16>
      %143 = vector.shape_cast %140 : vector<8x8xbf16> to vector<1x8x8xbf16>
      tpu.vector_store %arg15[%c2_87, %c0_88, %c0_89], %143 {strides = array<i32>} : memref<4x8x8xbf16, #tpu.memory_space<vmem>>, vector<1x8x8xbf16>,
      %144 = vector.extract_strided_slice %123 {offsets = [0, 16], sizes = [8, 8], strides = [1, 1]} : vector<8x32xbf16> to vector<8x8xbf16>
      %c2_90 = arith.constant 2 : index
      %c0_91 = arith.constant 0 : index
      %c0_92 = arith.constant 0 : index
      %145 = vector.load %arg16[%c2_90, %c0_91, %c0_92] : memref<4x8x8xbf16, #tpu.memory_space<vmem>>, vector<1x8x8xbf16>
      %146 = vector.shape_cast %145 : vector<1x8x8xbf16> to vector<8x8xbf16>
      %147 = vector.shape_cast %144 : vector<8x8xbf16> to vector<1x8x8xbf16>
      tpu.vector_store %arg16[%c2_90, %c0_91, %c0_92], %147 {strides = array<i32>} : memref<4x8x8xbf16, #tpu.memory_space<vmem>>, vector<1x8x8xbf16>,
      %148 = vector.extract_strided_slice %115 {offsets = [0, 24], sizes = [8, 8], strides = [1, 1]} : vector<8x32xbf16> to vector<8x8xbf16>
      %c3_93 = arith.constant 3 : index
      %c0_94 = arith.constant 0 : index
      %c0_95 = arith.constant 0 : index
      %149 = vector.load %arg15[%c3_93, %c0_94, %c0_95] : memref<4x8x8xbf16, #tpu.memory_space<vmem>>, vector<1x8x8xbf16>
      %150 = vector.shape_cast %149 : vector<1x8x8xbf16> to vector<8x8xbf16>
      %151 = vector.shape_cast %148 : vector<8x8xbf16> to vector<1x8x8xbf16>
      tpu.vector_store %arg15[%c3_93, %c0_94, %c0_95], %151 {strides = array<i32>} : memref<4x8x8xbf16, #tpu.memory_space<vmem>>, vector<1x8x8xbf16>,
      %152 = vector.extract_strided_slice %123 {offsets = [0, 24], sizes = [8, 8], strides = [1, 1]} : vector<8x32xbf16> to vector<8x8xbf16>
      %c3_96 = arith.constant 3 : index
      %c0_97 = arith.constant 0 : index
      %c0_98 = arith.constant 0 : index
      %153 = vector.load %arg16[%c3_96, %c0_97, %c0_98] : memref<4x8x8xbf16, #tpu.memory_space<vmem>>, vector<1x8x8xbf16>
      %154 = vector.shape_cast %153 : vector<1x8x8xbf16> to vector<8x8xbf16>
      %155 = vector.shape_cast %152 : vector<8x8xbf16> to vector<1x8x8xbf16>
      tpu.vector_store %arg16[%c3_96, %c0_97, %c0_98], %155 {strides = array<i32>} : memref<4x8x8xbf16, #tpu.memory_space<vmem>>, vector<1x8x8xbf16>,
    } else {
    }
    %c0 = arith.constant 0 : index
    %c0_1 = arith.constant 0 : index
    %c0_2 = arith.constant 0 : index
    %3 = vector.load %arg2[%c0, %c0_1, %c0_2] : memref<1x8x32xbf16, #tpu.memory_space<vmem>>, vector<1x8x32xbf16>
    %4 = vector.shape_cast %3 : vector<1x8x32xbf16> to vector<8x32xbf16>
    %c0_3 = arith.constant 0 : index
    %c0_4 = arith.constant 0 : index
    %5 = vector.load %arg6[%c0_3, %c0_4] : memref<32x32xbf16, #tpu.memory_space<vmem>>, vector<32x32xbf16>
    %cst = arith.constant dense<0.000000e+00> : vector<8x32xf32>
    %6 = tpu.matmul %4, %5, %cst {dimension_numbers = #tpu.dot_dimension_numbers<[1], [0], [0], [1], [0, 0, 1, 1], [], []>} : vector<8x32xbf16>, vector<32x32xbf16>, vector<8x32xf32> -> vector<8x32xf32>
    %c0_5 = arith.constant 0 : index
    %c0_6 = arith.constant 0 : index
    %7 = vector.load %arg7[%c0_5, %c0_6] : memref<1x32xf32, #tpu.memory_space<vmem>>, vector<1x32xf32>
    %8 = vector.broadcast %7 : vector<1x32xf32> to vector<8x32xf32>
    %9 = arith.addf %6, %8 : vector<8x32xf32>
    %10 = arith.truncf %9 : vector<8x32xf32> to vector<8x32xbf16>
    %c0_7 = arith.constant 0 : index
    %c0_8 = arith.constant 0 : index
    %c0_9 = arith.constant 0 : index
    %11 = vector.load %arg5[%c0_7, %c0_8, %c0_9] : memref<1x8x8xi8, #tpu.memory_space<vmem>>, vector<1x8x8xi8>
    %12 = vector.shape_cast %11 : vector<1x8x8xi8> to vector<8x8xi8>
    %c0_i8 = arith.constant 0 : i8
    %13 = vector.broadcast %c0_i8 : i8 to vector<8x8xi8>
    %14 = arith.cmpi ne, %12, %13 : vector<8x8xi8>
    %15 = vector.extract_strided_slice %10 {offsets = [0, 0], sizes = [8, 8], strides = [1, 1]} : vector<8x32xbf16> to vector<8x8xbf16>
    %c0_10 = arith.constant 0 : index
    %c0_11 = arith.constant 0 : index
    %c0_12 = arith.constant 0 : index
    %16 = vector.load %arg15[%c0_10, %c0_11, %c0_12] : memref<4x8x8xbf16, #tpu.memory_space<vmem>>, vector<1x8x8xbf16>
    %17 = vector.shape_cast %16 : vector<1x8x8xbf16> to vector<8x8xbf16>
    %c0_13 = arith.constant 0 : index
    %c0_14 = arith.constant 0 : index
    %c0_15 = arith.constant 0 : index
    %18 = vector.load %arg16[%c0_13, %c0_14, %c0_15] : memref<4x8x8xbf16, #tpu.memory_space<vmem>>, vector<1x8x8xbf16>
    %19 = vector.shape_cast %18 : vector<1x8x8xbf16> to vector<8x8xbf16>
    %cst_16 = arith.constant dense<0.000000e+00> : vector<8x8xf32>
    %20 = tpu.matmul %15, %17, %cst_16 {dimension_numbers = #tpu.dot_dimension_numbers<[1], [1], [0], [0], [0, 0, 1, 0], [], []>} : vector<8x8xbf16>, vector<8x8xbf16>, vector<8x8xf32> -> vector<8x8xf32>
    %cst_17 = arith.constant -1.000000e+09 : f32
    %21 = vector.broadcast %cst_17 : f32 to vector<8x8xf32>
    %22 = arith.select %14, %20, %21 : vector<8x8xi1>, vector<8x8xf32>
    %cst_18 = arith.constant dense<0xFF800000> : vector<8xf32>
    %23 = vector.multi_reduction <maximumf>, %22, %cst_18 [1] : vector<8x8xf32> to vector<8xf32>
    %24 = vector.shape_cast %23 : vector<8xf32> to vector<8x1xf32>
    %25 = vector.broadcast %24 : vector<8x1xf32> to vector<8x8xf32>
    %26 = arith.subf %22, %25 : vector<8x8xf32>
    %27 = math.exp %26 : vector<8x8xf32>
    %cst_19 = arith.constant dense<0.000000e+00> : vector<8xf32>
    %28 = vector.multi_reduction <add>, %27, %cst_19 [1] : vector<8x8xf32> to vector<8xf32>
    %29 = vector.shape_cast %28 : vector<8xf32> to vector<8x1xf32>
    %30 = arith.truncf %27 : vector<8x8xf32> to vector<8x8xbf16>
    %cst_20 = arith.constant dense<0.000000e+00> : vector<8x8xf32>
    %31 = tpu.matmul %30, %19, %cst_20 {dimension_numbers = #tpu.dot_dimension_numbers<[1], [0], [0], [1], [0, 0, 1, 1], [], []>} : vector<8x8xbf16>, vector<8x8xbf16>, vector<8x8xf32> -> vector<8x8xf32>
    %32 = tpu.reciprocal %29 {approx = true} : vector<8x1xf32> -> vector<8x1xf32>
    %33 = vector.broadcast %32 : vector<8x1xf32> to vector<8x8xf32>
    %34 = arith.mulf %31, %33 : vector<8x8xf32>
    %35 = arith.truncf %34 : vector<8x8xf32> to vector<8x8xbf16>
    %36 = vector.extract_strided_slice %10 {offsets = [0, 8], sizes = [8, 8], strides = [1, 1]} : vector<8x32xbf16> to vector<8x8xbf16>
    %c1 = arith.constant 1 : index
    %c0_21 = arith.constant 0 : index
    %c0_22 = arith.constant 0 : index
    %37 = vector.load %arg15[%c1, %c0_21, %c0_22] : memref<4x8x8xbf16, #tpu.memory_space<vmem>>, vector<1x8x8xbf16>
    %38 = vector.shape_cast %37 : vector<1x8x8xbf16> to vector<8x8xbf16>
    %c1_23 = arith.constant 1 : index
    %c0_24 = arith.constant 0 : index
    %c0_25 = arith.constant 0 : index
    %39 = vector.load %arg16[%c1_23, %c0_24, %c0_25] : memref<4x8x8xbf16, #tpu.memory_space<vmem>>, vector<1x8x8xbf16>
    %40 = vector.shape_cast %39 : vector<1x8x8xbf16> to vector<8x8xbf16>
    %cst_26 = arith.constant dense<0.000000e+00> : vector<8x8xf32>
    %41 = tpu.matmul %36, %38, %cst_26 {dimension_numbers = #tpu.dot_dimension_numbers<[1], [1], [0], [0], [0, 0, 1, 0], [], []>} : vector<8x8xbf16>, vector<8x8xbf16>, vector<8x8xf32> -> vector<8x8xf32>
    %cst_27 = arith.constant -1.000000e+09 : f32
    %42 = vector.broadcast %cst_27 : f32 to vector<8x8xf32>
    %43 = arith.select %14, %41, %42 : vector<8x8xi1>, vector<8x8xf32>
    %cst_28 = arith.constant dense<0xFF800000> : vector<8xf32>
    %44 = vector.multi_reduction <maximumf>, %43, %cst_28 [1] : vector<8x8xf32> to vector<8xf32>
    %45 = vector.shape_cast %44 : vector<8xf32> to vector<8x1xf32>
    %46 = vector.broadcast %45 : vector<8x1xf32> to vector<8x8xf32>
    %47 = arith.subf %43, %46 : vector<8x8xf32>
    %48 = math.exp %47 : vector<8x8xf32>
    %cst_29 = arith.constant dense<0.000000e+00> : vector<8xf32>
    %49 = vector.multi_reduction <add>, %48, %cst_29 [1] : vector<8x8xf32> to vector<8xf32>
    %50 = vector.shape_cast %49 : vector<8xf32> to vector<8x1xf32>
    %51 = arith.truncf %48 : vector<8x8xf32> to vector<8x8xbf16>
    %cst_30 = arith.constant dense<0.000000e+00> : vector<8x8xf32>
    %52 = tpu.matmul %51, %40, %cst_30 {dimension_numbers = #tpu.dot_dimension_numbers<[1], [0], [0], [1], [0, 0, 1, 1], [], []>} : vector<8x8xbf16>, vector<8x8xbf16>, vector<8x8xf32> -> vector<8x8xf32>
    %53 = tpu.reciprocal %50 {approx = true} : vector<8x1xf32> -> vector<8x1xf32>
    %54 = vector.broadcast %53 : vector<8x1xf32> to vector<8x8xf32>
    %55 = arith.mulf %52, %54 : vector<8x8xf32>
    %56 = arith.truncf %55 : vector<8x8xf32> to vector<8x8xbf16>
    %57 = vector.extract_strided_slice %10 {offsets = [0, 16], sizes = [8, 8], strides = [1, 1]} : vector<8x32xbf16> to vector<8x8xbf16>
    %c2 = arith.constant 2 : index
    %c0_31 = arith.constant 0 : index
    %c0_32 = arith.constant 0 : index
    %58 = vector.load %arg15[%c2, %c0_31, %c0_32] : memref<4x8x8xbf16, #tpu.memory_space<vmem>>, vector<1x8x8xbf16>
    %59 = vector.shape_cast %58 : vector<1x8x8xbf16> to vector<8x8xbf16>
    %c2_33 = arith.constant 2 : index
    %c0_34 = arith.constant 0 : index
    %c0_35 = arith.constant 0 : index
    %60 = vector.load %arg16[%c2_33, %c0_34, %c0_35] : memref<4x8x8xbf16, #tpu.memory_space<vmem>>, vector<1x8x8xbf16>
    %61 = vector.shape_cast %60 : vector<1x8x8xbf16> to vector<8x8xbf16>
    %cst_36 = arith.constant dense<0.000000e+00> : vector<8x8xf32>
    %62 = tpu.matmul %57, %59, %cst_36 {dimension_numbers = #tpu.dot_dimension_numbers<[1], [1], [0], [0], [0, 0, 1, 0], [], []>} : vector<8x8xbf16>, vector<8x8xbf16>, vector<8x8xf32> -> vector<8x8xf32>
    %cst_37 = arith.constant -1.000000e+09 : f32
    %63 = vector.broadcast %cst_37 : f32 to vector<8x8xf32>
    %64 = arith.select %14, %62, %63 : vector<8x8xi1>, vector<8x8xf32>
    %cst_38 = arith.constant dense<0xFF800000> : vector<8xf32>
    %65 = vector.multi_reduction <maximumf>, %64, %cst_38 [1] : vector<8x8xf32> to vector<8xf32>
    %66 = vector.shape_cast %65 : vector<8xf32> to vector<8x1xf32>
    %67 = vector.broadcast %66 : vector<8x1xf32> to vector<8x8xf32>
    %68 = arith.subf %64, %67 : vector<8x8xf32>
    %69 = math.exp %68 : vector<8x8xf32>
    %cst_39 = arith.constant dense<0.000000e+00> : vector<8xf32>
    %70 = vector.multi_reduction <add>, %69, %cst_39 [1] : vector<8x8xf32> to vector<8xf32>
    %71 = vector.shape_cast %70 : vector<8xf32> to vector<8x1xf32>
    %72 = arith.truncf %69 : vector<8x8xf32> to vector<8x8xbf16>
    %cst_40 = arith.constant dense<0.000000e+00> : vector<8x8xf32>
    %73 = tpu.matmul %72, %61, %cst_40 {dimension_numbers = #tpu.dot_dimension_numbers<[1], [0], [0], [1], [0, 0, 1, 1], [], []>} : vector<8x8xbf16>, vector<8x8xbf16>, vector<8x8xf32> -> vector<8x8xf32>
    %74 = tpu.reciprocal %71 {approx = true} : vector<8x1xf32> -> vector<8x1xf32>
    %75 = vector.broadcast %74 : vector<8x1xf32> to vector<8x8xf32>
    %76 = arith.mulf %73, %75 : vector<8x8xf32>
    %77 = arith.truncf %76 : vector<8x8xf32> to vector<8x8xbf16>
    %78 = vector.extract_strided_slice %10 {offsets = [0, 24], sizes = [8, 8], strides = [1, 1]} : vector<8x32xbf16> to vector<8x8xbf16>
    %c3 = arith.constant 3 : index
    %c0_41 = arith.constant 0 : index
    %c0_42 = arith.constant 0 : index
    %79 = vector.load %arg15[%c3, %c0_41, %c0_42] : memref<4x8x8xbf16, #tpu.memory_space<vmem>>, vector<1x8x8xbf16>
    %80 = vector.shape_cast %79 : vector<1x8x8xbf16> to vector<8x8xbf16>
    %c3_43 = arith.constant 3 : index
    %c0_44 = arith.constant 0 : index
    %c0_45 = arith.constant 0 : index
    %81 = vector.load %arg16[%c3_43, %c0_44, %c0_45] : memref<4x8x8xbf16, #tpu.memory_space<vmem>>, vector<1x8x8xbf16>
    %82 = vector.shape_cast %81 : vector<1x8x8xbf16> to vector<8x8xbf16>
    %cst_46 = arith.constant dense<0.000000e+00> : vector<8x8xf32>
    %83 = tpu.matmul %78, %80, %cst_46 {dimension_numbers = #tpu.dot_dimension_numbers<[1], [1], [0], [0], [0, 0, 1, 0], [], []>} : vector<8x8xbf16>, vector<8x8xbf16>, vector<8x8xf32> -> vector<8x8xf32>
    %cst_47 = arith.constant -1.000000e+09 : f32
    %84 = vector.broadcast %cst_47 : f32 to vector<8x8xf32>
    %85 = arith.select %14, %83, %84 : vector<8x8xi1>, vector<8x8xf32>
    %cst_48 = arith.constant dense<0xFF800000> : vector<8xf32>
    %86 = vector.multi_reduction <maximumf>, %85, %cst_48 [1] : vector<8x8xf32> to vector<8xf32>
    %87 = vector.shape_cast %86 : vector<8xf32> to vector<8x1xf32>
    %88 = vector.broadcast %87 : vector<8x1xf32> to vector<8x8xf32>
    %89 = arith.subf %85, %88 : vector<8x8xf32>
    %90 = math.exp %89 : vector<8x8xf32>
    %cst_49 = arith.constant dense<0.000000e+00> : vector<8xf32>
    %91 = vector.multi_reduction <add>, %90, %cst_49 [1] : vector<8x8xf32> to vector<8xf32>
    %92 = vector.shape_cast %91 : vector<8xf32> to vector<8x1xf32>
    %93 = arith.truncf %90 : vector<8x8xf32> to vector<8x8xbf16>
    %cst_50 = arith.constant dense<0.000000e+00> : vector<8x8xf32>
    %94 = tpu.matmul %93, %82, %cst_50 {dimension_numbers = #tpu.dot_dimension_numbers<[1], [0], [0], [1], [0, 0, 1, 1], [], []>} : vector<8x8xbf16>, vector<8x8xbf16>, vector<8x8xf32> -> vector<8x8xf32>
    %95 = tpu.reciprocal %92 {approx = true} : vector<8x1xf32> -> vector<8x1xf32>
    %96 = vector.broadcast %95 : vector<8x1xf32> to vector<8x8xf32>
    %97 = arith.mulf %94, %96 : vector<8x8xf32>
    %98 = arith.truncf %97 : vector<8x8xf32> to vector<8x8xbf16>
    %99 = tpu.concatenate %35, %56, %77, %98 in 1 : vector<8x8xbf16>, vector<8x8xbf16>, vector<8x8xbf16>, vector<8x8xbf16> -> vector<8x32xbf16>
    %c0_51 = arith.constant 0 : index
    %c0_52 = arith.constant 0 : index
    %100 = vector.load %arg12[%c0_51, %c0_52] : memref<32x32xbf16, #tpu.memory_space<vmem>>, vector<32x32xbf16>
    %cst_53 = arith.constant dense<0.000000e+00> : vector<8x32xf32>
    %101 = tpu.matmul %99, %100, %cst_53 {dimension_numbers = #tpu.dot_dimension_numbers<[1], [0], [0], [1], [0, 0, 1, 1], [], []>} : vector<8x32xbf16>, vector<32x32xbf16>, vector<8x32xf32> -> vector<8x32xf32>
    %c0_54 = arith.constant 0 : index
    %c0_55 = arith.constant 0 : index
    %102 = vector.load %arg13[%c0_54, %c0_55] : memref<1x32xf32, #tpu.memory_space<vmem>>, vector<1x32xf32>
    %103 = vector.broadcast %102 : vector<1x32xf32> to vector<8x32xf32>
    %104 = arith.addf %101, %103 : vector<8x32xf32>
    %c0_56 = arith.constant 0 : index
    %c0_57 = arith.constant 0 : index
    %c0_58 = arith.constant 0 : index
    %105 = vector.load %arg14[%c0_56, %c0_57, %c0_58] : memref<1x8x32xf32, #tpu.memory_space<vmem>>, vector<1x8x32xf32>
    %106 = vector.shape_cast %105 : vector<1x8x32xf32> to vector<8x32xf32>
    %107 = vector.shape_cast %104 : vector<8x32xf32> to vector<1x8x32xf32>
    tpu.vector_store %arg14[%c0_56, %c0_57, %c0_58], %107 {strides = array<i32>} : memref<1x8x32xf32, #tpu.memory_space<vmem>>, vector<1x8x32xf32>,
    return
  }
  func.func @transform_0(%arg0: i32, %arg1: i32) -> (i32, i32, i32) {
    %c0_i32 = arith.constant 0 : i32
    %c0_i32_0 = arith.constant 0 : i32
    return %arg0, %arg1, %c0_i32 : i32, i32, i32
  }
  func.func @transform_1(%arg0: i32, %arg1: i32) -> (i32, i32, i32) {
    %c0_i32 = arith.constant 0 : i32
    %c0_i32_0 = arith.constant 0 : i32
    %c0_i32_1 = arith.constant 0 : i32
    return %arg0, %c0_i32, %c0_i32_0 : i32, i32, i32
  }
  func.func @transform_2(%arg0: i32, %arg1: i32) -> (i32, i32, i32) {
    %c0_i32 = arith.constant 0 : i32
    %c0_i32_0 = arith.constant 0 : i32
    %c0_i32_1 = arith.constant 0 : i32
    return %arg0, %c0_i32, %c0_i32_0 : i32, i32, i32
  }
  func.func @transform_3(%arg0: i32, %arg1: i32) -> (i32, i32, i32) {
    %c0_i32 = arith.constant 0 : i32
    %c0_i32_0 = arith.constant 0 : i32
    return %arg0, %arg1, %c0_i32 : i32, i32, i32
  }
  func.func @transform_4(%arg0: i32, %arg1: i32) -> (i32, i32) {
    %c0_i32 = arith.constant 0 : i32
    %c0_i32_0 = arith.constant 0 : i32
    %c0_i32_1 = arith.constant 0 : i32
    return %c0_i32, %c0_i32_0 : i32, i32
  }
  func.func @transform_5(%arg0: i32, %arg1: i32) -> (i32, i32) {
    %c0_i32 = arith.constant 0 : i32
    %c0_i32_0 = arith.constant 0 : i32
    %c0_i32_1 = arith.constant 0 : i32
    return %c0_i32, %c0_i32_0 : i32, i32
  }
  func.func @transform_6(%arg0: i32, %arg1: i32) -> (i32, i32) {
    %c0_i32 = arith.constant 0 : i32
    %c0_i32_0 = arith.constant 0 : i32
    %c0_i32_1 = arith.constant 0 : i32
    return %c0_i32, %c0_i32_0 : i32, i32
  }
  func.func @transform_7(%arg0: i32, %arg1: i32) -> (i32, i32) {
    %c0_i32 = arith.constant 0 : i32
    %c0_i32_0 = arith.constant 0 : i32
    %c0_i32_1 = arith.constant 0 : i32
    return %c0_i32, %c0_i32_0 : i32, i32
  }
  func.func @transform_8(%arg0: i32, %arg1: i32) -> (i32, i32) {
    %c0_i32 = arith.constant 0 : i32
    %c0_i32_0 = arith.constant 0 : i32
    %c0_i32_1 = arith.constant 0 : i32
    return %c0_i32, %c0_i32_0 : i32, i32
  }
  func.func @transform_9(%arg0: i32, %arg1: i32) -> (i32, i32) {
    %c0_i32 = arith.constant 0 : i32
    %c0_i32_0 = arith.constant 0 : i32
    %c0_i32_1 = arith.constant 0 : i32
    return %c0_i32, %c0_i32_0 : i32, i32
  }
  func.func @transform_10(%arg0: i32, %arg1: i32) -> (i32, i32) {
    %c0_i32 = arith.constant 0 : i32
    %c0_i32_0 = arith.constant 0 : i32
    %c0_i32_1 = arith.constant 0 : i32
    return %c0_i32, %c0_i32_0 : i32, i32
  }
  func.func @transform_11(%arg0: i32, %arg1: i32) -> (i32, i32) {
    %c0_i32 = arith.constant 0 : i32
    %c0_i32_0 = arith.constant 0 : i32
    %c0_i32_1 = arith.constant 0 : i32
    return %c0_i32, %c0_i32_0 : i32, i32
  }
  func.func @transform_12(%arg0: i32, %arg1: i32) -> (i32, i32, i32) {
    %c0_i32 = arith.constant 0 : i32
    %c0_i32_0 = arith.constant 0 : i32
    return %arg0, %arg1, %c0_i32 : i32, i32, i32
  }
}

module attributes {stable_mosaic.version = 11 : i64} {
  func.func @mha_kernel(%arg0: i32, %arg1: i32, %arg2: memref<1x8x32xbf16, #tpu.memory_space<vmem>>, %arg3: memref<1x8x32xbf16, #tpu.memory_space<vmem>>, %arg4: memref<1x8x32xbf16, #tpu.memory_space<vmem>>, %arg5: memref<1x8x8xi8, #tpu.memory_space<vmem>>, %arg6: memref<32x32xbf16, #tpu.memory_space<vmem>>, %arg7: memref<1x32xf32, #tpu.memory_space<vmem>>, %arg8: memref<32x32xbf16, #tpu.memory_space<vmem>>, %arg9: memref<1x32xf32, #tpu.memory_space<vmem>>, %arg10: memref<32x32xbf16, #tpu.memory_space<vmem>>, %arg11: memref<1x32xf32, #tpu.memory_space<vmem>>, %arg12: memref<32x32xbf16, #tpu.memory_space<vmem>>, %arg13: memref<1x32xf32, #tpu.memory_space<vmem>>, %arg14: memref<1x8x32xf32, #tpu.memory_space<vmem>>, %arg15: memref<4x8x8xbf16, #tpu.memory_space<vmem>>, %arg16: memref<4x8x8xbf16, #tpu.memory_space<vmem>>) attributes {dimension_semantics = [#tpu.dimension_semantics<parallel>, #tpu.dimension_semantics<arbitrary>], iteration_bounds = array<i64: 2, 1>, scalar_prefetch = 0 : i64, scratch_operands = 2 : i64, tpu.core_type = #tpu.core_type<tc>, window_params = [{transform_indices = @transform_0, window_bounds = array<i64: 1, 8, 32>}, {transform_indices = @transform_1, window_bounds = array<i64: 1, 8, 32>}, {transform_indices = @transform_2, window_bounds = array<i64: 1, 8, 32>}, {transform_indices = @transform_3, window_bounds = array<i64: 1, 8, 8>}, {pipeline_mode = #tpu.pipeline_mode<synchronous>, transform_indices = @transform_4, window_bounds = array<i64: 32, 32>}, {pipeline_mode = #tpu.pipeline_mode<synchronous>, transform_indices = @transform_5, window_bounds = array<i64: 1, 32>}, {pipeline_mode = #tpu.pipeline_mode<synchronous>, transform_indices = @transform_6, window_bounds = array<i64: 32, 32>}, {pipeline_mode = #tpu.pipeline_mode<synchronous>, transform_indices = @transform_7, window_bounds = array<i64: 1, 32>}, {pipeline_mode = #tpu.pipeline_mode<synchronous>, transform_indices = @transform_8, window_bounds = array<i64: 32, 32>}, {pipeline_mode = #tpu.pipeline_mode<synchronous>, transform_indices = @transform_9, window_bounds = array<i64: 1, 32>}, {pipeline_mode = #tpu.pipeline_mode<synchronous>, transform_indices = @transform_10, window_bounds = array<i64: 32, 32>}, {pipeline_mode = #tpu.pipeline_mode<synchronous>, transform_indices = @transform_11, window_bounds = array<i64: 1, 32>}, {transform_indices = @transform_12, window_bounds = array<i64: 1, 8, 32>}]} {
    %c0_i32 = arith.constant 0 : i32
    %0 = arith.cmpi eq, %arg1, %c0_i32 : i32
    %1 = arith.extui %0 : i1 to i32
    %c0_i32_0 = arith.constant 0 : i32
    %2 = arith.cmpi ne, %1, %c0_i32_0 : i32
    scf.if %2 {
      %c0_59 = arith.constant 0 : index
      %c0_60 = arith.constant 0 : index
      %c0_61 = arith.constant 0 : index
      %108 = vector.load %arg3[%c0_59, %c0_60, %c0_61] : memref<1x8x32xbf16, #tpu.memory_space<vmem>>, vector<1x8x32xbf16>
      %109 = vector.shape_cast %108 : vector<1x8x32xbf16> to vector<8x32xbf16>
      %c0_62 = arith.constant 0 : index
      %c0_63 = arith.constant 0 : index
      %110 = vector.load %arg8[%c0_62, %c0_63] : memref<32x32xbf16, #tpu.memory_space<vmem>>, vector<32x32xbf16>
      %cst_64 = arith.constant dense<0.000000e+00> : vector<8x32xf32>
      %111 = tpu.matmul %109, %110, %cst_64 {dimension_numbers = #tpu.dot_dimension_numbers<[1], [0], [0], [1], [0, 0, 1, 1], [], []>} : vector<8x32xbf16>, vector<32x32xbf16>, vector<8x32xf32> -> vector<8x32xf32>
      %c0_65 = arith.constant 0 : index
      %c0_66 = arith.constant 0 : index
      %112 = vector.load %arg9[%c0_65, %c0_66] : memref<1x32xf32, #tpu.memory_space<vmem>>, vector<1x32xf32>
      %113 = vector.broadcast %112 : vector<1x32xf32> to vector<8x32xf32>
      %114 = arith.addf %111, %113 : vector<8x32xf32>
      %115 = arith.truncf %114 : vector<8x32xf32> to vector<8x32xbf16>
      %c0_67 = arith.constant 0 : index
      %c0_68 = arith.constant 0 : index
      %c0_69 = arith.constant 0 : index
      %116 = vector.load %arg4[%c0_67, %c0_68, %c0_69] : memref<1x8x32xbf16, #tpu.memory_space<vmem>>, vector<1x8x32xbf16>
      %117 = vector.shape_cast %116 : vector<1x8x32xbf16> to vector<8x32xbf16>
      %c0_70 = arith.constant 0 : index
      %c0_71 = arith.constant 0 : index
      %118 = vector.load %arg10[%c0_70, %c0_71] : memref<32x32xbf16, #tpu.memory_space<vmem>>, vector<32x32xbf16>
      %cst_72 = arith.constant dense<0.000000e+00> : vector<8x32xf32>
      %119 = tpu.matmul %117, %118, %cst_72 {dimension_numbers = #tpu.dot_dimension_numbers<[1], [0], [0], [1], [0, 0, 1, 1], [], []>} : vector<8x32xbf16>, vector<32x32xbf16>, vector<8x32xf32> -> vector<8x32xf32>
      %c0_73 = arith.constant 0 : index
      %c0_74 = arith.constant 0 : index
      %120 = vector.load %arg11[%c0_73, %c0_74] : memref<1x32xf32, #tpu.memory_space<vmem>>, vector<1x32xf32>
      %121 = vector.broadcast %120 : vector<1x32xf32> to vector<8x32xf32>
      %122 = arith.addf %119, %121 : vector<8x32xf32>
      %123 = arith.truncf %122 : vector<8x32xf32> to vector<8x32xbf16>
      %124 = vector.extract_strided_slice %115 {offsets = [0, 0], sizes = [8, 8], strides = [1, 1]} : vector<8x32xbf16> to vector<8x8xbf16>
      %c0_75 = arith.constant 0 : index
      %c0_76 = arith.constant 0 : index
      %c0_77 = arith.constant 0 : index
      %125 = vector.load %arg15[%c0_75, %c0_76, %c0_77] : memref<4x8x8xbf16, #tpu.memory_space<vmem>>, vector<1x8x8xbf16>
      %126 = vector.shape_cast %125 : vector<1x8x8xbf16> to vector<8x8xbf16>
      %127 = vector.shape_cast %124 : vector<8x8xbf16> to vector<1x8x8xbf16>
      tpu.vector_store %arg15[%c0_75, %c0_76, %c0_77], %127 {strides = array<i32>} : memref<4x8x8xbf16, #tpu.memory_space<vmem>>, vector<1x8x8xbf16>,
      %128 = vector.extract_strided_slice %123 {offsets = [0, 0], sizes = [8, 8], strides = [1, 1]} : vector<8x32xbf16> to vector<8x8xbf16>
      %c0_78 = arith.constant 0 : index
      %c0_79 = arith.constant 0 : index
      %c0_80 = arith.constant 0 : index
      %129 = vector.load %arg16[%c0_78, %c0_79, %c0_80] : memref<4x8x8xbf16, #tpu.memory_space<vmem>>, vector<1x8x8xbf16>
      %130 = vector.shape_cast %129 : vector<1x8x8xbf16> to vector<8x8xbf16>
      %131 = vector.shape_cast %128 : vector<8x8xbf16> to vector<1x8x8xbf16>
      tpu.vector_store %arg16[%c0_78, %c0_79, %c0_80], %131 {strides = array<i32>} : memref<4x8x8xbf16, #tpu.memory_space<vmem>>, vector<1x8x8xbf16>,
      %132 = vector.extract_strided_slice %115 {offsets = [0, 8], sizes = [8, 8], strides = [1, 1]} : vector<8x32xbf16> to vector<8x8xbf16>
      %c1_81 = arith.constant 1 : index
      %c0_82 = arith.constant 0 : index
      %c0_83 = arith.constant 0 : index
      %133 = vector.load %arg15[%c1_81, %c0_82, %c0_83] : memref<4x8x8xbf16, #tpu.memory_space<vmem>>, vector<1x8x8xbf16>
      %134 = vector.shape_cast %133 : vector<1x8x8xbf16> to vector<8x8xbf16>
      %135 = vector.shape_cast %132 : vector<8x8xbf16> to vector<1x8x8xbf16>
      tpu.vector_store %arg15[%c1_81, %c0_82, %c0_83], %135 {strides = array<i32>} : memref<4x8x8xbf16, #tpu.memory_space<vmem>>, vector<1x8x8xbf16>,
      %136 = vector.extract_strided_slice %123 {offsets = [0, 8], sizes = [8, 8], strides = [1, 1]} : vector<8x32xbf16> to vector<8x8xbf16>
      %c1_84 = arith.constant 1 : index
      %c0_85 = arith.constant 0 : index
      %c0_86 = arith.constant 0 : index
      %137 = vector.load %arg16[%c1_84, %c0_85, %c0_86] : memref<4x8x8xbf16, #tpu.memory_space<vmem>>, vector<1x8x8xbf16>
      %138 = vector.shape_cast %137 : vector<1x8x8xbf16> to vector<8x8xbf16>
      %139 = vector.shape_cast %136 : vector<8x8xbf16> to vector<1x8x8xbf16>
      tpu.vector_store %arg16[%c1_84, %c0_85, %c0_86], %139 {strides = array<i32>} : memref<4x8x8xbf16, #tpu.memory_space<vmem>>, vector<1x8x8xbf16>,
      %140 = vector.extract_strided_slice %115 {offsets = [0, 16], sizes = [8, 8], strides = [1, 1]} : vector<8x32xbf16> to vector<8x8xbf16>
      %c2_87 = arith.constant 2 : index
      %c0_88 = arith.constant 0 : index
      %c0_89 = arith.constant 0 : index
      %141 = vector.load %arg15[%c2_87, %c0_88, %c0_89] : memref<4x8x8xbf16, #tpu.memory_space<vmem>>, vector<1x8x8xbf16>
      %142 = vector.shape_cast %141 : vector<1x8x8xbf16> to vector<8x8xbf16>
      %143 = vector.shape_cast %140 : vector<8x8xbf16> to vector<1x8x8xbf16>
      tpu.vector_store %arg15[%c2_87, %c0_88, %c0_89], %143 {strides = array<i32>} : memref<4x8x8xbf16, #tpu.memory_space<vmem>>, vector<1x8x8xbf16>,
      %144 = vector.extract_strided_slice %123 {offsets = [0, 16], sizes = [8, 8], strides = [1, 1]} : vector<8x32xbf16> to vector<8x8xbf16>
      %c2_90 = arith.constant 2 : index
      %c0_91 = arith.constant 0 : index
      %c0_92 = arith.constant 0 : index
      %145 = vector.load %arg16[%c2_90, %c0_91, %c0_92] : memref<4x8x8xbf16, #tpu.memory_space<vmem>>, vector<1x8x8xbf16>
      %146 = vector.shape_cast %145 : vector<1x8x8xbf16> to vector<8x8xbf16>
      %147 = vector.shape_cast %144 : vector<8x8xbf16> to vector<1x8x8xbf16>
      tpu.vector_store %arg16[%c2_90, %c0_91, %c0_92], %147 {strides = array<i32>} : memref<4x8x8xbf16, #tpu.memory_space<vmem>>, vector<1x8x8xbf16>,
      %148 = vector.extract_strided_slice %115 {offsets = [0, 24], sizes = [8, 8], strides = [1, 1]} : vector<8x32xbf16> to vector<8x8xbf16>
      %c3_93 = arith.constant 3 : index
      %c0_94 = arith.constant 0 : index
      %c0_95 = arith.constant 0 : index
      %149 = vector.load %arg15[%c3_93, %c0_94, %c0_95] : memref<4x8x8xbf16, #tpu.memory_space<vmem>>, vector<1x8x8xbf16>
      %150 = vector.shape_cast %149 : vector<1x8x8xbf16> to vector<8x8xbf16>
      %151 = vector.shape_cast %148 : vector<8x8xbf16> to vector<1x8x8xbf16>
      tpu.vector_store %arg15[%c3_93, %c0_94, %c0_95], %151 {strides = array<i32>} : memref<4x8x8xbf16, #tpu.memory_space<vmem>>, vector<1x8x8xbf16>,
      %152 = vector.extract_strided_slice %123 {offsets = [0, 24], sizes = [8, 8], strides = [1, 1]} : vector<8x32xbf16> to vector<8x8xbf16>
      %c3_96 = arith.constant 3 : index
      %c0_97 = arith.constant 0 : index
      %c0_98 = arith.constant 0 : index
      %153 = vector.load %arg16[%c3_96, %c0_97, %c0_98] : memref<4x8x8xbf16, #tpu.memory_space<vmem>>, vector<1x8x8xbf16>
      %154 = vector.shape_cast %153 : vector<1x8x8xbf16> to vector<8x8xbf16>
      %155 = vector.shape_cast %152 : vector<8x8xbf16> to vector<1x8x8xbf16>
      tpu.vector_store %arg16[%c3_96, %c0_97, %c0_98], %155 {strides = array<i32>} : memref<4x8x8xbf16, #tpu.memory_space<vmem>>, vector<1x8x8xbf16>,
    } else {
    }
    %c0 = arith.constant 0 : index
    %c0_1 = arith.constant 0 : index
    %c0_2 = arith.constant 0 : index
    %3 = vector.load %arg2[%c0, %c0_1, %c0_2] : memref<1x8x32xbf16, #tpu.memory_space<vmem>>, vector<1x8x32xbf16>
    %4 = vector.shape_cast %3 : vector<1x8x32xbf16> to vector<8x32xbf16>
    %c0_3 = arith.constant 0 : index
    %c0_4 = arith.constant 0 : index
    %5 = vector.load %arg6[%c0_3, %c0_4] : memref<32x32xbf16, #tpu.memory_space<vmem>>, vector<32x32xbf16>
    %cst = arith.constant dense<0.000000e+00> : vector<8x32xf32>
    %6 = tpu.matmul %4, %5, %cst {dimension_numbers = #tpu.dot_dimension_numbers<[1], [0], [0], [1], [0, 0, 1, 1], [], []>} : vector<8x32xbf16>, vector<32x32xbf16>, vector<8x32xf32> -> vector<8x32xf32>
    %c0_5 = arith.constant 0 : index
    %c0_6 = arith.constant 0 : index
    %7 = vector.load %arg7[%c0_5, %c0_6] : memref<1x32xf32, #tpu.memory_space<vmem>>, vector<1x32xf32>
    %8 = vector.broadcast %7 : vector<1x32xf32> to vector<8x32xf32>
    %9 = arith.addf %6, %8 : vector<8x32xf32>
    %10 = arith.truncf %9 : vector<8x32xf32> to vector<8x32xbf16>
    %c0_7 = arith.constant 0 : index
    %c0_8 = arith.constant 0 : index
    %c0_9 = arith.constant 0 : index
    %11 = vector.load %arg5[%c0_7, %c0_8, %c0_9] : memref<1x8x8xi8, #tpu.memory_space<vmem>>, vector<1x8x8xi8>
    %12 = vector.shape_cast %11 : vector<1x8x8xi8> to vector<8x8xi8>
    %c0_i8 = arith.constant 0 : i8
    %13 = vector.broadcast %c0_i8 : i8 to vector<8x8xi8>
    %14 = arith.cmpi ne, %12, %13 : vector<8x8xi8>
    %15 = vector.extract_strided_slice %10 {offsets = [0, 0], sizes = [8, 8], strides = [1, 1]} : vector<8x32xbf16> to vector<8x8xbf16>
    %c0_10 = arith.constant 0 : index
    %c0_11 = arith.constant 0 : index
    %c0_12 = arith.constant 0 : index
    %16 = vector.load %arg15[%c0_10, %c0_11, %c0_12] : memref<4x8x8xbf16, #tpu.memory_space<vmem>>, vector<1x8x8xbf16>
    %17 = vector.shape_cast %16 : vector<1x8x8xbf16> to vector<8x8xbf16>
    %c0_13 = arith.constant 0 : index
    %c0_14 = arith.constant 0 : index
    %c0_15 = arith.constant 0 : index
    %18 = vector.load %arg16[%c0_13, %c0_14, %c0_15] : memref<4x8x8xbf16, #tpu.memory_space<vmem>>, vector<1x8x8xbf16>
    %19 = vector.shape_cast %18 : vector<1x8x8xbf16> to vector<8x8xbf16>
    %cst_16 = arith.constant dense<0.000000e+00> : vector<8x8xf32>
    %20 = tpu.matmul %15, %17, %cst_16 {dimension_numbers = #tpu.dot_dimension_numbers<[1], [1], [0], [0], [0, 0, 1, 0], [], []>} : vector<8x8xbf16>, vector<8x8xbf16>, vector<8x8xf32> -> vector<8x8xf32>
    %cst_17 = arith.constant -1.000000e+09 : f32
    %21 = vector.broadcast %cst_17 : f32 to vector<8x8xf32>
    %22 = arith.select %14, %20, %21 : vector<8x8xi1>, vector<8x8xf32>
    %cst_18 = arith.constant dense<0xFF800000> : vector<8xf32>
    %23 = vector.multi_reduction <maximumf>, %22, %cst_18 [1] : vector<8x8xf32> to vector<8xf32>
    %24 = vector.shape_cast %23 : vector<8xf32> to vector<8x1xf32>
    %25 = vector.broadcast %24 : vector<8x1xf32> to vector<8x8xf32>
    %26 = arith.subf %22, %25 : vector<8x8xf32>
    %27 = math.exp %26 : vector<8x8xf32>
    %cst_19 = arith.constant dense<0.000000e+00> : vector<8xf32>
    %28 = vector.multi_reduction <add>, %27, %cst_19 [1] : vector<8x8xf32> to vector<8xf32>
    %29 = vector.shape_cast %28 : vector<8xf32> to vector<8x1xf32>
    %30 = arith.truncf %27 : vector<8x8xf32> to vector<8x8xbf16>
    %cst_20 = arith.constant dense<0.000000e+00> : vector<8x8xf32>
    %31 = tpu.matmul %30, %19, %cst_20 {dimension_numbers = #tpu.dot_dimension_numbers<[1], [0], [0], [1], [0, 0, 1, 1], [], []>} : vector<8x8xbf16>, vector<8x8xbf16>, vector<8x8xf32> -> vector<8x8xf32>
    %32 = tpu.reciprocal %29 {approx = true} : vector<8x1xf32> -> vector<8x1xf32>
    %33 = vector.broadcast %32 : vector<8x1xf32> to vector<8x8xf32>
    %34 = arith.mulf %31, %33 : vector<8x8xf32>
    %35 = arith.truncf %34 : vector<8x8xf32> to vector<8x8xbf16>
    %36 = vector.extract_strided_slice %10 {offsets = [0, 8], sizes = [8, 8], strides = [1, 1]} : vector<8x32xbf16> to vector<8x8xbf16>
    %c1 = arith.constant 1 : index
    %c0_21 = arith.constant 0 : index
    %c0_22 = arith.constant 0 : index
    %37 = vector.load %arg15[%c1, %c0_21, %c0_22] : memref<4x8x8xbf16, #tpu.memory_space<vmem>>, vector<1x8x8xbf16>
    %38 = vector.shape_cast %37 : vector<1x8x8xbf16> to vector<8x8xbf16>
    %c1_23 = arith.constant 1 : index
    %c0_24 = arith.constant 0 : index
    %c0_25 = arith.constant 0 : index
    %39 = vector.load %arg16[%c1_23, %c0_24, %c0_25] : memref<4x8x8xbf16, #tpu.memory_space<vmem>>, vector<1x8x8xbf16>
    %40 = vector.shape_cast %39 : vector<1x8x8xbf16> to vector<8x8xbf16>
    %cst_26 = arith.constant dense<0.000000e+00> : vector<8x8xf32>
    %41 = tpu.matmul %36, %38, %cst_26 {dimension_numbers = #tpu.dot_dimension_numbers<[1], [1], [0], [0], [0, 0, 1, 0], [], []>} : vector<8x8xbf16>, vector<8x8xbf16>, vector<8x8xf32> -> vector<8x8xf32>
    %cst_27 = arith.constant -1.000000e+09 : f32
    %42 = vector.broadcast %cst_27 : f32 to vector<8x8xf32>
    %43 = arith.select %14, %41, %42 : vector<8x8xi1>, vector<8x8xf32>
    %cst_28 = arith.constant dense<0xFF800000> : vector<8xf32>
    %44 = vector.multi_reduction <maximumf>, %43, %cst_28 [1] : vector<8x8xf32> to vector<8xf32>
    %45 = vector.shape_cast %44 : vector<8xf32> to vector<8x1xf32>
    %46 = vector.broadcast %45 : vector<8x1xf32> to vector<8x8xf32>
    %47 = arith.subf %43, %46 : vector<8x8xf32>
    %48 = math.exp %47 : vector<8x8xf32>
    %cst_29 = arith.constant dense<0.000000e+00> : vector<8xf32>
    %49 = vector.multi_reduction <add>, %48, %cst_29 [1] : vector<8x8xf32> to vector<8xf32>
    %50 = vector.shape_cast %49 : vector<8xf32> to vector<8x1xf32>
    %51 = arith.truncf %48 : vector<8x8xf32> to vector<8x8xbf16>
    %cst_30 = arith.constant dense<0.000000e+00> : vector<8x8xf32>
    %52 = tpu.matmul %51, %40, %cst_30 {dimension_numbers = #tpu.dot_dimension_numbers<[1], [0], [0], [1], [0, 0, 1, 1], [], []>} : vector<8x8xbf16>, vector<8x8xbf16>, vector<8x8xf32> -> vector<8x8xf32>
    %53 = tpu.reciprocal %50 {approx = true} : vector<8x1xf32> -> vector<8x1xf32>
    %54 = vector.broadcast %53 : vector<8x1xf32> to vector<8x8xf32>
    %55 = arith.mulf %52, %54 : vector<8x8xf32>
    %56 = arith.truncf %55 : vector<8x8xf32> to vector<8x8xbf16>
    %57 = vector.extract_strided_slice %10 {offsets = [0, 16], sizes = [8, 8], strides = [1, 1]} : vector<8x32xbf16> to vector<8x8xbf16>
    %c2 = arith.constant 2 : index
    %c0_31 = arith.constant 0 : index
    %c0_32 = arith.constant 0 : index
    %58 = vector.load %arg15[%c2, %c0_31, %c0_32] : memref<4x8x8xbf16, #tpu.memory_space<vmem>>, vector<1x8x8xbf16>
    %59 = vector.shape_cast %58 : vector<1x8x8xbf16> to vector<8x8xbf16>
    %c2_33 = arith.constant 2 : index
    %c0_34 = arith.constant 0 : index
    %c0_35 = arith.constant 0 : index
    %60 = vector.load %arg16[%c2_33, %c0_34, %c0_35] : memref<4x8x8xbf16, #tpu.memory_space<vmem>>, vector<1x8x8xbf16>
    %61 = vector.shape_cast %60 : vector<1x8x8xbf16> to vector<8x8xbf16>
    %cst_36 = arith.constant dense<0.000000e+00> : vector<8x8xf32>
    %62 = tpu.matmul %57, %59, %cst_36 {dimension_numbers = #tpu.dot_dimension_numbers<[1], [1], [0], [0], [0, 0, 1, 0], [], []>} : vector<8x8xbf16>, vector<8x8xbf16>, vector<8x8xf32> -> vector<8x8xf32>
    %cst_37 = arith.constant -1.000000e+09 : f32
    %63 = vector.broadcast %cst_37 : f32 to vector<8x8xf32>
    %64 = arith.select %14, %62, %63 : vector<8x8xi1>, vector<8x8xf32>
    %cst_38 = arith.constant dense<0xFF800000> : vector<8xf32>
    %65 = vector.multi_reduction <maximumf>, %64, %cst_38 [1] : vector<8x8xf32> to vector<8xf32>
    %66 = vector.shape_cast %65 : vector<8xf32> to vector<8x1xf32>
    %67 = vector.broadcast %66 : vector<8x1xf32> to vector<8x8xf32>
    %68 = arith.subf %64, %67 : vector<8x8xf32>
    %69 = math.exp %68 : vector<8x8xf32>
    %cst_39 = arith.constant dense<0.000000e+00> : vector<8xf32>
    %70 = vector.multi_reduction <add>, %69, %cst_39 [1] : vector<8x8xf32> to vector<8xf32>
    %71 = vector.shape_cast %70 : vector<8xf32> to vector<8x1xf32>
    %72 = arith.truncf %69 : vector<8x8xf32> to vector<8x8xbf16>
    %cst_40 = arith.constant dense<0.000000e+00> : vector<8x8xf32>
    %73 = tpu.matmul %72, %61, %cst_40 {dimension_numbers = #tpu.dot_dimension_numbers<[1], [0], [0], [1], [0, 0, 1, 1], [], []>} : vector<8x8xbf16>, vector<8x8xbf16>, vector<8x8xf32> -> vector<8x8xf32>
    %74 = tpu.reciprocal %71 {approx = true} : vector<8x1xf32> -> vector<8x1xf32>
    %75 = vector.broadcast %74 : vector<8x1xf32> to vector<8x8xf32>
    %76 = arith.mulf %73, %75 : vector<8x8xf32>
    %77 = arith.truncf %76 : vector<8x8xf32> to vector<8x8xbf16>
    %78 = vector.extract_strided_slice %10 {offsets = [0, 24], sizes = [8, 8], strides = [1, 1]} : vector<8x32xbf16> to vector<8x8xbf16>
    %c3 = arith.constant 3 : index
    %c0_41 = arith.constant 0 : index
    %c0_42 = arith.constant 0 : index
    %79 = vector.load %arg15[%c3, %c0_41, %c0_42] : memref<4x8x8xbf16, #tpu.memory_space<vmem>>, vector<1x8x8xbf16>
    %80 = vector.shape_cast %79 : vector<1x8x8xbf16> to vector<8x8xbf16>
    %c3_43 = arith.constant 3 : index
    %c0_44 = arith.constant 0 : index
    %c0_45 = arith.constant 0 : index
    %81 = vector.load %arg16[%c3_43, %c0_44, %c0_45] : memref<4x8x8xbf16, #tpu.memory_space<vmem>>, vector<1x8x8xbf16>
    %82 = vector.shape_cast %81 : vector<1x8x8xbf16> to vector<8x8xbf16>
    %cst_46 = arith.constant dense<0.000000e+00> : vector<8x8xf32>
    %83 = tpu.matmul %78, %80, %cst_46 {dimension_numbers = #tpu.dot_dimension_numbers<[1], [1], [0], [0], [0, 0, 1, 0], [], []>} : vector<8x8xbf16>, vector<8x8xbf16>, vector<8x8xf32> -> vector<8x8xf32>
    %cst_47 = arith.constant -1.000000e+09 : f32
    %84 = vector.broadcast %cst_47 : f32 to vector<8x8xf32>
    %85 = arith.select %14, %83, %84 : vector<8x8xi1>, vector<8x8xf32>
    %cst_48 = arith.constant dense<0xFF800000> : vector<8xf32>
    %86 = vector.multi_reduction <maximumf>, %85, %cst_48 [1] : vector<8x8xf32> to vector<8xf32>
    %87 = vector.shape_cast %86 : vector<8xf32> to vector<8x1xf32>
    %88 = vector.broadcast %87 : vector<8x1xf32> to vector<8x8xf32>
    %89 = arith.subf %85, %88 : vector<8x8xf32>
    %90 = math.exp %89 : vector<8x8xf32>
    %cst_49 = arith.constant dense<0.000000e+00> : vector<8xf32>
    %91 = vector.multi_reduction <add>, %90, %cst_49 [1] : vector<8x8xf32> to vector<8xf32>
    %92 = vector.shape_cast %91 : vector<8xf32> to vector<8x1xf32>
    %93 = arith.truncf %90 : vector<8x8xf32> to vector<8x8xbf16>
    %cst_50 = arith.constant dense<0.000000e+00> : vector<8x8xf32>
    %94 = tpu.matmul %93, %82, %cst_50 {dimension_numbers = #tpu.dot_dimension_numbers<[1], [0], [0], [1], [0, 0, 1, 1], [], []>} : vector<8x8xbf16>, vector<8x8xbf16>, vector<8x8xf32> -> vector<8x8xf32>
    %95 = tpu.reciprocal %92 {approx = true} : vector<8x1xf32> -> vector<8x1xf32>
    %96 = vector.broadcast %95 : vector<8x1xf32> to vector<8x8xf32>
    %97 = arith.mulf %94, %96 : vector<8x8xf32>
    %98 = arith.truncf %97 : vector<8x8xf32> to vector<8x8xbf16>
    %99 = tpu.concatenate %35, %56, %77, %98 in 1 : vector<8x8xbf16>, vector<8x8xbf16>, vector<8x8xbf16>, vector<8x8xbf16> -> vector<8x32xbf16>
    %c0_51 = arith.constant 0 : index
    %c0_52 = arith.constant 0 : index
    %100 = vector.load %arg12[%c0_51, %c0_52] : memref<32x32xbf16, #tpu.memory_space<vmem>>, vector<32x32xbf16>
    %cst_53 = arith.constant dense<0.000000e+00> : vector<8x32xf32>
    %101 = tpu.matmul %99, %100, %cst_53 {dimension_numbers = #tpu.dot_dimension_numbers<[1], [0], [0], [1], [0, 0, 1, 1], [], []>} : vector<8x32xbf16>, vector<32x32xbf16>, vector<8x32xf32> -> vector<8x32xf32>
    %c0_54 = arith.constant 0 : index
    %c0_55 = arith.constant 0 : index
    %102 = vector.load %arg13[%c0_54, %c0_55] : memref<1x32xf32, #tpu.memory_space<vmem>>, vector<1x32xf32>
    %103 = vector.broadcast %102 : vector<1x32xf32> to vector<8x32xf32>
    %104 = arith.addf %101, %103 : vector<8x32xf32>
    %c0_56 = arith.constant 0 : index
    %c0_57 = arith.constant 0 : index
    %c0_58 = arith.constant 0 : index
    %105 = vector.load %arg14[%c0_56, %c0_57, %c0_58] : memref<1x8x32xf32, #tpu.memory_space<vmem>>, vector<1x8x32xf32>
    %106 = vector.shape_cast %105 : vector<1x8x32xf32> to vector<8x32xf32>
    %107 = vector.shape_cast %104 : vector<8x32xf32> to vector<1x8x32xf32>
    tpu.vector_store %arg14[%c0_56, %c0_57, %c0_58], %107 {strides = array<i32>} : memref<1x8x32xf32, #tpu.memory_space<vmem>>, vector<1x8x32xf32>,
    return
  }
  func.func @transform_0(%arg0: i32, %arg1: i32) -> (i32, i32, i32) {
    %c0_i32 = arith.constant 0 : i32
    %c0_i32_0 = arith.constant 0 : i32
    return %arg0, %arg1, %c0_i32 : i32, i32, i32
  }
  func.func @transform_1(%arg0: i32, %arg1: i32) -> (i32, i32, i32) {
    %c0_i32 = arith.constant 0 : i32
    %c0_i32_0 = arith.constant 0 : i32
    %c0_i32_1 = arith.constant 0 : i32
    return %arg0, %c0_i32, %c0_i32_0 : i32, i32, i32
  }
  func.func @transform_2(%arg0: i32, %arg1: i32) -> (i32, i32, i32) {
    %c0_i32 = arith.constant 0 : i32
    %c0_i32_0 = arith.constant 0 : i32
    %c0_i32_1 = arith.constant 0 : i32
    return %arg0, %c0_i32, %c0_i32_0 : i32, i32, i32
  }
  func.func @transform_3(%arg0: i32, %arg1: i32) -> (i32, i32, i32) {
    %c0_i32 = arith.constant 0 : i32
    %c0_i32_0 = arith.constant 0 : i32
    return %arg0, %arg1, %c0_i32 : i32, i32, i32
  }
  func.func @transform_4(%arg0: i32, %arg1: i32) -> (i32, i32) {
    %c0_i32 = arith.constant 0 : i32
    %c0_i32_0 = arith.constant 0 : i32
    %c0_i32_1 = arith.constant 0 : i32
    return %c0_i32, %c0_i32_0 : i32, i32
  }
  func.func @transform_5(%arg0: i32, %arg1: i32) -> (i32, i32) {
    %c0_i32 = arith.constant 0 : i32
    %c0_i32_0 = arith.constant 0 : i32
    %c0_i32_1 = arith.constant 0 : i32
    return %c0_i32, %c0_i32_0 : i32, i32
  }
  func.func @transform_6(%arg0: i32, %arg1: i32) -> (i32, i32) {
    %c0_i32 = arith.constant 0 : i32
    %c0_i32_0 = arith.constant 0 : i32
    %c0_i32_1 = arith.constant 0 : i32
    return %c0_i32, %c0_i32_0 : i32, i32
  }
  func.func @transform_7(%arg0: i32, %arg1: i32) -> (i32, i32) {
    %c0_i32 = arith.constant 0 : i32
    %c0_i32_0 = arith.constant 0 : i32
    %c0_i32_1 = arith.constant 0 : i32
    return %c0_i32, %c0_i32_0 : i32, i32
  }
  func.func @transform_8(%arg0: i32, %arg1: i32) -> (i32, i32) {
    %c0_i32 = arith.constant 0 : i32
    %c0_i32_0 = arith.constant 0 : i32
    %c0_i32_1 = arith.constant 0 : i32
    return %c0_i32, %c0_i32_0 : i32, i32
  }
  func.func @transform_9(%arg0: i32, %arg1: i32) -> (i32, i32) {
    %c0_i32 = arith.constant 0 : i32
    %c0_i32_0 = arith.constant 0 : i32
    %c0_i32_1 = arith.constant 0 : i32
    return %c0_i32, %c0_i32_0 : i32, i32
  }
  func.func @transform_10(%arg0: i32, %arg1: i32) -> (i32, i32) {
    %c0_i32 = arith.constant 0 : i32
    %c0_i32_0 = arith.constant 0 : i32
    %c0_i32_1 = arith.constant 0 : i32
    return %c0_i32, %c0_i32_0 : i32, i32
  }
  func.func @transform_11(%arg0: i32, %arg1: i32) -> (i32, i32) {
    %c0_i32 = arith.constant 0 : i32
    %c0_i32_0 = arith.constant 0 : i32
    %c0_i32_1 = arith.constant 0 : i32
    return %c0_i32, %c0_i32_0 : i32, i32
  }
  func.func @transform_12(%arg0: i32, %arg1: i32) -> (i32, i32, i32) {
    %c0_i32 = arith.constant 0 : i32
    %c0_i32_0 = arith.constant 0 : i32
    return %arg0, %arg1, %c0_i32 : i32, i32, i32
  }
}

module attributes {stable_mosaic.version = 11 : i64} {
  func.func @mha_kernel(%arg0: i32, %arg1: i32, %arg2: memref<1x8x32xbf16, #tpu.memory_space<vmem>>, %arg3: memref<1x8x32xbf16, #tpu.memory_space<vmem>>, %arg4: memref<1x8x32xbf16, #tpu.memory_space<vmem>>, %arg5: memref<1x8x8xi8, #tpu.memory_space<vmem>>, %arg6: memref<32x32xbf16, #tpu.memory_space<vmem>>, %arg7: memref<1x32xf32, #tpu.memory_space<vmem>>, %arg8: memref<32x32xbf16, #tpu.memory_space<vmem>>, %arg9: memref<1x32xf32, #tpu.memory_space<vmem>>, %arg10: memref<32x32xbf16, #tpu.memory_space<vmem>>, %arg11: memref<1x32xf32, #tpu.memory_space<vmem>>, %arg12: memref<32x32xbf16, #tpu.memory_space<vmem>>, %arg13: memref<1x32xf32, #tpu.memory_space<vmem>>, %arg14: memref<1x8x32xf32, #tpu.memory_space<vmem>>, %arg15: memref<4x8x8xbf16, #tpu.memory_space<vmem>>, %arg16: memref<4x8x8xbf16, #tpu.memory_space<vmem>>, %arg17: memref<8x32xbf16, #tpu.memory_space<vmem>>) attributes {dimension_semantics = [#tpu.dimension_semantics<parallel>, #tpu.dimension_semantics<arbitrary>], iteration_bounds = array<i64: 2, 1>, scalar_prefetch = 0 : i64, scratch_operands = 3 : i64, tpu.core_type = #tpu.core_type<tc>, window_params = [{transform_indices = @transform_0, window_bounds = array<i64: 1, 8, 32>}, {pipeline_mode = #tpu.pipeline_mode<synchronous>, transform_indices = @transform_1, window_bounds = array<i64: 1, 8, 32>}, {pipeline_mode = #tpu.pipeline_mode<synchronous>, transform_indices = @transform_2, window_bounds = array<i64: 1, 8, 32>}, {transform_indices = @transform_3, window_bounds = array<i64: 1, 8, 8>}, {pipeline_mode = #tpu.pipeline_mode<synchronous>, transform_indices = @transform_4, window_bounds = array<i64: 32, 32>}, {pipeline_mode = #tpu.pipeline_mode<synchronous>, transform_indices = @transform_5, window_bounds = array<i64: 1, 32>}, {pipeline_mode = #tpu.pipeline_mode<synchronous>, transform_indices = @transform_6, window_bounds = array<i64: 32, 32>}, {pipeline_mode = #tpu.pipeline_mode<synchronous>, transform_indices = @transform_7, window_bounds = array<i64: 1, 32>}, {pipeline_mode = #tpu.pipeline_mode<synchronous>, transform_indices = @transform_8, window_bounds = array<i64: 32, 32>}, {pipeline_mode = #tpu.pipeline_mode<synchronous>, transform_indices = @transform_9, window_bounds = array<i64: 1, 32>}, {pipeline_mode = #tpu.pipeline_mode<synchronous>, transform_indices = @transform_10, window_bounds = array<i64: 32, 32>}, {pipeline_mode = #tpu.pipeline_mode<synchronous>, transform_indices = @transform_11, window_bounds = array<i64: 1, 32>}, {transform_indices = @transform_12, window_bounds = array<i64: 1, 8, 32>}]} {
    %c0_i32 = arith.constant 0 : i32
    %0 = arith.cmpi eq, %arg1, %c0_i32 : i32
    %1 = arith.extui %0 : i1 to i32
    %c0_i32_0 = arith.constant 0 : i32
    %2 = arith.cmpi ne, %1, %c0_i32_0 : i32
    scf.if %2 {
      %c0_66 = arith.constant 0 : index
      %c0_67 = arith.constant 0 : index
      %c0_68 = arith.constant 0 : index
      %112 = vector.load %arg3[%c0_66, %c0_67, %c0_68] : memref<1x8x32xbf16, #tpu.memory_space<vmem>>, vector<1x8x32xbf16>
      %113 = vector.shape_cast %112 : vector<1x8x32xbf16> to vector<8x32xbf16>
      %c0_69 = arith.constant 0 : index
      %c0_70 = arith.constant 0 : index
      %114 = vector.load %arg8[%c0_69, %c0_70] : memref<32x32xbf16, #tpu.memory_space<vmem>>, vector<32x32xbf16>
      %cst_71 = arith.constant dense<0.000000e+00> : vector<8x32xf32>
      %115 = tpu.matmul %113, %114, %cst_71 {dimension_numbers = #tpu.dot_dimension_numbers<[1], [0], [0], [1], [0, 0, 1, 1], [], []>} : vector<8x32xbf16>, vector<32x32xbf16>, vector<8x32xf32> -> vector<8x32xf32>
      %c0_72 = arith.constant 0 : index
      %c0_73 = arith.constant 0 : index
      %116 = vector.load %arg9[%c0_72, %c0_73] : memref<1x32xf32, #tpu.memory_space<vmem>>, vector<1x32xf32>
      %117 = vector.broadcast %116 : vector<1x32xf32> to vector<8x32xf32>
      %118 = arith.addf %115, %117 : vector<8x32xf32>
      %119 = arith.truncf %118 : vector<8x32xf32> to vector<8x32xbf16>
      %c0_74 = arith.constant 0 : index
      %c0_75 = arith.constant 0 : index
      %c0_76 = arith.constant 0 : index
      %120 = vector.load %arg4[%c0_74, %c0_75, %c0_76] : memref<1x8x32xbf16, #tpu.memory_space<vmem>>, vector<1x8x32xbf16>
      %121 = vector.shape_cast %120 : vector<1x8x32xbf16> to vector<8x32xbf16>
      %c0_77 = arith.constant 0 : index
      %c0_78 = arith.constant 0 : index
      %122 = vector.load %arg10[%c0_77, %c0_78] : memref<32x32xbf16, #tpu.memory_space<vmem>>, vector<32x32xbf16>
      %cst_79 = arith.constant dense<0.000000e+00> : vector<8x32xf32>
      %123 = tpu.matmul %121, %122, %cst_79 {dimension_numbers = #tpu.dot_dimension_numbers<[1], [0], [0], [1], [0, 0, 1, 1], [], []>} : vector<8x32xbf16>, vector<32x32xbf16>, vector<8x32xf32> -> vector<8x32xf32>
      %c0_80 = arith.constant 0 : index
      %c0_81 = arith.constant 0 : index
      %124 = vector.load %arg11[%c0_80, %c0_81] : memref<1x32xf32, #tpu.memory_space<vmem>>, vector<1x32xf32>
      %125 = vector.broadcast %124 : vector<1x32xf32> to vector<8x32xf32>
      %126 = arith.addf %123, %125 : vector<8x32xf32>
      %127 = arith.truncf %126 : vector<8x32xf32> to vector<8x32xbf16>
      %128 = vector.extract_strided_slice %119 {offsets = [0, 0], sizes = [8, 8], strides = [1, 1]} : vector<8x32xbf16> to vector<8x8xbf16>
      %c0_82 = arith.constant 0 : index
      %c0_83 = arith.constant 0 : index
      %c0_84 = arith.constant 0 : index
      %129 = vector.load %arg15[%c0_82, %c0_83, %c0_84] : memref<4x8x8xbf16, #tpu.memory_space<vmem>>, vector<1x8x8xbf16>
      %130 = vector.shape_cast %129 : vector<1x8x8xbf16> to vector<8x8xbf16>
      %131 = vector.shape_cast %128 : vector<8x8xbf16> to vector<1x8x8xbf16>
      tpu.vector_store %arg15[%c0_82, %c0_83, %c0_84], %131 {strides = array<i32>} : memref<4x8x8xbf16, #tpu.memory_space<vmem>>, vector<1x8x8xbf16>,
      %132 = vector.extract_strided_slice %127 {offsets = [0, 0], sizes = [8, 8], strides = [1, 1]} : vector<8x32xbf16> to vector<8x8xbf16>
      %c0_85 = arith.constant 0 : index
      %c0_86 = arith.constant 0 : index
      %c0_87 = arith.constant 0 : index
      %133 = vector.load %arg16[%c0_85, %c0_86, %c0_87] : memref<4x8x8xbf16, #tpu.memory_space<vmem>>, vector<1x8x8xbf16>
      %134 = vector.shape_cast %133 : vector<1x8x8xbf16> to vector<8x8xbf16>
      %135 = vector.shape_cast %132 : vector<8x8xbf16> to vector<1x8x8xbf16>
      tpu.vector_store %arg16[%c0_85, %c0_86, %c0_87], %135 {strides = array<i32>} : memref<4x8x8xbf16, #tpu.memory_space<vmem>>, vector<1x8x8xbf16>,
      %136 = vector.extract_strided_slice %119 {offsets = [0, 8], sizes = [8, 8], strides = [1, 1]} : vector<8x32xbf16> to vector<8x8xbf16>
      %c1_88 = arith.constant 1 : index
      %c0_89 = arith.constant 0 : index
      %c0_90 = arith.constant 0 : index
      %137 = vector.load %arg15[%c1_88, %c0_89, %c0_90] : memref<4x8x8xbf16, #tpu.memory_space<vmem>>, vector<1x8x8xbf16>
      %138 = vector.shape_cast %137 : vector<1x8x8xbf16> to vector<8x8xbf16>
      %139 = vector.shape_cast %136 : vector<8x8xbf16> to vector<1x8x8xbf16>
      tpu.vector_store %arg15[%c1_88, %c0_89, %c0_90], %139 {strides = array<i32>} : memref<4x8x8xbf16, #tpu.memory_space<vmem>>, vector<1x8x8xbf16>,
      %140 = vector.extract_strided_slice %127 {offsets = [0, 8], sizes = [8, 8], strides = [1, 1]} : vector<8x32xbf16> to vector<8x8xbf16>
      %c1_91 = arith.constant 1 : index
      %c0_92 = arith.constant 0 : index
      %c0_93 = arith.constant 0 : index
      %141 = vector.load %arg16[%c1_91, %c0_92, %c0_93] : memref<4x8x8xbf16, #tpu.memory_space<vmem>>, vector<1x8x8xbf16>
      %142 = vector.shape_cast %141 : vector<1x8x8xbf16> to vector<8x8xbf16>
      %143 = vector.shape_cast %140 : vector<8x8xbf16> to vector<1x8x8xbf16>
      tpu.vector_store %arg16[%c1_91, %c0_92, %c0_93], %143 {strides = array<i32>} : memref<4x8x8xbf16, #tpu.memory_space<vmem>>, vector<1x8x8xbf16>,
      %144 = vector.extract_strided_slice %119 {offsets = [0, 16], sizes = [8, 8], strides = [1, 1]} : vector<8x32xbf16> to vector<8x8xbf16>
      %c2_94 = arith.constant 2 : index
      %c0_95 = arith.constant 0 : index
      %c0_96 = arith.constant 0 : index
      %145 = vector.load %arg15[%c2_94, %c0_95, %c0_96] : memref<4x8x8xbf16, #tpu.memory_space<vmem>>, vector<1x8x8xbf16>
      %146 = vector.shape_cast %145 : vector<1x8x8xbf16> to vector<8x8xbf16>
      %147 = vector.shape_cast %144 : vector<8x8xbf16> to vector<1x8x8xbf16>
      tpu.vector_store %arg15[%c2_94, %c0_95, %c0_96], %147 {strides = array<i32>} : memref<4x8x8xbf16, #tpu.memory_space<vmem>>, vector<1x8x8xbf16>,
      %148 = vector.extract_strided_slice %127 {offsets = [0, 16], sizes = [8, 8], strides = [1, 1]} : vector<8x32xbf16> to vector<8x8xbf16>
      %c2_97 = arith.constant 2 : index
      %c0_98 = arith.constant 0 : index
      %c0_99 = arith.constant 0 : index
      %149 = vector.load %arg16[%c2_97, %c0_98, %c0_99] : memref<4x8x8xbf16, #tpu.memory_space<vmem>>, vector<1x8x8xbf16>
      %150 = vector.shape_cast %149 : vector<1x8x8xbf16> to vector<8x8xbf16>
      %151 = vector.shape_cast %148 : vector<8x8xbf16> to vector<1x8x8xbf16>
      tpu.vector_store %arg16[%c2_97, %c0_98, %c0_99], %151 {strides = array<i32>} : memref<4x8x8xbf16, #tpu.memory_space<vmem>>, vector<1x8x8xbf16>,
      %152 = vector.extract_strided_slice %119 {offsets = [0, 24], sizes = [8, 8], strides = [1, 1]} : vector<8x32xbf16> to vector<8x8xbf16>
      %c3_100 = arith.constant 3 : index
      %c0_101 = arith.constant 0 : index
      %c0_102 = arith.constant 0 : index
      %153 = vector.load %arg15[%c3_100, %c0_101, %c0_102] : memref<4x8x8xbf16, #tpu.memory_space<vmem>>, vector<1x8x8xbf16>
      %154 = vector.shape_cast %153 : vector<1x8x8xbf16> to vector<8x8xbf16>
      %155 = vector.shape_cast %152 : vector<8x8xbf16> to vector<1x8x8xbf16>
      tpu.vector_store %arg15[%c3_100, %c0_101, %c0_102], %155 {strides = array<i32>} : memref<4x8x8xbf16, #tpu.memory_space<vmem>>, vector<1x8x8xbf16>,
      %156 = vector.extract_strided_slice %127 {offsets = [0, 24], sizes = [8, 8], strides = [1, 1]} : vector<8x32xbf16> to vector<8x8xbf16>
      %c3_103 = arith.constant 3 : index
      %c0_104 = arith.constant 0 : index
      %c0_105 = arith.constant 0 : index
      %157 = vector.load %arg16[%c3_103, %c0_104, %c0_105] : memref<4x8x8xbf16, #tpu.memory_space<vmem>>, vector<1x8x8xbf16>
      %158 = vector.shape_cast %157 : vector<1x8x8xbf16> to vector<8x8xbf16>
      %159 = vector.shape_cast %156 : vector<8x8xbf16> to vector<1x8x8xbf16>
      tpu.vector_store %arg16[%c3_103, %c0_104, %c0_105], %159 {strides = array<i32>} : memref<4x8x8xbf16, #tpu.memory_space<vmem>>, vector<1x8x8xbf16>,
    } else {
    }
    %c0 = arith.constant 0 : index
    %c0_1 = arith.constant 0 : index
    %c0_2 = arith.constant 0 : index
    %3 = vector.load %arg2[%c0, %c0_1, %c0_2] : memref<1x8x32xbf16, #tpu.memory_space<vmem>>, vector<1x8x32xbf16>
    %4 = vector.shape_cast %3 : vector<1x8x32xbf16> to vector<8x32xbf16>
    %c0_3 = arith.constant 0 : index
    %c0_4 = arith.constant 0 : index
    %5 = vector.load %arg6[%c0_3, %c0_4] : memref<32x32xbf16, #tpu.memory_space<vmem>>, vector<32x32xbf16>
    %cst = arith.constant dense<0.000000e+00> : vector<8x32xf32>
    %6 = tpu.matmul %4, %5, %cst {dimension_numbers = #tpu.dot_dimension_numbers<[1], [0], [0], [1], [0, 0, 1, 1], [], []>} : vector<8x32xbf16>, vector<32x32xbf16>, vector<8x32xf32> -> vector<8x32xf32>
    %c0_5 = arith.constant 0 : index
    %c0_6 = arith.constant 0 : index
    %7 = vector.load %arg7[%c0_5, %c0_6] : memref<1x32xf32, #tpu.memory_space<vmem>>, vector<1x32xf32>
    %8 = vector.broadcast %7 : vector<1x32xf32> to vector<8x32xf32>
    %9 = arith.addf %6, %8 : vector<8x32xf32>
    %10 = arith.truncf %9 : vector<8x32xf32> to vector<8x32xbf16>
    %c0_7 = arith.constant 0 : index
    %c0_8 = arith.constant 0 : index
    %c0_9 = arith.constant 0 : index
    %11 = vector.load %arg5[%c0_7, %c0_8, %c0_9] : memref<1x8x8xi8, #tpu.memory_space<vmem>>, vector<1x8x8xi8>
    %12 = vector.shape_cast %11 : vector<1x8x8xi8> to vector<8x8xi8>
    %c0_i8 = arith.constant 0 : i8
    %13 = vector.broadcast %c0_i8 : i8 to vector<8x8xi8>
    %14 = arith.cmpi ne, %12, %13 : vector<8x8xi8>
    %15 = vector.extract_strided_slice %10 {offsets = [0, 0], sizes = [8, 8], strides = [1, 1]} : vector<8x32xbf16> to vector<8x8xbf16>
    %c0_10 = arith.constant 0 : index
    %c0_11 = arith.constant 0 : index
    %c0_12 = arith.constant 0 : index
    %16 = vector.load %arg15[%c0_10, %c0_11, %c0_12] : memref<4x8x8xbf16, #tpu.memory_space<vmem>>, vector<1x8x8xbf16>
    %17 = vector.shape_cast %16 : vector<1x8x8xbf16> to vector<8x8xbf16>
    %c0_13 = arith.constant 0 : index
    %c0_14 = arith.constant 0 : index
    %c0_15 = arith.constant 0 : index
    %18 = vector.load %arg16[%c0_13, %c0_14, %c0_15] : memref<4x8x8xbf16, #tpu.memory_space<vmem>>, vector<1x8x8xbf16>
    %19 = vector.shape_cast %18 : vector<1x8x8xbf16> to vector<8x8xbf16>
    %cst_16 = arith.constant dense<0.000000e+00> : vector<8x8xf32>
    %20 = tpu.matmul %15, %17, %cst_16 {dimension_numbers = #tpu.dot_dimension_numbers<[1], [1], [0], [0], [0, 0, 1, 0], [], []>} : vector<8x8xbf16>, vector<8x8xbf16>, vector<8x8xf32> -> vector<8x8xf32>
    %cst_17 = arith.constant -1.000000e+09 : f32
    %21 = vector.broadcast %cst_17 : f32 to vector<8x8xf32>
    %22 = arith.select %14, %20, %21 : vector<8x8xi1>, vector<8x8xf32>
    %cst_18 = arith.constant dense<0xFF800000> : vector<8xf32>
    %23 = vector.multi_reduction <maximumf>, %22, %cst_18 [1] : vector<8x8xf32> to vector<8xf32>
    %24 = vector.shape_cast %23 : vector<8xf32> to vector<8x1xf32>
    %25 = vector.broadcast %24 : vector<8x1xf32> to vector<8x8xf32>
    %26 = arith.subf %22, %25 : vector<8x8xf32>
    %27 = math.exp %26 : vector<8x8xf32>
    %cst_19 = arith.constant dense<0.000000e+00> : vector<8xf32>
    %28 = vector.multi_reduction <add>, %27, %cst_19 [1] : vector<8x8xf32> to vector<8xf32>
    %29 = vector.shape_cast %28 : vector<8xf32> to vector<8x1xf32>
    %30 = arith.truncf %27 : vector<8x8xf32> to vector<8x8xbf16>
    %cst_20 = arith.constant dense<0.000000e+00> : vector<8x8xf32>
    %31 = tpu.matmul %30, %19, %cst_20 {dimension_numbers = #tpu.dot_dimension_numbers<[1], [0], [0], [1], [0, 0, 1, 1], [], []>} : vector<8x8xbf16>, vector<8x8xbf16>, vector<8x8xf32> -> vector<8x8xf32>
    %32 = tpu.reciprocal %29 {approx = true} : vector<8x1xf32> -> vector<8x1xf32>
    %33 = vector.broadcast %32 : vector<8x1xf32> to vector<8x8xf32>
    %34 = arith.mulf %31, %33 : vector<8x8xf32>
    %35 = arith.truncf %34 : vector<8x8xf32> to vector<8x8xbf16>
    %c0_21 = arith.constant 0 : index
    %c0_22 = arith.constant 0 : index
    %36 = vector.load %arg17[%c0_21, %c0_22] : memref<8x32xbf16, #tpu.memory_space<vmem>>, vector<8x8xbf16>
    tpu.vector_store %arg17[%c0_21, %c0_22], %35 {strides = array<i32>} : memref<8x32xbf16, #tpu.memory_space<vmem>>, vector<8x8xbf16>,
    %37 = vector.extract_strided_slice %10 {offsets = [0, 8], sizes = [8, 8], strides = [1, 1]} : vector<8x32xbf16> to vector<8x8xbf16>
    %c1 = arith.constant 1 : index
    %c0_23 = arith.constant 0 : index
    %c0_24 = arith.constant 0 : index
    %38 = vector.load %arg15[%c1, %c0_23, %c0_24] : memref<4x8x8xbf16, #tpu.memory_space<vmem>>, vector<1x8x8xbf16>
    %39 = vector.shape_cast %38 : vector<1x8x8xbf16> to vector<8x8xbf16>
    %c1_25 = arith.constant 1 : index
    %c0_26 = arith.constant 0 : index
    %c0_27 = arith.constant 0 : index
    %40 = vector.load %arg16[%c1_25, %c0_26, %c0_27] : memref<4x8x8xbf16, #tpu.memory_space<vmem>>, vector<1x8x8xbf16>
    %41 = vector.shape_cast %40 : vector<1x8x8xbf16> to vector<8x8xbf16>
    %cst_28 = arith.constant dense<0.000000e+00> : vector<8x8xf32>
    %42 = tpu.matmul %37, %39, %cst_28 {dimension_numbers = #tpu.dot_dimension_numbers<[1], [1], [0], [0], [0, 0, 1, 0], [], []>} : vector<8x8xbf16>, vector<8x8xbf16>, vector<8x8xf32> -> vector<8x8xf32>
    %cst_29 = arith.constant -1.000000e+09 : f32
    %43 = vector.broadcast %cst_29 : f32 to vector<8x8xf32>
    %44 = arith.select %14, %42, %43 : vector<8x8xi1>, vector<8x8xf32>
    %cst_30 = arith.constant dense<0xFF800000> : vector<8xf32>
    %45 = vector.multi_reduction <maximumf>, %44, %cst_30 [1] : vector<8x8xf32> to vector<8xf32>
    %46 = vector.shape_cast %45 : vector<8xf32> to vector<8x1xf32>
    %47 = vector.broadcast %46 : vector<8x1xf32> to vector<8x8xf32>
    %48 = arith.subf %44, %47 : vector<8x8xf32>
    %49 = math.exp %48 : vector<8x8xf32>
    %cst_31 = arith.constant dense<0.000000e+00> : vector<8xf32>
    %50 = vector.multi_reduction <add>, %49, %cst_31 [1] : vector<8x8xf32> to vector<8xf32>
    %51 = vector.shape_cast %50 : vector<8xf32> to vector<8x1xf32>
    %52 = arith.truncf %49 : vector<8x8xf32> to vector<8x8xbf16>
    %cst_32 = arith.constant dense<0.000000e+00> : vector<8x8xf32>
    %53 = tpu.matmul %52, %41, %cst_32 {dimension_numbers = #tpu.dot_dimension_numbers<[1], [0], [0], [1], [0, 0, 1, 1], [], []>} : vector<8x8xbf16>, vector<8x8xbf16>, vector<8x8xf32> -> vector<8x8xf32>
    %54 = tpu.reciprocal %51 {approx = true} : vector<8x1xf32> -> vector<8x1xf32>
    %55 = vector.broadcast %54 : vector<8x1xf32> to vector<8x8xf32>
    %56 = arith.mulf %53, %55 : vector<8x8xf32>
    %57 = arith.truncf %56 : vector<8x8xf32> to vector<8x8xbf16>
    %c0_33 = arith.constant 0 : index
    %c8 = arith.constant 8 : index
    %58 = vector.load %arg17[%c0_33, %c8] : memref<8x32xbf16, #tpu.memory_space<vmem>>, vector<8x8xbf16>
    tpu.vector_store %arg17[%c0_33, %c8], %57 {strides = array<i32>} : memref<8x32xbf16, #tpu.memory_space<vmem>>, vector<8x8xbf16>,
    %59 = vector.extract_strided_slice %10 {offsets = [0, 16], sizes = [8, 8], strides = [1, 1]} : vector<8x32xbf16> to vector<8x8xbf16>
    %c2 = arith.constant 2 : index
    %c0_34 = arith.constant 0 : index
    %c0_35 = arith.constant 0 : index
    %60 = vector.load %arg15[%c2, %c0_34, %c0_35] : memref<4x8x8xbf16, #tpu.memory_space<vmem>>, vector<1x8x8xbf16>
    %61 = vector.shape_cast %60 : vector<1x8x8xbf16> to vector<8x8xbf16>
    %c2_36 = arith.constant 2 : index
    %c0_37 = arith.constant 0 : index
    %c0_38 = arith.constant 0 : index
    %62 = vector.load %arg16[%c2_36, %c0_37, %c0_38] : memref<4x8x8xbf16, #tpu.memory_space<vmem>>, vector<1x8x8xbf16>
    %63 = vector.shape_cast %62 : vector<1x8x8xbf16> to vector<8x8xbf16>
    %cst_39 = arith.constant dense<0.000000e+00> : vector<8x8xf32>
    %64 = tpu.matmul %59, %61, %cst_39 {dimension_numbers = #tpu.dot_dimension_numbers<[1], [1], [0], [0], [0, 0, 1, 0], [], []>} : vector<8x8xbf16>, vector<8x8xbf16>, vector<8x8xf32> -> vector<8x8xf32>
    %cst_40 = arith.constant -1.000000e+09 : f32
    %65 = vector.broadcast %cst_40 : f32 to vector<8x8xf32>
    %66 = arith.select %14, %64, %65 : vector<8x8xi1>, vector<8x8xf32>
    %cst_41 = arith.constant dense<0xFF800000> : vector<8xf32>
    %67 = vector.multi_reduction <maximumf>, %66, %cst_41 [1] : vector<8x8xf32> to vector<8xf32>
    %68 = vector.shape_cast %67 : vector<8xf32> to vector<8x1xf32>
    %69 = vector.broadcast %68 : vector<8x1xf32> to vector<8x8xf32>
    %70 = arith.subf %66, %69 : vector<8x8xf32>
    %71 = math.exp %70 : vector<8x8xf32>
    %cst_42 = arith.constant dense<0.000000e+00> : vector<8xf32>
    %72 = vector.multi_reduction <add>, %71, %cst_42 [1] : vector<8x8xf32> to vector<8xf32>
    %73 = vector.shape_cast %72 : vector<8xf32> to vector<8x1xf32>
    %74 = arith.truncf %71 : vector<8x8xf32> to vector<8x8xbf16>
    %cst_43 = arith.constant dense<0.000000e+00> : vector<8x8xf32>
    %75 = tpu.matmul %74, %63, %cst_43 {dimension_numbers = #tpu.dot_dimension_numbers<[1], [0], [0], [1], [0, 0, 1, 1], [], []>} : vector<8x8xbf16>, vector<8x8xbf16>, vector<8x8xf32> -> vector<8x8xf32>
    %76 = tpu.reciprocal %73 {approx = true} : vector<8x1xf32> -> vector<8x1xf32>
    %77 = vector.broadcast %76 : vector<8x1xf32> to vector<8x8xf32>
    %78 = arith.mulf %75, %77 : vector<8x8xf32>
    %79 = arith.truncf %78 : vector<8x8xf32> to vector<8x8xbf16>
    %c0_44 = arith.constant 0 : index
    %c16 = arith.constant 16 : index
    %80 = vector.load %arg17[%c0_44, %c16] : memref<8x32xbf16, #tpu.memory_space<vmem>>, vector<8x8xbf16>
    tpu.vector_store %arg17[%c0_44, %c16], %79 {strides = array<i32>} : memref<8x32xbf16, #tpu.memory_space<vmem>>, vector<8x8xbf16>,
    %81 = vector.extract_strided_slice %10 {offsets = [0, 24], sizes = [8, 8], strides = [1, 1]} : vector<8x32xbf16> to vector<8x8xbf16>
    %c3 = arith.constant 3 : index
    %c0_45 = arith.constant 0 : index
    %c0_46 = arith.constant 0 : index
    %82 = vector.load %arg15[%c3, %c0_45, %c0_46] : memref<4x8x8xbf16, #tpu.memory_space<vmem>>, vector<1x8x8xbf16>
    %83 = vector.shape_cast %82 : vector<1x8x8xbf16> to vector<8x8xbf16>
    %c3_47 = arith.constant 3 : index
    %c0_48 = arith.constant 0 : index
    %c0_49 = arith.constant 0 : index
    %84 = vector.load %arg16[%c3_47, %c0_48, %c0_49] : memref<4x8x8xbf16, #tpu.memory_space<vmem>>, vector<1x8x8xbf16>
    %85 = vector.shape_cast %84 : vector<1x8x8xbf16> to vector<8x8xbf16>
    %cst_50 = arith.constant dense<0.000000e+00> : vector<8x8xf32>
    %86 = tpu.matmul %81, %83, %cst_50 {dimension_numbers = #tpu.dot_dimension_numbers<[1], [1], [0], [0], [0, 0, 1, 0], [], []>} : vector<8x8xbf16>, vector<8x8xbf16>, vector<8x8xf32> -> vector<8x8xf32>
    %cst_51 = arith.constant -1.000000e+09 : f32
    %87 = vector.broadcast %cst_51 : f32 to vector<8x8xf32>
    %88 = arith.select %14, %86, %87 : vector<8x8xi1>, vector<8x8xf32>
    %cst_52 = arith.constant dense<0xFF800000> : vector<8xf32>
    %89 = vector.multi_reduction <maximumf>, %88, %cst_52 [1] : vector<8x8xf32> to vector<8xf32>
    %90 = vector.shape_cast %89 : vector<8xf32> to vector<8x1xf32>
    %91 = vector.broadcast %90 : vector<8x1xf32> to vector<8x8xf32>
    %92 = arith.subf %88, %91 : vector<8x8xf32>
    %93 = math.exp %92 : vector<8x8xf32>
    %cst_53 = arith.constant dense<0.000000e+00> : vector<8xf32>
    %94 = vector.multi_reduction <add>, %93, %cst_53 [1] : vector<8x8xf32> to vector<8xf32>
    %95 = vector.shape_cast %94 : vector<8xf32> to vector<8x1xf32>
    %96 = arith.truncf %93 : vector<8x8xf32> to vector<8x8xbf16>
    %cst_54 = arith.constant dense<0.000000e+00> : vector<8x8xf32>
    %97 = tpu.matmul %96, %85, %cst_54 {dimension_numbers = #tpu.dot_dimension_numbers<[1], [0], [0], [1], [0, 0, 1, 1], [], []>} : vector<8x8xbf16>, vector<8x8xbf16>, vector<8x8xf32> -> vector<8x8xf32>
    %98 = tpu.reciprocal %95 {approx = true} : vector<8x1xf32> -> vector<8x1xf32>
    %99 = vector.broadcast %98 : vector<8x1xf32> to vector<8x8xf32>
    %100 = arith.mulf %97, %99 : vector<8x8xf32>
    %101 = arith.truncf %100 : vector<8x8xf32> to vector<8x8xbf16>
    %c0_55 = arith.constant 0 : index
    %c24 = arith.constant 24 : index
    %102 = vector.load %arg17[%c0_55, %c24] : memref<8x32xbf16, #tpu.memory_space<vmem>>, vector<8x8xbf16>
    tpu.vector_store %arg17[%c0_55, %c24], %101 {strides = array<i32>} : memref<8x32xbf16, #tpu.memory_space<vmem>>, vector<8x8xbf16>,
    %c0_56 = arith.constant 0 : index
    %c0_57 = arith.constant 0 : index
    %103 = vector.load %arg17[%c0_56, %c0_57] : memref<8x32xbf16, #tpu.memory_space<vmem>>, vector<8x32xbf16>
    %c0_58 = arith.constant 0 : index
    %c0_59 = arith.constant 0 : index
    %104 = vector.load %arg12[%c0_58, %c0_59] : memref<32x32xbf16, #tpu.memory_space<vmem>>, vector<32x32xbf16>
    %cst_60 = arith.constant dense<0.000000e+00> : vector<8x32xf32>
    %105 = tpu.matmul %103, %104, %cst_60 {dimension_numbers = #tpu.dot_dimension_numbers<[1], [0], [0], [1], [0, 0, 1, 1], [], []>} : vector<8x32xbf16>, vector<32x32xbf16>, vector<8x32xf32> -> vector<8x32xf32>
    %c0_61 = arith.constant 0 : index
    %c0_62 = arith.constant 0 : index
    %106 = vector.load %arg13[%c0_61, %c0_62] : memref<1x32xf32, #tpu.memory_space<vmem>>, vector<1x32xf32>
    %107 = vector.broadcast %106 : vector<1x32xf32> to vector<8x32xf32>
    %108 = arith.addf %105, %107 : vector<8x32xf32>
    %c0_63 = arith.constant 0 : index
    %c0_64 = arith.constant 0 : index
    %c0_65 = arith.constant 0 : index
    %109 = vector.load %arg14[%c0_63, %c0_64, %c0_65] : memref<1x8x32xf32, #tpu.memory_space<vmem>>, vector<1x8x32xf32>
    %110 = vector.shape_cast %109 : vector<1x8x32xf32> to vector<8x32xf32>
    %111 = vector.shape_cast %108 : vector<8x32xf32> to vector<1x8x32xf32>
    tpu.vector_store %arg14[%c0_63, %c0_64, %c0_65], %111 {strides = array<i32>} : memref<1x8x32xf32, #tpu.memory_space<vmem>>, vector<1x8x32xf32>,
    return
  }
  func.func @transform_0(%arg0: i32, %arg1: i32) -> (i32, i32, i32) {
    %c0_i32 = arith.constant 0 : i32
    %c0_i32_0 = arith.constant 0 : i32
    return %arg0, %arg1, %c0_i32 : i32, i32, i32
  }
  func.func @transform_1(%arg0: i32, %arg1: i32) -> (i32, i32, i32) {
    %c0_i32 = arith.constant 0 : i32
    %c0_i32_0 = arith.constant 0 : i32
    %c0_i32_1 = arith.constant 0 : i32
    return %arg0, %c0_i32, %c0_i32_0 : i32, i32, i32
  }
  func.func @transform_2(%arg0: i32, %arg1: i32) -> (i32, i32, i32) {
    %c0_i32 = arith.constant 0 : i32
    %c0_i32_0 = arith.constant 0 : i32
    %c0_i32_1 = arith.constant 0 : i32
    return %arg0, %c0_i32, %c0_i32_0 : i32, i32, i32
  }
  func.func @transform_3(%arg0: i32, %arg1: i32) -> (i32, i32, i32) {
    %c0_i32 = arith.constant 0 : i32
    %c0_i32_0 = arith.constant 0 : i32
    return %arg0, %arg1, %c0_i32 : i32, i32, i32
  }
  func.func @transform_4(%arg0: i32, %arg1: i32) -> (i32, i32) {
    %c0_i32 = arith.constant 0 : i32
    %c0_i32_0 = arith.constant 0 : i32
    %c0_i32_1 = arith.constant 0 : i32
    return %c0_i32, %c0_i32_0 : i32, i32
  }
  func.func @transform_5(%arg0: i32, %arg1: i32) -> (i32, i32) {
    %c0_i32 = arith.constant 0 : i32
    %c0_i32_0 = arith.constant 0 : i32
    %c0_i32_1 = arith.constant 0 : i32
    return %c0_i32, %c0_i32_0 : i32, i32
  }
  func.func @transform_6(%arg0: i32, %arg1: i32) -> (i32, i32) {
    %c0_i32 = arith.constant 0 : i32
    %c0_i32_0 = arith.constant 0 : i32
    %c0_i32_1 = arith.constant 0 : i32
    return %c0_i32, %c0_i32_0 : i32, i32
  }
  func.func @transform_7(%arg0: i32, %arg1: i32) -> (i32, i32) {
    %c0_i32 = arith.constant 0 : i32
    %c0_i32_0 = arith.constant 0 : i32
    %c0_i32_1 = arith.constant 0 : i32
    return %c0_i32, %c0_i32_0 : i32, i32
  }
  func.func @transform_8(%arg0: i32, %arg1: i32) -> (i32, i32) {
    %c0_i32 = arith.constant 0 : i32
    %c0_i32_0 = arith.constant 0 : i32
    %c0_i32_1 = arith.constant 0 : i32
    return %c0_i32, %c0_i32_0 : i32, i32
  }
  func.func @transform_9(%arg0: i32, %arg1: i32) -> (i32, i32) {
    %c0_i32 = arith.constant 0 : i32
    %c0_i32_0 = arith.constant 0 : i32
    %c0_i32_1 = arith.constant 0 : i32
    return %c0_i32, %c0_i32_0 : i32, i32
  }
  func.func @transform_10(%arg0: i32, %arg1: i32) -> (i32, i32) {
    %c0_i32 = arith.constant 0 : i32
    %c0_i32_0 = arith.constant 0 : i32
    %c0_i32_1 = arith.constant 0 : i32
    return %c0_i32, %c0_i32_0 : i32, i32
  }
  func.func @transform_11(%arg0: i32, %arg1: i32) -> (i32, i32) {
    %c0_i32 = arith.constant 0 : i32
    %c0_i32_0 = arith.constant 0 : i32
    %c0_i32_1 = arith.constant 0 : i32
    return %c0_i32, %c0_i32_0 : i32, i32
  }
  func.func @transform_12(%arg0: i32, %arg1: i32) -> (i32, i32, i32) {
    %c0_i32 = arith.constant 0 : i32
    %c0_i32_0 = arith.constant 0 : i32
    return %arg0, %arg1, %c0_i32 : i32, i32, i32
  }
}

module attributes {stable_mosaic.version = 11 : i64} {
  func.func @mha_kernel(%arg0: i32, %arg1: i32, %arg2: memref<1x8x32xbf16, #tpu.memory_space<vmem>>, %arg3: memref<1x8x32xbf16, #tpu.memory_space<vmem>>, %arg4: memref<1x8x32xbf16, #tpu.memory_space<vmem>>, %arg5: memref<1x8x8xi8, #tpu.memory_space<vmem>>, %arg6: memref<32x32xbf16, #tpu.memory_space<vmem>>, %arg7: memref<1x32xf32, #tpu.memory_space<vmem>>, %arg8: memref<32x32xbf16, #tpu.memory_space<vmem>>, %arg9: memref<1x32xf32, #tpu.memory_space<vmem>>, %arg10: memref<32x32xbf16, #tpu.memory_space<vmem>>, %arg11: memref<1x32xf32, #tpu.memory_space<vmem>>, %arg12: memref<32x32xbf16, #tpu.memory_space<vmem>>, %arg13: memref<1x32xf32, #tpu.memory_space<vmem>>, %arg14: memref<1x8x32xf32, #tpu.memory_space<vmem>>, %arg15: memref<4x8x8xbf16, #tpu.memory_space<vmem>>, %arg16: memref<4x8x8xbf16, #tpu.memory_space<vmem>>, %arg17: memref<8x32xbf16, #tpu.memory_space<vmem>>) attributes {dimension_semantics = [#tpu.dimension_semantics<parallel>, #tpu.dimension_semantics<arbitrary>], iteration_bounds = array<i64: 2, 1>, scalar_prefetch = 0 : i64, scratch_operands = 3 : i64, tpu.core_type = #tpu.core_type<tc>, window_params = [{transform_indices = @transform_0, window_bounds = array<i64: 1, 8, 32>}, {transform_indices = @transform_1, window_bounds = array<i64: 1, 8, 32>}, {transform_indices = @transform_2, window_bounds = array<i64: 1, 8, 32>}, {transform_indices = @transform_3, window_bounds = array<i64: 1, 8, 8>}, {pipeline_mode = #tpu.pipeline_mode<synchronous>, transform_indices = @transform_4, window_bounds = array<i64: 32, 32>}, {pipeline_mode = #tpu.pipeline_mode<synchronous>, transform_indices = @transform_5, window_bounds = array<i64: 1, 32>}, {pipeline_mode = #tpu.pipeline_mode<synchronous>, transform_indices = @transform_6, window_bounds = array<i64: 32, 32>}, {pipeline_mode = #tpu.pipeline_mode<synchronous>, transform_indices = @transform_7, window_bounds = array<i64: 1, 32>}, {pipeline_mode = #tpu.pipeline_mode<synchronous>, transform_indices = @transform_8, window_bounds = array<i64: 32, 32>}, {pipeline_mode = #tpu.pipeline_mode<synchronous>, transform_indices = @transform_9, window_bounds = array<i64: 1, 32>}, {pipeline_mode = #tpu.pipeline_mode<synchronous>, transform_indices = @transform_10, window_bounds = array<i64: 32, 32>}, {pipeline_mode = #tpu.pipeline_mode<synchronous>, transform_indices = @transform_11, window_bounds = array<i64: 1, 32>}, {transform_indices = @transform_12, window_bounds = array<i64: 1, 8, 32>}]} {
    %c0_i32 = arith.constant 0 : i32
    %0 = arith.cmpi eq, %arg1, %c0_i32 : i32
    %1 = arith.extui %0 : i1 to i32
    %c0_i32_0 = arith.constant 0 : i32
    %2 = arith.cmpi ne, %1, %c0_i32_0 : i32
    scf.if %2 {
      %c0_66 = arith.constant 0 : index
      %c0_67 = arith.constant 0 : index
      %c0_68 = arith.constant 0 : index
      %112 = vector.load %arg3[%c0_66, %c0_67, %c0_68] : memref<1x8x32xbf16, #tpu.memory_space<vmem>>, vector<1x8x32xbf16>
      %113 = vector.shape_cast %112 : vector<1x8x32xbf16> to vector<8x32xbf16>
      %c0_69 = arith.constant 0 : index
      %c0_70 = arith.constant 0 : index
      %114 = vector.load %arg8[%c0_69, %c0_70] : memref<32x32xbf16, #tpu.memory_space<vmem>>, vector<32x32xbf16>
      %cst_71 = arith.constant dense<0.000000e+00> : vector<8x32xf32>
      %115 = tpu.matmul %113, %114, %cst_71 {dimension_numbers = #tpu.dot_dimension_numbers<[1], [0], [0], [1], [0, 0, 1, 1], [], []>} : vector<8x32xbf16>, vector<32x32xbf16>, vector<8x32xf32> -> vector<8x32xf32>
      %c0_72 = arith.constant 0 : index
      %c0_73 = arith.constant 0 : index
      %116 = vector.load %arg9[%c0_72, %c0_73] : memref<1x32xf32, #tpu.memory_space<vmem>>, vector<1x32xf32>
      %117 = vector.broadcast %116 : vector<1x32xf32> to vector<8x32xf32>
      %118 = arith.addf %115, %117 : vector<8x32xf32>
      %119 = arith.truncf %118 : vector<8x32xf32> to vector<8x32xbf16>
      %c0_74 = arith.constant 0 : index
      %c0_75 = arith.constant 0 : index
      %c0_76 = arith.constant 0 : index
      %120 = vector.load %arg4[%c0_74, %c0_75, %c0_76] : memref<1x8x32xbf16, #tpu.memory_space<vmem>>, vector<1x8x32xbf16>
      %121 = vector.shape_cast %120 : vector<1x8x32xbf16> to vector<8x32xbf16>
      %c0_77 = arith.constant 0 : index
      %c0_78 = arith.constant 0 : index
      %122 = vector.load %arg10[%c0_77, %c0_78] : memref<32x32xbf16, #tpu.memory_space<vmem>>, vector<32x32xbf16>
      %cst_79 = arith.constant dense<0.000000e+00> : vector<8x32xf32>
      %123 = tpu.matmul %121, %122, %cst_79 {dimension_numbers = #tpu.dot_dimension_numbers<[1], [0], [0], [1], [0, 0, 1, 1], [], []>} : vector<8x32xbf16>, vector<32x32xbf16>, vector<8x32xf32> -> vector<8x32xf32>
      %c0_80 = arith.constant 0 : index
      %c0_81 = arith.constant 0 : index
      %124 = vector.load %arg11[%c0_80, %c0_81] : memref<1x32xf32, #tpu.memory_space<vmem>>, vector<1x32xf32>
      %125 = vector.broadcast %124 : vector<1x32xf32> to vector<8x32xf32>
      %126 = arith.addf %123, %125 : vector<8x32xf32>
      %127 = arith.truncf %126 : vector<8x32xf32> to vector<8x32xbf16>
      %128 = vector.extract_strided_slice %119 {offsets = [0, 0], sizes = [8, 8], strides = [1, 1]} : vector<8x32xbf16> to vector<8x8xbf16>
      %c0_82 = arith.constant 0 : index
      %c0_83 = arith.constant 0 : index
      %c0_84 = arith.constant 0 : index
      %129 = vector.load %arg15[%c0_82, %c0_83, %c0_84] : memref<4x8x8xbf16, #tpu.memory_space<vmem>>, vector<1x8x8xbf16>
      %130 = vector.shape_cast %129 : vector<1x8x8xbf16> to vector<8x8xbf16>
      %131 = vector.shape_cast %128 : vector<8x8xbf16> to vector<1x8x8xbf16>
      tpu.vector_store %arg15[%c0_82, %c0_83, %c0_84], %131 {strides = array<i32>} : memref<4x8x8xbf16, #tpu.memory_space<vmem>>, vector<1x8x8xbf16>,
      %132 = vector.extract_strided_slice %127 {offsets = [0, 0], sizes = [8, 8], strides = [1, 1]} : vector<8x32xbf16> to vector<8x8xbf16>
      %c0_85 = arith.constant 0 : index
      %c0_86 = arith.constant 0 : index
      %c0_87 = arith.constant 0 : index
      %133 = vector.load %arg16[%c0_85, %c0_86, %c0_87] : memref<4x8x8xbf16, #tpu.memory_space<vmem>>, vector<1x8x8xbf16>
      %134 = vector.shape_cast %133 : vector<1x8x8xbf16> to vector<8x8xbf16>
      %135 = vector.shape_cast %132 : vector<8x8xbf16> to vector<1x8x8xbf16>
      tpu.vector_store %arg16[%c0_85, %c0_86, %c0_87], %135 {strides = array<i32>} : memref<4x8x8xbf16, #tpu.memory_space<vmem>>, vector<1x8x8xbf16>,
      %136 = vector.extract_strided_slice %119 {offsets = [0, 8], sizes = [8, 8], strides = [1, 1]} : vector<8x32xbf16> to vector<8x8xbf16>
      %c1_88 = arith.constant 1 : index
      %c0_89 = arith.constant 0 : index
      %c0_90 = arith.constant 0 : index
      %137 = vector.load %arg15[%c1_88, %c0_89, %c0_90] : memref<4x8x8xbf16, #tpu.memory_space<vmem>>, vector<1x8x8xbf16>
      %138 = vector.shape_cast %137 : vector<1x8x8xbf16> to vector<8x8xbf16>
      %139 = vector.shape_cast %136 : vector<8x8xbf16> to vector<1x8x8xbf16>
      tpu.vector_store %arg15[%c1_88, %c0_89, %c0_90], %139 {strides = array<i32>} : memref<4x8x8xbf16, #tpu.memory_space<vmem>>, vector<1x8x8xbf16>,
      %140 = vector.extract_strided_slice %127 {offsets = [0, 8], sizes = [8, 8], strides = [1, 1]} : vector<8x32xbf16> to vector<8x8xbf16>
      %c1_91 = arith.constant 1 : index
      %c0_92 = arith.constant 0 : index
      %c0_93 = arith.constant 0 : index
      %141 = vector.load %arg16[%c1_91, %c0_92, %c0_93] : memref<4x8x8xbf16, #tpu.memory_space<vmem>>, vector<1x8x8xbf16>
      %142 = vector.shape_cast %141 : vector<1x8x8xbf16> to vector<8x8xbf16>
      %143 = vector.shape_cast %140 : vector<8x8xbf16> to vector<1x8x8xbf16>
      tpu.vector_store %arg16[%c1_91, %c0_92, %c0_93], %143 {strides = array<i32>} : memref<4x8x8xbf16, #tpu.memory_space<vmem>>, vector<1x8x8xbf16>,
      %144 = vector.extract_strided_slice %119 {offsets = [0, 16], sizes = [8, 8], strides = [1, 1]} : vector<8x32xbf16> to vector<8x8xbf16>
      %c2_94 = arith.constant 2 : index
      %c0_95 = arith.constant 0 : index
      %c0_96 = arith.constant 0 : index
      %145 = vector.load %arg15[%c2_94, %c0_95, %c0_96] : memref<4x8x8xbf16, #tpu.memory_space<vmem>>, vector<1x8x8xbf16>
      %146 = vector.shape_cast %145 : vector<1x8x8xbf16> to vector<8x8xbf16>
      %147 = vector.shape_cast %144 : vector<8x8xbf16> to vector<1x8x8xbf16>
      tpu.vector_store %arg15[%c2_94, %c0_95, %c0_96], %147 {strides = array<i32>} : memref<4x8x8xbf16, #tpu.memory_space<vmem>>, vector<1x8x8xbf16>,
      %148 = vector.extract_strided_slice %127 {offsets = [0, 16], sizes = [8, 8], strides = [1, 1]} : vector<8x32xbf16> to vector<8x8xbf16>
      %c2_97 = arith.constant 2 : index
      %c0_98 = arith.constant 0 : index
      %c0_99 = arith.constant 0 : index
      %149 = vector.load %arg16[%c2_97, %c0_98, %c0_99] : memref<4x8x8xbf16, #tpu.memory_space<vmem>>, vector<1x8x8xbf16>
      %150 = vector.shape_cast %149 : vector<1x8x8xbf16> to vector<8x8xbf16>
      %151 = vector.shape_cast %148 : vector<8x8xbf16> to vector<1x8x8xbf16>
      tpu.vector_store %arg16[%c2_97, %c0_98, %c0_99], %151 {strides = array<i32>} : memref<4x8x8xbf16, #tpu.memory_space<vmem>>, vector<1x8x8xbf16>,
      %152 = vector.extract_strided_slice %119 {offsets = [0, 24], sizes = [8, 8], strides = [1, 1]} : vector<8x32xbf16> to vector<8x8xbf16>
      %c3_100 = arith.constant 3 : index
      %c0_101 = arith.constant 0 : index
      %c0_102 = arith.constant 0 : index
      %153 = vector.load %arg15[%c3_100, %c0_101, %c0_102] : memref<4x8x8xbf16, #tpu.memory_space<vmem>>, vector<1x8x8xbf16>
      %154 = vector.shape_cast %153 : vector<1x8x8xbf16> to vector<8x8xbf16>
      %155 = vector.shape_cast %152 : vector<8x8xbf16> to vector<1x8x8xbf16>
      tpu.vector_store %arg15[%c3_100, %c0_101, %c0_102], %155 {strides = array<i32>} : memref<4x8x8xbf16, #tpu.memory_space<vmem>>, vector<1x8x8xbf16>,
      %156 = vector.extract_strided_slice %127 {offsets = [0, 24], sizes = [8, 8], strides = [1, 1]} : vector<8x32xbf16> to vector<8x8xbf16>
      %c3_103 = arith.constant 3 : index
      %c0_104 = arith.constant 0 : index
      %c0_105 = arith.constant 0 : index
      %157 = vector.load %arg16[%c3_103, %c0_104, %c0_105] : memref<4x8x8xbf16, #tpu.memory_space<vmem>>, vector<1x8x8xbf16>
      %158 = vector.shape_cast %157 : vector<1x8x8xbf16> to vector<8x8xbf16>
      %159 = vector.shape_cast %156 : vector<8x8xbf16> to vector<1x8x8xbf16>
      tpu.vector_store %arg16[%c3_103, %c0_104, %c0_105], %159 {strides = array<i32>} : memref<4x8x8xbf16, #tpu.memory_space<vmem>>, vector<1x8x8xbf16>,
    } else {
    }
    %c0 = arith.constant 0 : index
    %c0_1 = arith.constant 0 : index
    %c0_2 = arith.constant 0 : index
    %3 = vector.load %arg2[%c0, %c0_1, %c0_2] : memref<1x8x32xbf16, #tpu.memory_space<vmem>>, vector<1x8x32xbf16>
    %4 = vector.shape_cast %3 : vector<1x8x32xbf16> to vector<8x32xbf16>
    %c0_3 = arith.constant 0 : index
    %c0_4 = arith.constant 0 : index
    %5 = vector.load %arg6[%c0_3, %c0_4] : memref<32x32xbf16, #tpu.memory_space<vmem>>, vector<32x32xbf16>
    %cst = arith.constant dense<0.000000e+00> : vector<8x32xf32>
    %6 = tpu.matmul %4, %5, %cst {dimension_numbers = #tpu.dot_dimension_numbers<[1], [0], [0], [1], [0, 0, 1, 1], [], []>} : vector<8x32xbf16>, vector<32x32xbf16>, vector<8x32xf32> -> vector<8x32xf32>
    %c0_5 = arith.constant 0 : index
    %c0_6 = arith.constant 0 : index
    %7 = vector.load %arg7[%c0_5, %c0_6] : memref<1x32xf32, #tpu.memory_space<vmem>>, vector<1x32xf32>
    %8 = vector.broadcast %7 : vector<1x32xf32> to vector<8x32xf32>
    %9 = arith.addf %6, %8 : vector<8x32xf32>
    %10 = arith.truncf %9 : vector<8x32xf32> to vector<8x32xbf16>
    %c0_7 = arith.constant 0 : index
    %c0_8 = arith.constant 0 : index
    %c0_9 = arith.constant 0 : index
    %11 = vector.load %arg5[%c0_7, %c0_8, %c0_9] : memref<1x8x8xi8, #tpu.memory_space<vmem>>, vector<1x8x8xi8>
    %12 = vector.shape_cast %11 : vector<1x8x8xi8> to vector<8x8xi8>
    %c0_i8 = arith.constant 0 : i8
    %13 = vector.broadcast %c0_i8 : i8 to vector<8x8xi8>
    %14 = arith.cmpi ne, %12, %13 : vector<8x8xi8>
    %15 = vector.extract_strided_slice %10 {offsets = [0, 0], sizes = [8, 8], strides = [1, 1]} : vector<8x32xbf16> to vector<8x8xbf16>
    %c0_10 = arith.constant 0 : index
    %c0_11 = arith.constant 0 : index
    %c0_12 = arith.constant 0 : index
    %16 = vector.load %arg15[%c0_10, %c0_11, %c0_12] : memref<4x8x8xbf16, #tpu.memory_space<vmem>>, vector<1x8x8xbf16>
    %17 = vector.shape_cast %16 : vector<1x8x8xbf16> to vector<8x8xbf16>
    %c0_13 = arith.constant 0 : index
    %c0_14 = arith.constant 0 : index
    %c0_15 = arith.constant 0 : index
    %18 = vector.load %arg16[%c0_13, %c0_14, %c0_15] : memref<4x8x8xbf16, #tpu.memory_space<vmem>>, vector<1x8x8xbf16>
    %19 = vector.shape_cast %18 : vector<1x8x8xbf16> to vector<8x8xbf16>
    %cst_16 = arith.constant dense<0.000000e+00> : vector<8x8xf32>
    %20 = tpu.matmul %15, %17, %cst_16 {dimension_numbers = #tpu.dot_dimension_numbers<[1], [1], [0], [0], [0, 0, 1, 0], [], []>} : vector<8x8xbf16>, vector<8x8xbf16>, vector<8x8xf32> -> vector<8x8xf32>
    %cst_17 = arith.constant -1.000000e+09 : f32
    %21 = vector.broadcast %cst_17 : f32 to vector<8x8xf32>
    %22 = arith.select %14, %20, %21 : vector<8x8xi1>, vector<8x8xf32>
    %cst_18 = arith.constant dense<0xFF800000> : vector<8xf32>
    %23 = vector.multi_reduction <maximumf>, %22, %cst_18 [1] : vector<8x8xf32> to vector<8xf32>
    %24 = vector.shape_cast %23 : vector<8xf32> to vector<8x1xf32>
    %25 = vector.broadcast %24 : vector<8x1xf32> to vector<8x8xf32>
    %26 = arith.subf %22, %25 : vector<8x8xf32>
    %27 = math.exp %26 : vector<8x8xf32>
    %cst_19 = arith.constant dense<0.000000e+00> : vector<8xf32>
    %28 = vector.multi_reduction <add>, %27, %cst_19 [1] : vector<8x8xf32> to vector<8xf32>
    %29 = vector.shape_cast %28 : vector<8xf32> to vector<8x1xf32>
    %30 = arith.truncf %27 : vector<8x8xf32> to vector<8x8xbf16>
    %cst_20 = arith.constant dense<0.000000e+00> : vector<8x8xf32>
    %31 = tpu.matmul %30, %19, %cst_20 {dimension_numbers = #tpu.dot_dimension_numbers<[1], [0], [0], [1], [0, 0, 1, 1], [], []>} : vector<8x8xbf16>, vector<8x8xbf16>, vector<8x8xf32> -> vector<8x8xf32>
    %32 = tpu.reciprocal %29 {approx = true} : vector<8x1xf32> -> vector<8x1xf32>
    %33 = vector.broadcast %32 : vector<8x1xf32> to vector<8x8xf32>
    %34 = arith.mulf %31, %33 : vector<8x8xf32>
    %35 = arith.truncf %34 : vector<8x8xf32> to vector<8x8xbf16>
    %c0_21 = arith.constant 0 : index
    %c0_22 = arith.constant 0 : index
    %36 = vector.load %arg17[%c0_21, %c0_22] : memref<8x32xbf16, #tpu.memory_space<vmem>>, vector<8x8xbf16>
    tpu.vector_store %arg17[%c0_21, %c0_22], %35 {strides = array<i32>} : memref<8x32xbf16, #tpu.memory_space<vmem>>, vector<8x8xbf16>,
    %37 = vector.extract_strided_slice %10 {offsets = [0, 8], sizes = [8, 8], strides = [1, 1]} : vector<8x32xbf16> to vector<8x8xbf16>
    %c1 = arith.constant 1 : index
    %c0_23 = arith.constant 0 : index
    %c0_24 = arith.constant 0 : index
    %38 = vector.load %arg15[%c1, %c0_23, %c0_24] : memref<4x8x8xbf16, #tpu.memory_space<vmem>>, vector<1x8x8xbf16>
    %39 = vector.shape_cast %38 : vector<1x8x8xbf16> to vector<8x8xbf16>
    %c1_25 = arith.constant 1 : index
    %c0_26 = arith.constant 0 : index
    %c0_27 = arith.constant 0 : index
    %40 = vector.load %arg16[%c1_25, %c0_26, %c0_27] : memref<4x8x8xbf16, #tpu.memory_space<vmem>>, vector<1x8x8xbf16>
    %41 = vector.shape_cast %40 : vector<1x8x8xbf16> to vector<8x8xbf16>
    %cst_28 = arith.constant dense<0.000000e+00> : vector<8x8xf32>
    %42 = tpu.matmul %37, %39, %cst_28 {dimension_numbers = #tpu.dot_dimension_numbers<[1], [1], [0], [0], [0, 0, 1, 0], [], []>} : vector<8x8xbf16>, vector<8x8xbf16>, vector<8x8xf32> -> vector<8x8xf32>
    %cst_29 = arith.constant -1.000000e+09 : f32
    %43 = vector.broadcast %cst_29 : f32 to vector<8x8xf32>
    %44 = arith.select %14, %42, %43 : vector<8x8xi1>, vector<8x8xf32>
    %cst_30 = arith.constant dense<0xFF800000> : vector<8xf32>
    %45 = vector.multi_reduction <maximumf>, %44, %cst_30 [1] : vector<8x8xf32> to vector<8xf32>
    %46 = vector.shape_cast %45 : vector<8xf32> to vector<8x1xf32>
    %47 = vector.broadcast %46 : vector<8x1xf32> to vector<8x8xf32>
    %48 = arith.subf %44, %47 : vector<8x8xf32>
    %49 = math.exp %48 : vector<8x8xf32>
    %cst_31 = arith.constant dense<0.000000e+00> : vector<8xf32>
    %50 = vector.multi_reduction <add>, %49, %cst_31 [1] : vector<8x8xf32> to vector<8xf32>
    %51 = vector.shape_cast %50 : vector<8xf32> to vector<8x1xf32>
    %52 = arith.truncf %49 : vector<8x8xf32> to vector<8x8xbf16>
    %cst_32 = arith.constant dense<0.000000e+00> : vector<8x8xf32>
    %53 = tpu.matmul %52, %41, %cst_32 {dimension_numbers = #tpu.dot_dimension_numbers<[1], [0], [0], [1], [0, 0, 1, 1], [], []>} : vector<8x8xbf16>, vector<8x8xbf16>, vector<8x8xf32> -> vector<8x8xf32>
    %54 = tpu.reciprocal %51 {approx = true} : vector<8x1xf32> -> vector<8x1xf32>
    %55 = vector.broadcast %54 : vector<8x1xf32> to vector<8x8xf32>
    %56 = arith.mulf %53, %55 : vector<8x8xf32>
    %57 = arith.truncf %56 : vector<8x8xf32> to vector<8x8xbf16>
    %c0_33 = arith.constant 0 : index
    %c8 = arith.constant 8 : index
    %58 = vector.load %arg17[%c0_33, %c8] : memref<8x32xbf16, #tpu.memory_space<vmem>>, vector<8x8xbf16>
    tpu.vector_store %arg17[%c0_33, %c8], %57 {strides = array<i32>} : memref<8x32xbf16, #tpu.memory_space<vmem>>, vector<8x8xbf16>,
    %59 = vector.extract_strided_slice %10 {offsets = [0, 16], sizes = [8, 8], strides = [1, 1]} : vector<8x32xbf16> to vector<8x8xbf16>
    %c2 = arith.constant 2 : index
    %c0_34 = arith.constant 0 : index
    %c0_35 = arith.constant 0 : index
    %60 = vector.load %arg15[%c2, %c0_34, %c0_35] : memref<4x8x8xbf16, #tpu.memory_space<vmem>>, vector<1x8x8xbf16>
    %61 = vector.shape_cast %60 : vector<1x8x8xbf16> to vector<8x8xbf16>
    %c2_36 = arith.constant 2 : index
    %c0_37 = arith.constant 0 : index
    %c0_38 = arith.constant 0 : index
    %62 = vector.load %arg16[%c2_36, %c0_37, %c0_38] : memref<4x8x8xbf16, #tpu.memory_space<vmem>>, vector<1x8x8xbf16>
    %63 = vector.shape_cast %62 : vector<1x8x8xbf16> to vector<8x8xbf16>
    %cst_39 = arith.constant dense<0.000000e+00> : vector<8x8xf32>
    %64 = tpu.matmul %59, %61, %cst_39 {dimension_numbers = #tpu.dot_dimension_numbers<[1], [1], [0], [0], [0, 0, 1, 0], [], []>} : vector<8x8xbf16>, vector<8x8xbf16>, vector<8x8xf32> -> vector<8x8xf32>
    %cst_40 = arith.constant -1.000000e+09 : f32
    %65 = vector.broadcast %cst_40 : f32 to vector<8x8xf32>
    %66 = arith.select %14, %64, %65 : vector<8x8xi1>, vector<8x8xf32>
    %cst_41 = arith.constant dense<0xFF800000> : vector<8xf32>
    %67 = vector.multi_reduction <maximumf>, %66, %cst_41 [1] : vector<8x8xf32> to vector<8xf32>
    %68 = vector.shape_cast %67 : vector<8xf32> to vector<8x1xf32>
    %69 = vector.broadcast %68 : vector<8x1xf32> to vector<8x8xf32>
    %70 = arith.subf %66, %69 : vector<8x8xf32>
    %71 = math.exp %70 : vector<8x8xf32>
    %cst_42 = arith.constant dense<0.000000e+00> : vector<8xf32>
    %72 = vector.multi_reduction <add>, %71, %cst_42 [1] : vector<8x8xf32> to vector<8xf32>
    %73 = vector.shape_cast %72 : vector<8xf32> to vector<8x1xf32>
    %74 = arith.truncf %71 : vector<8x8xf32> to vector<8x8xbf16>
    %cst_43 = arith.constant dense<0.000000e+00> : vector<8x8xf32>
    %75 = tpu.matmul %74, %63, %cst_43 {dimension_numbers = #tpu.dot_dimension_numbers<[1], [0], [0], [1], [0, 0, 1, 1], [], []>} : vector<8x8xbf16>, vector<8x8xbf16>, vector<8x8xf32> -> vector<8x8xf32>
    %76 = tpu.reciprocal %73 {approx = true} : vector<8x1xf32> -> vector<8x1xf32>
    %77 = vector.broadcast %76 : vector<8x1xf32> to vector<8x8xf32>
    %78 = arith.mulf %75, %77 : vector<8x8xf32>
    %79 = arith.truncf %78 : vector<8x8xf32> to vector<8x8xbf16>
    %c0_44 = arith.constant 0 : index
    %c16 = arith.constant 16 : index
    %80 = vector.load %arg17[%c0_44, %c16] : memref<8x32xbf16, #tpu.memory_space<vmem>>, vector<8x8xbf16>
    tpu.vector_store %arg17[%c0_44, %c16], %79 {strides = array<i32>} : memref<8x32xbf16, #tpu.memory_space<vmem>>, vector<8x8xbf16>,
    %81 = vector.extract_strided_slice %10 {offsets = [0, 24], sizes = [8, 8], strides = [1, 1]} : vector<8x32xbf16> to vector<8x8xbf16>
    %c3 = arith.constant 3 : index
    %c0_45 = arith.constant 0 : index
    %c0_46 = arith.constant 0 : index
    %82 = vector.load %arg15[%c3, %c0_45, %c0_46] : memref<4x8x8xbf16, #tpu.memory_space<vmem>>, vector<1x8x8xbf16>
    %83 = vector.shape_cast %82 : vector<1x8x8xbf16> to vector<8x8xbf16>
    %c3_47 = arith.constant 3 : index
    %c0_48 = arith.constant 0 : index
    %c0_49 = arith.constant 0 : index
    %84 = vector.load %arg16[%c3_47, %c0_48, %c0_49] : memref<4x8x8xbf16, #tpu.memory_space<vmem>>, vector<1x8x8xbf16>
    %85 = vector.shape_cast %84 : vector<1x8x8xbf16> to vector<8x8xbf16>
    %cst_50 = arith.constant dense<0.000000e+00> : vector<8x8xf32>
    %86 = tpu.matmul %81, %83, %cst_50 {dimension_numbers = #tpu.dot_dimension_numbers<[1], [1], [0], [0], [0, 0, 1, 0], [], []>} : vector<8x8xbf16>, vector<8x8xbf16>, vector<8x8xf32> -> vector<8x8xf32>
    %cst_51 = arith.constant -1.000000e+09 : f32
    %87 = vector.broadcast %cst_51 : f32 to vector<8x8xf32>
    %88 = arith.select %14, %86, %87 : vector<8x8xi1>, vector<8x8xf32>
    %cst_52 = arith.constant dense<0xFF800000> : vector<8xf32>
    %89 = vector.multi_reduction <maximumf>, %88, %cst_52 [1] : vector<8x8xf32> to vector<8xf32>
    %90 = vector.shape_cast %89 : vector<8xf32> to vector<8x1xf32>
    %91 = vector.broadcast %90 : vector<8x1xf32> to vector<8x8xf32>
    %92 = arith.subf %88, %91 : vector<8x8xf32>
    %93 = math.exp %92 : vector<8x8xf32>
    %cst_53 = arith.constant dense<0.000000e+00> : vector<8xf32>
    %94 = vector.multi_reduction <add>, %93, %cst_53 [1] : vector<8x8xf32> to vector<8xf32>
    %95 = vector.shape_cast %94 : vector<8xf32> to vector<8x1xf32>
    %96 = arith.truncf %93 : vector<8x8xf32> to vector<8x8xbf16>
    %cst_54 = arith.constant dense<0.000000e+00> : vector<8x8xf32>
    %97 = tpu.matmul %96, %85, %cst_54 {dimension_numbers = #tpu.dot_dimension_numbers<[1], [0], [0], [1], [0, 0, 1, 1], [], []>} : vector<8x8xbf16>, vector<8x8xbf16>, vector<8x8xf32> -> vector<8x8xf32>
    %98 = tpu.reciprocal %95 {approx = true} : vector<8x1xf32> -> vector<8x1xf32>
    %99 = vector.broadcast %98 : vector<8x1xf32> to vector<8x8xf32>
    %100 = arith.mulf %97, %99 : vector<8x8xf32>
    %101 = arith.truncf %100 : vector<8x8xf32> to vector<8x8xbf16>
    %c0_55 = arith.constant 0 : index
    %c24 = arith.constant 24 : index
    %102 = vector.load %arg17[%c0_55, %c24] : memref<8x32xbf16, #tpu.memory_space<vmem>>, vector<8x8xbf16>
    tpu.vector_store %arg17[%c0_55, %c24], %101 {strides = array<i32>} : memref<8x32xbf16, #tpu.memory_space<vmem>>, vector<8x8xbf16>,
    %c0_56 = arith.constant 0 : index
    %c0_57 = arith.constant 0 : index
    %103 = vector.load %arg17[%c0_56, %c0_57] : memref<8x32xbf16, #tpu.memory_space<vmem>>, vector<8x32xbf16>
    %c0_58 = arith.constant 0 : index
    %c0_59 = arith.constant 0 : index
    %104 = vector.load %arg12[%c0_58, %c0_59] : memref<32x32xbf16, #tpu.memory_space<vmem>>, vector<32x32xbf16>
    %cst_60 = arith.constant dense<0.000000e+00> : vector<8x32xf32>
    %105 = tpu.matmul %103, %104, %cst_60 {dimension_numbers = #tpu.dot_dimension_numbers<[1], [0], [0], [1], [0, 0, 1, 1], [], []>} : vector<8x32xbf16>, vector<32x32xbf16>, vector<8x32xf32> -> vector<8x32xf32>
    %c0_61 = arith.constant 0 : index
    %c0_62 = arith.constant 0 : index
    %106 = vector.load %arg13[%c0_61, %c0_62] : memref<1x32xf32, #tpu.memory_space<vmem>>, vector<1x32xf32>
    %107 = vector.broadcast %106 : vector<1x32xf32> to vector<8x32xf32>
    %108 = arith.addf %105, %107 : vector<8x32xf32>
    %c0_63 = arith.constant 0 : index
    %c0_64 = arith.constant 0 : index
    %c0_65 = arith.constant 0 : index
    %109 = vector.load %arg14[%c0_63, %c0_64, %c0_65] : memref<1x8x32xf32, #tpu.memory_space<vmem>>, vector<1x8x32xf32>
    %110 = vector.shape_cast %109 : vector<1x8x32xf32> to vector<8x32xf32>
    %111 = vector.shape_cast %108 : vector<8x32xf32> to vector<1x8x32xf32>
    tpu.vector_store %arg14[%c0_63, %c0_64, %c0_65], %111 {strides = array<i32>} : memref<1x8x32xf32, #tpu.memory_space<vmem>>, vector<1x8x32xf32>,
    return
  }
  func.func @transform_0(%arg0: i32, %arg1: i32) -> (i32, i32, i32) {
    %c0_i32 = arith.constant 0 : i32
    %c0_i32_0 = arith.constant 0 : i32
    return %arg0, %arg1, %c0_i32 : i32, i32, i32
  }
  func.func @transform_1(%arg0: i32, %arg1: i32) -> (i32, i32, i32) {
    %c0_i32 = arith.constant 0 : i32
    %c0_i32_0 = arith.constant 0 : i32
    %c0_i32_1 = arith.constant 0 : i32
    return %arg0, %c0_i32, %c0_i32_0 : i32, i32, i32
  }
  func.func @transform_2(%arg0: i32, %arg1: i32) -> (i32, i32, i32) {
    %c0_i32 = arith.constant 0 : i32
    %c0_i32_0 = arith.constant 0 : i32
    %c0_i32_1 = arith.constant 0 : i32
    return %arg0, %c0_i32, %c0_i32_0 : i32, i32, i32
  }
  func.func @transform_3(%arg0: i32, %arg1: i32) -> (i32, i32, i32) {
    %c0_i32 = arith.constant 0 : i32
    %c0_i32_0 = arith.constant 0 : i32
    return %arg0, %arg1, %c0_i32 : i32, i32, i32
  }
  func.func @transform_4(%arg0: i32, %arg1: i32) -> (i32, i32) {
    %c0_i32 = arith.constant 0 : i32
    %c0_i32_0 = arith.constant 0 : i32
    %c0_i32_1 = arith.constant 0 : i32
    return %c0_i32, %c0_i32_0 : i32, i32
  }
  func.func @transform_5(%arg0: i32, %arg1: i32) -> (i32, i32) {
    %c0_i32 = arith.constant 0 : i32
    %c0_i32_0 = arith.constant 0 : i32
    %c0_i32_1 = arith.constant 0 : i32
    return %c0_i32, %c0_i32_0 : i32, i32
  }
  func.func @transform_6(%arg0: i32, %arg1: i32) -> (i32, i32) {
    %c0_i32 = arith.constant 0 : i32
    %c0_i32_0 = arith.constant 0 : i32
    %c0_i32_1 = arith.constant 0 : i32
    return %c0_i32, %c0_i32_0 : i32, i32
  }
  func.func @transform_7(%arg0: i32, %arg1: i32) -> (i32, i32) {
    %c0_i32 = arith.constant 0 : i32
    %c0_i32_0 = arith.constant 0 : i32
    %c0_i32_1 = arith.constant 0 : i32
    return %c0_i32, %c0_i32_0 : i32, i32
  }
  func.func @transform_8(%arg0: i32, %arg1: i32) -> (i32, i32) {
    %c0_i32 = arith.constant 0 : i32
    %c0_i32_0 = arith.constant 0 : i32
    %c0_i32_1 = arith.constant 0 : i32
    return %c0_i32, %c0_i32_0 : i32, i32
  }
  func.func @transform_9(%arg0: i32, %arg1: i32) -> (i32, i32) {
    %c0_i32 = arith.constant 0 : i32
    %c0_i32_0 = arith.constant 0 : i32
    %c0_i32_1 = arith.constant 0 : i32
    return %c0_i32, %c0_i32_0 : i32, i32
  }
  func.func @transform_10(%arg0: i32, %arg1: i32) -> (i32, i32) {
    %c0_i32 = arith.constant 0 : i32
    %c0_i32_0 = arith.constant 0 : i32
    %c0_i32_1 = arith.constant 0 : i32
    return %c0_i32, %c0_i32_0 : i32, i32
  }
  func.func @transform_11(%arg0: i32, %arg1: i32) -> (i32, i32) {
    %c0_i32 = arith.constant 0 : i32
    %c0_i32_0 = arith.constant 0 : i32
    %c0_i32_1 = arith.constant 0 : i32
    return %c0_i32, %c0_i32_0 : i32, i32
  }
  func.func @transform_12(%arg0: i32, %arg1: i32) -> (i32, i32, i32) {
    %c0_i32 = arith.constant 0 : i32
    %c0_i32_0 = arith.constant 0 : i32
    return %arg0, %arg1, %c0_i32 : i32, i32, i32
  }
}

</mosaic_0001>

<bundles_post_ra>
// kernel: tpu_custom_call.1
= control target key start
LH: loop header
LB: loop body
LE: loop exit
PB: predicated region body
PF: predicated region fallthrough
CT: control target
= control target key end

     0   :  { %s2719_s0 = inlined_call_operand.hbm [shape: bf16[2,8,32], index: 0, kind: input, shape index: {}]   ;;  %s2720_s1 = inlined_call_operand.hbm [shape: bf16[2,8,32], index: 1, kind: input, shape index: {}]   ;;  %s2721_s2 = inlined_call_operand.hbm [shape: bf16[2,8,32], index: 2, kind: input, shape index: {}]   ;;  %s2722_s3 = inlined_call_operand.hbm [shape: s8[2,8,8], index: 3, kind: input, shape index: {}]   ;;  %s2723_s4 = inlined_call_operand.hbm [shape: bf16[32,32], index: 4, kind: input, shape index: {}]   ;;  %s2724_s5 = inlined_call_operand.vmem [shape: f32[1,32], index: 5, kind: input, shape index: {}]   ;;  %s2725_s6 = inlined_call_operand.vmem [shape: bf16[32,32], index: 6, kind: input, shape index: {}]   ;;  %s2726_s7 = inlined_call_operand.vmem [shape: f32[1,32], index: 7, kind: input, shape index: {}]   ;;  %s2727_s8 = inlined_call_operand.hbm [shape: bf16[32,32], index: 8, kind: input, shape index: {}]   ;;  %s2728_s9 = inlined_call_operand.hbm [shape: f32[1,32], index: 9, kind: input, shape index: {}]   ;;  %s2729_s10 = inlined_call_operand.vmem [shape: bf16[32,32], index: 10, kind: input, shape index: {}]   ;;  %s2730_s11 = inlined_call_operand.vmem [shape: f32[1,32], index: 11, kind: input, shape index: {}]   ;;  %s2731_s12 = inlined_call_operand.hbm [shape: f32[2,8,32], index: 12, kind: output, shape index: {}]  }
   0x1   :  { %2755 = sst [smem:[#allocation27_spill]] %s2719_s0 }
   0x2   :  { %2756 = sst [smem:[#allocation28_spill]] %s2720_s1 }
   0x3   :  { %2757 = sst [smem:[#allocation29_spill]] %s2722_s3 }
   0x4   :  { %2758 = sst [smem:[#allocation30_spill]] %s2724_s5 }
   0x5   :  { %2759 = sst [smem:[#allocation31_spill]] %s2725_s6 }
   0x6   :  { %2760 = sst [smem:[#allocation32_spill]] %s2726_s7 }
   0x7   :  { %2761 = sst [smem:[#allocation33_spill]] %s2729_s10 }
   0x8   :  { %2762 = sst [smem:[#allocation34_spill]] %s2730_s11 }
   0x9   :  { %2763 = sst [smem:[#allocation35_spill]] %s2731_s12 }
   0xa   :  { %17 = vsyncpa [#allocation5], 0 }
   0xb   :  { %19 = vsyncpa [#allocation5 + $0x1], 0 }
   0xc   :  { %20 = vsyncpa [#allocation8], 0 }
   0xd   :  { %21 = vsyncpa [#allocation11], 0 }
   0xe   :  { %23 = vsyncpa [#allocation11 + $0x1], 0 }
   0xf   :  { %24 = vsyncpa [#allocation14], 0 }
  0x10   :  { %25 = vsyncpa [#allocation6], 0 }
  0x11   :  { %27 = vsyncpa [#allocation6 + $0x1], 0  ;;  %s2217_s21 = smov 0   ;;  %s2219_s22 = smov 0  }
  0x12   :  { %s2221_s23 = smov 0   ;;  %s2223_s24 = smov 0  }
  0x13   :  { %s2225_s25 = smov 0   ;;  %s2227_s26 = smov 0  }
  0x14 LB: > { %2764 = sst [smem:[#allocation23_spill]] %s2111_s21  ;;  %s2248_s27 = sadd.s32 4294967295, %s2131_s26   ;;  %s2131_s26 = sphi %s2227_s26, %s33_s26   ;;  %s2127_s25 = sphi %s2225_s25, %s2812_s25   ;;  %s2123_s24 = sphi %s2223_s24, %s2811_s24   ;;  %s2119_s23 = sphi %s2221_s23, %s2810_s23   ;;  %s2115_s22 = sphi %s2219_s22, %s2809_s22   ;;  %s2111_s21 = sphi %s2217_s21, %s2808_s21  }
  0x15   : > { %s1525_s28 = sadd.s32 4294967294, %s2131_s26   ;;  %p67_p0 = scmp.ne.s32.totalorder %s2115_s22, %s2111_s21 }
  0x16   : > { %p2736_p1 = scmp.eq.s32.totalorder %s2248_s27, 0  ;;  %p347_p3 = scmp.eq.s32.totalorder %s1525_s28, 1 }
  0x17   : > { %p1526_p5 = scmp.ge.s32.totalorder %s2131_s26, 1  ;;  %p354_p7 = scmp.lt.s32.totalorder %s2131_s26, 3 }
  0x18   : > { %p2257_p4 = por %p2736_p1, %p67_p0  ;;  %p2262_p6 = por %p347_p3, %p67_p0 }
  0x19   : > { %s2732_s13 = sshll.u32 %s2123_s24, 6  ;;  %p2268_p8 = pnand %p1526_p5, %p354_p7 }
  0x1a   : > { %s2765_s29 = scalar_select %p2257_p4, 1, 0 }
  0x1b   : > { %s2767_s30 = scalar_select %p2262_p6, 1, 0 }
  0x1c   : > { %2766 = sst [smem:[#allocation24_spill]] %s2765_s29  ;;  %s2771_s1 = sld [smem:[#allocation28_spill]] }
  0x1d   : > { %2768 = sst [smem:[#allocation25_spill]] %s2767_s30  ;;  %s2133_s18 = smov [#allocation7]  }
  0x1e   : > { %s2769_s14 = scalar_select %p2268_p8, 1, 0 }
  0x1f   : > { %s369_s19 = sshll.u32 %s2133_s18, 4  ;;  %p1706_p9 = pneg %p2268_p8  ;;  %s2281_s19 = int_to_ptr.vmem [resolvable:$true] %s369_s19 }
  0x20   : > { %2770 = sst [smem:[#allocation26_spill]] %s2769_s14  ;;  %s2134_s28 = smov [#allocation12]  }
  0x21   : > { %p2286_p11 = pnand %p1706_p9, %p2257_p4  ;;  %s392_s15 = sshll.u32 %s2134_s28, 4  ;;  %s2290_s15 = int_to_ptr.vmem [resolvable:$true] %s392_s15 }
  0x22   : > { %s2277_s17 = scalar_lea.hbm %s2771_s1, %s2732_s13  ;;  %p2294_p12 = pnand %p1706_p9, %p2736_p1 }
  0x23   : > { %s2772_s20 = scalar_select %p2286_p11, 1, 0 }
  0x24   : > { %s2773_s16 = scalar_select %p2294_p12, 1, 0 }
  0x25   : > { %s1829_s18 = scalar_lea.hbm %s2277_s17, 64  ;;  %p2748_p0 = pneg %p2286_p11 }
  0x26   : > { %p1830_p13 = scmp.ne.s32.totalorder %s2277_s17, %s1829_s18  ;;  %s1834_s21 = scalar_lea.hbm %s2771_s1, 128 }
  0x27   : > { %p1835_p7 = scmp.lt.u32.totalorder %s2277_s17, %s2771_s1  ;;  %p1836_p9 = scmp.lt.u32.totalorder %s1834_s21, %s1829_s18 }
  0x28   : > { %p1832_p3 = pnand %p2748_p0, %p1830_p13  ;;  %p1838_p1 = scmp.lt.u32.totalorder %s1829_s18, %s2277_s17 }
  0x29   : > { %p1837_p10 = por %p1836_p9, %p1835_p7 }
  0x2a   : > { %p1833_p5 = pneg %p1832_p3 }
  0x2b   : > { %p1839_p2 = por %p1838_p1, %p1837_p10 }
  0x2d   : > { %p1840_p6 = pnand %p1839_p2, %p1833_p5 }
  0x2f   : > { %1843 = shalt.err (!%p1840_p6)
}
  0x30   : > { %s1844_s11 = scalar_lea.vmem %s2281_s19, 64  ;;  %p1852_p8 = scmp.lt.s32.totalorder %s2281_s19, %s2281_s19 }
  0x31   : > { %p1845_p13 = scmp.ne.s32.totalorder %s2281_s19, %s1844_s11  ;;  %p1853_p12 = scmp.lt.s32.totalorder %s1844_s11, %s1844_s11 }
  0x33   : > { %p1847_p3 = pnand %p1845_p13, %p2748_p0  ;;  %p1854_p7 = por %p1853_p12, %p1852_p8 }
  0x35   : > { %p1848_p4 = pneg %p1847_p3 }
  0x37   : > { %p1855_p9 = pnand %p1854_p7, %p1848_p4 }
  0x39   : > { %1858 = shalt.err (!%p1855_p9)
}
  0x3a   : > { %1709 = dma.hbm_to_vmem [thread:$0]  (!%p2286_p11), %s2277_s17, 64, %s2281_s19, [#allocation8]  }
  0x3b   : > { %s1859_s30 = scalar_lea.hbm %s2723_s4, 256  ;;  %p2774_p2 = scmp.ne.s32.totalorder %s2773_s16, 0 }
  0x3c   : > { %p1860_p1 = scmp.ne.s32.totalorder %s2723_s4, %s1859_s30  ;;  %p1866_p10 = scmp.lt.u32.totalorder %s1859_s30, %s2723_s4 }
  0x3d   : > { %p2332_p6 = pneg %p2774_p2 }
  0x3f   : > { %s2775_s11 = scalar_select %p2332_p6, 1, 0 }
  0x40   : > { %p1862_p4 = pnand %p2332_p6, %p1860_p1 }
  0x42   : > { %p1863_p8 = pneg %p1862_p4 }
  0x44   : > { %p1868_p12 = pnand %p1866_p10, %p1863_p8 }
  0x46   : > { %1871 = shalt.err (!%p1868_p12)
}
  0x47   : > { %s1872_s17 = scalar_lea.vmem %s2290_s15, 256  ;;  %p1880_p7 = scmp.lt.s32.totalorder %s2290_s15, %s2290_s15 }
  0x48   : > { %p1873_p5 = scmp.ne.s32.totalorder %s2290_s15, %s1872_s17  ;;  %p1881_p9 = scmp.lt.s32.totalorder %s1872_s17, %s1872_s17 }
  0x4a   : > { %p1875_p13 = pnand %p1873_p5, %p2332_p6  ;;  %p1882_p1 = por %p1881_p9, %p1880_p7 }
  0x4c   : > { %p1876_p3 = pneg %p1875_p13 }
  0x4e   : > { %p1883_p4 = pnand %p1882_p1, %p1876_p3 }
  0x50   : > { %1886 = shalt.err (!%p1883_p4)
}
  0x51   : > { %s2135_s19 = smov 64   ;;  %s2136_s1 = smov 4  }
  0x52   : > { %1715 = dma.hbm_to_vmem [thread:$0]  (!%p2774_p2), %s2723_s4, 256, %s2290_s15, [#allocation11], %s2135_s19, %s2135_s19, %s2136_s1  }
  0x53   : > { %s2776_s30 = sshll.u32 %s2123_s24, 6  ;;  %s2137_s17 = smov [#allocation13]  }
  0x54   : > { %s2358_s28 = scalar_lea.hbm %s2721_s2, %s2776_s30  ;;  %s414_s10 = sshll.u32 %s2137_s17, 4  ;;  %s415_s10 = int_to_ptr.vmem [resolvable:$true] %s414_s10 }
  0x55   : > { %s2138_s5 = smov [#allocation9]   ;;  %s1887_s14 = scalar_lea.hbm %s2727_s8, 256 }
  0x56   : > { %s382_s7 = sshll.u32 %s2138_s5, 4  ;;  %p1888_p8 = scmp.ne.s32.totalorder %s2727_s8, %s1887_s14  ;;  %s383_s7 = int_to_ptr.vmem [resolvable:$true] %s382_s7 }
  0x57   : > { %p1894_p5 = scmp.lt.u32.totalorder %s1887_s14, %s2727_s8 }
  0x58   : > { %p1890_p10 = pnand %p1888_p8, %p2332_p6 }
  0x5a   : > { %p1891_p12 = pneg %p1890_p10 }
  0x5c   : > { %p1896_p13 = pnand %p1894_p5, %p1891_p12 }
  0x5e   : > { %1899 = shalt.err (!%p1896_p13)
}
  0x5f   : > { %s1900_s21 = scalar_lea.vmem %s415_s10, 256  ;;  %p1908_p1 = scmp.lt.s32.totalorder %s415_s10, %s415_s10 }
  0x60   : > { %p1901_p3 = scmp.ne.s32.totalorder %s415_s10, %s1900_s21  ;;  %p1909_p4 = scmp.lt.s32.totalorder %s1900_s21, %s1900_s21 }
  0x62   : > { %p1903_p7 = pnand %p1901_p3, %p2332_p6  ;;  %p1910_p0 = por %p1909_p4, %p1908_p1 }
  0x64   : > { %p1904_p9 = pneg %p1903_p7 }
  0x66   : > { %p1911_p11 = pnand %p1910_p0, %p1904_p9 }
  0x68   : > { %1914 = shalt.err (!%p1911_p11)
}
  0x69   : > { %1718 = dma.hbm_to_vmem [thread:$0]  (!%p2774_p2), %s2727_s8, 256, %s415_s10, [#allocation14], %s2135_s19, %s2135_s19, %s2136_s1  }
  0x6a   : > { %s1915_s5 = scalar_lea.hbm %s2358_s28, 64  ;;  %p2777_p10 = scmp.ne.s32.totalorder %s2772_s20, 0 }
  0x6b   : > { %p1916_p8 = scmp.ne.s32.totalorder %s2358_s28, %s1915_s5  ;;  %s1920_s14 = scalar_lea.hbm %s2721_s2, 128 }
  0x6c   : > { %p2778_p12 = pneg %p2777_p10  ;;  %p1921_p11 = scmp.lt.u32.totalorder %s2358_s28, %s2721_s2 }
  0x6d   : > { %p1922_p0 = scmp.lt.u32.totalorder %s1920_s14, %s1915_s5  ;;  %p1924_p7 = scmp.lt.u32.totalorder %s1915_s5, %s2358_s28 }
  0x6e   : > { %p1918_p5 = pnand %p1916_p8, %p2778_p12 }
  0x6f   : > { %p1923_p3 = por %p1922_p0, %p1921_p11 }
  0x70   : > { %p1919_p13 = pneg %p1918_p5 }
  0x71   : > { %p1925_p9 = por %p1924_p7, %p1923_p3 }
  0x73   : > { %p1926_p1 = pnand %p1925_p9, %p1919_p13 }
  0x75   : > { %1929 = shalt.err (!%p1926_p1)
}
  0x76   : > { %s1930_s10 = scalar_lea.vmem %s383_s7, 64  ;;  %p2779_p8 = pmov %p2778_p12 }
  0x77   : > { %p1931_p4 = scmp.ne.s32.totalorder %s383_s7, %s1930_s10  ;;  %p1938_p2 = scmp.lt.s32.totalorder %s383_s7, %s383_s7 }
  0x78   : > { %p1939_p6 = scmp.lt.s32.totalorder %s1930_s10, %s1930_s10 }
  0x79   : > { %p1933_p12 = pnand %p1931_p4, %p2779_p8 }
  0x7a   : > { %p1940_p0 = por %p1939_p6, %p1938_p2 }
  0x7b   : > { %p1934_p5 = pneg %p1933_p12 }
  0x7d   : > { %p1941_p11 = pnand %p1940_p0, %p1934_p5 }
  0x7f   : > { %1944 = shalt.err (!%p1941_p11)
}
  0x80   : > { %1712 = dma.hbm_to_vmem [thread:$0]  (!%p2777_p10), %s2358_s28, 64, %s383_s7, [#allocation8]  }
  0x81   : > { %s2139_s19 = smov [#allocation15]   ;;  %s1945_s15 = scalar_lea.hbm %s2728_s9, 16 }
  0x82   : > { %s428_s1 = sshll.u32 %s2139_s19, 4  ;;  %p1946_p13 = scmp.ne.s32.totalorder %s2728_s9, %s1945_s15  ;;  %s429_s1 = int_to_ptr.vmem [resolvable:$true] %s428_s1 }
  0x83   : > { %p2780_p3 = scmp.ne.s32.totalorder %s2775_s11, 0  ;;  %p1952_p7 = scmp.lt.u32.totalorder %s1945_s15, %s2728_s9 }
  0x85   : > { %p1948_p2 = pnand %p1946_p13, %p2780_p3 }
  0x87   : > { %p1949_p6 = pneg %p1948_p2 }
  0x89   : > { %p1954_p9 = pnand %p1952_p7, %p1949_p6 }
  0x8b   : > { %1957 = shalt.err (!%p1954_p9)
}
  0x8c   : > { %s1958_s7 = scalar_lea.vmem %s429_s1, 16  ;;  %s1965_s20 = scalar_lea.vmem %s429_s1, 32 }
  0x8d   : > { %p1959_p10 = scmp.ne.s32.totalorder %s429_s1, %s1958_s7  ;;  %p1966_p8 = scmp.lt.s32.totalorder %s429_s1, %s429_s1 }
  0x8e   : > { %p1967_p12 = scmp.lt.s32.totalorder %s1965_s20, %s1958_s7 }
  0x8f   : > { %p1961_p1 = pnand %p1959_p10, %p2780_p3 }
  0x90   : > { %p1968_p5 = por %p1967_p12, %p1966_p8 }
  0x91   : > { %p1962_p4 = pneg %p1961_p1 }
  0x93   : > { %p1969_p0 = pnand %p1968_p5, %p1962_p4 }
  0x95   : > { %1972 = shalt.err (!%p1969_p0)
}
  0x96   : > { %p2781_p11 = scmp.ne.s32.totalorder %s2773_s16, 0  ;;  %s45_s11 = sadd.s32 1, %s2127_s25 }
  0x97   : > { %s54_s6 = sadd.s32 1, %s2119_s23  ;;  %p47_p13 = scmp.ge.s32.totalorder %s45_s11, 2 }
  0x98   : > { %1721 = dma.hbm_to_vmem [thread:$0]  (!%p2781_p11), %s2728_s9, 16, %s429_s1, [#allocation14]  }
  0x99   : > { %p61_p3 = scmp.ne.s32.totalorder %s2119_s23, %s2115_s22  ;;  %p62_p2 = scmp.eq.s32.totalorder %s2131_s26, 0 }
  0x9a   : > { %p1736_p6 = scmp.lt.s32.totalorder %s2131_s26, 2  ;;  %s2814_s11 = smov (%p47_p13, %s45_s11), 0 }
  0x9b   : > { %p63_p7 = por %p62_p2, %p61_p3  ;;  %p2782_p9 = scmp.eq.s32.totalorder %s2248_s27, 1 }
  0x9c   : > { %s49_s29 = ssub.s32 %s2127_s25, %s2814_s11  ;;  %s2432_s14 = sand.u32 1, %s2119_s23  }
  0x9d   : > { %p2425_p10 = por %p2782_p9, %p61_p3  ;;  %p52_p1 = scmp.eq.s32.totalorder %s49_s29, 0 }
  0x9e   : > { %s1533_s30 = sshll.u32 %s2432_s14, 2  ;;  %s1534_s13 = sshll.u32 %s2127_s25, 6 }
  0x9f   : > { %s2783_s16 = scalar_select %p2425_p10, 1, 0 }
  0xa0   : > { %s2437_s10 = scalar_select %p52_p1, %s2119_s23, %s54_s6  }
  0xa1   : > { %s2784_s18 = sld [smem:[#allocation27_spill]]  ;;  %s449_s15 = scalar_lea.vmem [#allocation4], %s1533_s30 }
  0xa2   : > { %s457_s12 = sshll.u32 %s449_s15, 4  ;;  %p2446_p4 = pnand %p1736_p6, %p63_p7  ;;  %s2450_s12 = int_to_ptr.vmem [resolvable:$true] %s457_s12 }
  0xa3   : > { %s464_s0 = sand.u32 1, %s2131_s26   ;;  %s446_s3 = scalar_lea.sflag [#allocation5], %s2432_s14 }
  0xa4   : > { %p1975_p12 = pneg %p2446_p4 }
  0xa7   : > { %s2442_s17 = scalar_lea.hbm %s2784_s18, %s1534_s13  ;;  %s1978_s5 = scalar_lea.hbm %s2784_s18, 128 }
  0xa8   : > { %s1973_s7 = scalar_lea.hbm %s2442_s17, 64  ;;  %p1979_p11 = scmp.lt.u32.totalorder %s2442_s17, %s2784_s18 }
  0xa9   : > { %p1974_p8 = scmp.ne.s32.totalorder %s2442_s17, %s1973_s7  ;;  %p1980_p13 = scmp.lt.u32.totalorder %s1978_s5, %s1973_s7 }
  0xaa   : > { %p1982_p2 = scmp.lt.u32.totalorder %s1973_s7, %s2442_s17 }
  0xab   : > { %p1976_p5 = pnand %p1975_p12, %p1974_p8  ;;  %p1981_p3 = por %p1980_p13, %p1979_p11 }
  0xad   : > { %p1977_p0 = pneg %p1976_p5  ;;  %p1983_p6 = por %p1982_p2, %p1981_p3 }
  0xaf   : > { %p1984_p7 = pnand %p1983_p6, %p1977_p0 }
  0xb1   : > { %1987 = shalt.err (!%p1984_p7)
}
  0xb2   : > { %s1988_s30 = scalar_lea.vmem %s2450_s12, 64  ;;  %s2140_s13 = smov [#allocation4]  }
  0xb3   : > { %p1989_p9 = scmp.ne.s32.totalorder %s2450_s12, %s1988_s30  ;;  %s1993_s19 = sshll.u32 %s2140_s13, 4  ;;  %s1994_s19 = int_to_ptr.vmem [resolvable:$false] %s1993_s19 }
  0xb4   : > { %s1995_s1 = scalar_lea.vmem %s1994_s19, 128  ;;  %p1996_p5 = scmp.lt.s32.totalorder %s2450_s12, %s1994_s19 }
  0xb5   : > { %p1991_p1 = pnand %p1989_p9, %p1975_p12  ;;  %p1997_p11 = scmp.lt.s32.totalorder %s1995_s1, %s1988_s30 }
  0xb7   : > { %p1992_p8 = pneg %p1991_p1  ;;  %p1998_p13 = por %p1997_p11, %p1996_p5 }
  0xb9   : > { %p1999_p3 = pnand %p1998_p13, %p1992_p8 }
  0xbb   : > { %2002 = shalt.err (!%p1999_p3)
}
  0xbc   : > { %1725 = dma.hbm_to_vmem [thread:$0]  (!%p2446_p4), %s2442_s17, 64, %s2450_s12, %s446_s3  }
  0xbd   : > { %s1535_s15 = sshll.u32 %s2432_s14, 1  ;;  %s1536_s7 = sshll.u32 %s2127_s25, 5 }
  0xbe   : > { %s2786_s5 = sld [smem:[#allocation29_spill]]  ;;  %s468_s29 = scalar_lea.vmem [#allocation10], %s1535_s15 }
  0xbf   : > { %s476_s30 = sshll.u32 %s468_s29, 4  ;;  %s465_s13 = scalar_lea.sflag [#allocation11], %s464_s0  ;;  %s477_s30 = int_to_ptr.vmem [resolvable:$true] %s476_s30 }
  0xc4   : > { %s2484_s6 = scalar_lea.hbm %s2786_s5, %s1536_s7  ;;  %s2008_s12 = scalar_lea.hbm %s2786_s5, 64 }
  0xc5   : > { %s2003_s19 = scalar_lea.hbm %s2484_s6, 32  ;;  %p2009_p7 = scmp.lt.u32.totalorder %s2484_s6, %s2786_s5 }
  0xc6   : > { %p2004_p0 = scmp.ne.s32.totalorder %s2484_s6, %s2003_s19  ;;  %p2010_p9 = scmp.lt.u32.totalorder %s2008_s12, %s2003_s19 }
  0xc7   : > { %p2012_p8 = scmp.lt.u32.totalorder %s2003_s19, %s2484_s6 }
  0xc8   : > { %p2006_p2 = pnand %p2004_p0, %p1975_p12  ;;  %p2011_p1 = por %p2010_p9, %p2009_p7 }
  0xca   : > { %p2007_p6 = pneg %p2006_p2  ;;  %p2013_p5 = por %p2012_p8, %p2011_p1 }
  0xcc   : > { %p2014_p11 = pnand %p2013_p5, %p2007_p6 }
  0xce   : > { %2017 = shalt.err (!%p2014_p11)
}
  0xcf   : > { %s2018_s0 = scalar_lea.vmem %s477_s30, 32  ;;  %s2141_s15 = smov [#allocation10]  }
  0xd0   : > { %p2019_p13 = scmp.ne.s32.totalorder %s477_s30, %s2018_s0  ;;  %s2023_s7 = sshll.u32 %s2141_s15, 4  ;;  %s2024_s7 = int_to_ptr.vmem [resolvable:$false] %s2023_s7 }
  0xd1   : > { %s2025_s20 = scalar_lea.vmem %s2024_s7, 64  ;;  %p2026_p2 = scmp.lt.s32.totalorder %s477_s30, %s2024_s7 }
  0xd2   : > { %p2021_p3 = pnand %p2019_p13, %p1975_p12  ;;  %p2027_p10 = scmp.lt.s32.totalorder %s2025_s20, %s2018_s0 }
  0xd4   : > { %p2022_p0 = pneg %p2021_p3  ;;  %p2028_p7 = por %p2027_p10, %p2026_p2 }
  0xd6   : > { %p2029_p9 = pnand %p2028_p7, %p2022_p0 }
  0xd8   : > { %2032 = shalt.err (!%p2029_p9)
}
  0xd9   : > { %1728 = dma.hbm_to_vmem [thread:$0]  (!%p2446_p4), %s2484_s6, 32, %s477_s30, %s465_s13  }
  0xda   : > { %s2787_s28 = sld [smem:[#allocation26_spill]] }
  0xe0   : > { %p2788_p6 = scmp.ne.s32.totalorder %s2787_s28, 0 }
  0xe1   : > { %s2789_s29 = sld [smem:[#allocation24_spill]] (!%p2788_p6)  ;;  %s2510_s19 = sand.u32 (!%p2788_p6), 1, %s2115_s22  }
  0xe2   : > { %485 = sbr.rel (%p2788_p6) target bundleno = 1562 (0x61a), region = 68  ;;  %s1538_s14 = sshll.u32 (!%p2788_p6), %s2510_s19, 2 }
  0xe3   : > { %s488_s17 = scalar_lea.sflag (!%p2788_p6), [#allocation5], %s2510_s19  ;;  %s2514_s12 = scalar_lea.vmem (!%p2788_p6), [#allocation4], %s1538_s14 }
  0xe7   : > { %p2790_p10 = scmp.ne.s32.totalorder (!%p2788_p6), %s2789_s29, 0 }
  0xe9   : > { %2086 = dma.done.wait (%p2790_p10), %s488_s17, 64  }
  0xea   : > { %2088 = vsyncadd (%p2790_p10), %s488_s17, 4294967232 }
  0xeb   : > { %2090 = dma.done.wait (%p2790_p10), [#allocation8], 128  }
  0xec   : > { %2092 = vsyncadd (%p2790_p10), [#allocation8], 4294967168  ;;  %s504_s21 = sand.u32 1, %s2248_s27   ;;  %s1539_s6 = sshll.u32 %s2510_s19, 1 }
  0xed   : > { %s505_s30 = scalar_lea.sflag [#allocation11], %s504_s21  ;;  %s2526_s13 = scalar_lea.vmem [#allocation10], %s1539_s6 }
  0xee   : > { %2094 = dma.done.wait (%p2790_p10), %s505_s30, 32  }
  0xef   : > { %2096 = vsyncadd (%p2790_p10), %s505_s30, 4294967264  ;;  %p2791_p4 = scmp.eq.s32.totalorder %s2248_s27, 0 }
  0xf1   : > { %2098 = dma.done.wait (%p2791_p4), [#allocation11], 256   ;;  %p2792_p12 = pmov %p2791_p4 }
  0xf2   : > { %p2793_p1 = pmov %p2791_p4 }
  0xf3   : > { %2100 = vsyncadd (%p2792_p12), [#allocation11], 4294967040 }
  0xf4   : > { %2102 = dma.done.wait (%p2793_p1), [#allocation14], 272   ;;  %p2794_p8 = pmov %p2793_p1 }
  0xf5   : > { %v2142_v0 = vmov 0.0   ;;  %vm2143_vm0 = vmmov 0   ;;  %s2795_s0 = sld [smem:[#allocation31_spill]]  ;;  %v573_v3 = vld [vmem:[#allocation7] sm:$0xf]  ;;  %vm597_vm1 = vcmask 261120  }
  0xf6   : > { %2104 = vsyncadd (%p2794_p8), [#allocation14], 4294967024  ;;  %1604 = vmatprep.subr.bf16.mxu0 %v2142_v0  ;;  %1608 = vmatprep.mubr.msk.bf16.mxu0 %vm2143_vm0, %v2142_v0  ;;  %v1807_v4 = vld [vmem:[#allocation12] sm:$0xff]   ;;  %v1808_v5 = vld [vmem:[#allocation12 + $0x8] sm:$0xff]   ;;  %s2796_s28 = sld [smem:[#allocation32_spill]]  ;;  %vm710_vm2 = vcmask 60416  }
  0xf7   : > { %1612 = vmatprep.subr.bf16.mxu1 %v2142_v0  ;;  %1616 = vmatprep.mubr.msk.bf16.mxu1 %vm2143_vm0, %v2142_v0  ;;  %v749_v6 = vld [vmem:[%s2514_s12] sm:$0xf]  ;;  %v1810_v8 = vld [vmem:[#allocation13 + $0x8] sm:$0xff]   ;;  %s2144_s29 = smov 104   ;;  %s2145_s14 = smov 120   ;;  %vm822_vm3 = vcmask 64512  }
  0xf8   : > { %v1809_v7 = vld [vmem:[#allocation13] sm:$0xff]   ;;  %v642_v9 = vld [vmem:[#allocation9] sm:$0xf]  ;;  %s2797_s21 = sld [smem:[#allocation30_spill]]  ;;  %s2146_s6 = smov 112   ;;  %vm886_vm4 = vcmask 1043456  }
  0xf9   : > { %1613 = vmatpush3.bf16.msra.mxu1 %v1809_v7  ;;  %v1548_v26 = vld [vmem:[#allocation15] ss:$0 sm:$0xff]  ;;  %v818_v47 = vld [vmem:[%s2526_s13] sm:$0x3]  ;;  %v2147_v48 = vmov 0   ;;  %s2148_s30 = smov 8  }
  0xfa   : > { %1614 = vmatprep.subr.bf16.mxu1 %v2142_v0  ;;  %vm819_vm5 = vnez %v818_v47  ;;  %s2800_s1 = sld [smem:[#allocation33_spill]]  ;;  %s2149_s7 = smov 16   ;;  %vm1282_vm7 = vcmask 130048   ;;  %vm1285_vm8 = vcmask 195584  }
  0xfb   : > { %v1805_v1 = vld [vmem:[%s2795_s0] sm:$0xff]   ;;  %v1806_v2 = vld [vmem:[%s2795_s0 + $0x8] sm:$0xff]   ;;  %v869_v49 = vsel %vm819_vm5, 16843009, %v2147_v48  ;;  %s2150_s20 = smov 24   ;;  %s2801_s17 = sld [smem:[#allocation34_spill]] }
  0xfc   : > { %1605 = vmatpush3.bf16.msra.mxu0 %v1805_v1  ;;  %v1544_v10 = vld [vmem:[%s2796_s28] ss:$0 sm:$0xff]  ;;  %v870_v50 = vunpack.c.0.s8 %v869_v49  ;;  %s1543_s28 = sshll.u32 %s2510_s19, 3  ;;  %s1571_s12 = sshll.u32 %s2123_s24, 7 }
  0xfd   : > { %1606 = vmatprep.subr.bf16.mxu0 %v2142_v0  ;;  %1615 = vmatpush3.bf16.msra.mxu1 %v1810_v8  ;;  %s2802_s3 = sld [smem:[#allocation35_spill]]  ;;  %s1355_s24 = scalar_lea.sflag [#allocation6], %s2510_s19 }
  0xfe   : > { %1628 = vmatprep.subr.bf16.mxu1 %v2142_v0  ;;  %v1554_v17 = vld [vmem:[%s2797_s21] ss:$0 sm:$0xff]  ;;  %vm2610_vm6 = vcmp.ne.s32.totalorder %v870_v50, 0  ;;  %s565_s21 = scalar_lea.vmem [#allocation16], %s1543_s28  ;;  %p2803_p11 = scmp.ne.s32.totalorder %s2783_s16, 0 }
 0x100   : > { %1607 = vmatpush3.bf16.msra.mxu0 %v1806_v2  ;;  %1617 = vmatmul.mubr.msk.bf16.vlgmr.msra.gmra.mrb[0].mxu1 %vm597_vm1, %v642_v9 }
 0x101   : > { %1620 = vmatprep.subr.bf16.mxu0 %v2142_v0  ;;  %1630 = vmatprep.mubr.msk.bf16.mxu1 %vm2143_vm0, %v2142_v0 }
 0x103   : > { %1609 = vmatmul.mubr.msk.bf16.vlgmr.msra.gmra.mrb[0].mxu0 %vm597_vm1, %v573_v3  ;;  %s2669_s27 = scalar_lea.hbm %s2802_s3, %s1571_s12 }
 0x104   : > { %1621 = vmatpush3.bf16.msra.mxu0 %v1807_v4  ;;  %1624 = vmatprep.mubr.msk.bf16.mxu0 %vm2143_vm0, %v2142_v0 }
 0x105   : > { %1622 = vmatprep.subr.bf16.mxu0 %v2142_v0 }
 0x108   : > { %1623 = vmatpush3.bf16.msra.mxu0 %v1808_v5 }
 0x109   : > { %1634 = vmatprep.subr.bf16.mxu0 %v2142_v0 }
 0x10b   : > { %1625 = vmatmul.mubr.msk.bf16.vlgmr.msra.gmra.mrb[4].mxu0 %vm597_vm1, %v749_v6 }
 0x10c   : > { %1636 = vmatprep.mubr.msk.bf16.mxu0 %vm2143_vm0, %v2142_v0 }
 0x1d3   : > { %v703_v27 = vpop.f32.mrb[0].mxu1 }
 0x1d4   : > { %v704_v28 = vadd.f32 %v1548_v26, %v703_v27  ;;  %v1618_v29 = vpop.f32.mrb[1].mxu1 }
 0x1d5   : > { %v706_v30 = vpop.f32.mrb[2].mxu1 }
 0x1d6   : > { %v635_v11 = vpop.f32.mrb[0].mxu0  ;;  %v2584_v31 = vpack.c.bf16 %v704_v28, %v704_v28  ;;  %v1619_v32 = vpop.f32.mrb[3].mxu1 }
 0x1d7   : > { %v636_v12 = vadd.f32 %v1544_v10, %v635_v11  ;;  %v1610_v13 = vpop.f32.mrb[1].mxu0 }
 0x1d8   : > { %v638_v14 = vpop.f32.mrb[2].mxu0  ;;  %712 = vst.msk [vmem:[#allocation3] sm:$0xf] %vm710_vm2, %v2584_v31 }
 0x1d9   : > { %v641_v15 = vpack.c.bf16 %v636_v12, %v636_v12  ;;  %v1611_v16 = vpop.f32.mrb[3].mxu0 }
 0x1db   : > { %711 = vst.msk [vmem:[#allocation2] sm:$0xf] %vm710_vm2, %v641_v15  ;;  %739 = vrot.lane.b32.xlu1 %v641_v15, %s2144_s29  ;;  %716 = vrot.lane.b32.xlu0 %v641_v15, %s2145_s14 }
 0x1de   : > { %v811_v18 = vpop.f32.mrb[4].mxu0 }
 0x1df   : > { %729 = vrot.lane.b32.xlu0 %v641_v15, %s2146_s6  ;;  %v812_v19 = vadd.f32 %v1554_v17, %v811_v18  ;;  %v1626_v20 = vpop.f32.mrb[5].mxu0  ;;  %v821_v33 = vld [vmem:[#allocation3] sm:$0xf] }
 0x1e0   : > { %v814_v21 = vpop.f32.mrb[6].mxu0  ;;  %v888_v34 = vsel %vm886_vm4, %v821_v33, 0 }
 0x1e1   : > { %v817_v22 = vpack.c.bf16 %v812_v19, %v812_v19  ;;  %v1627_v23 = vpop.f32.mrb[7].mxu0  ;;  %1635 = vmatpush3.bf16.msra.mxu0 %v888_v34 }
 0x1e2   : > { %v820_v24 = vld [vmem:[#allocation2] sm:$0xf]  ;;  %1646 = vmatprep.subr.bf16.mxu0 %v2142_v0 }
 0x1e3   : > { %v827_v25 = vsel %vm822_vm3, %v820_v24, 0  ;;  %938 = vrot.lane.b32.xlu1 %v817_v22, %s2145_s14  ;;  %1050 = vrot.lane.b32.xlu0 %v817_v22, %s2146_s6 }
 0x1e4   : > { %1629 = vmatpush3.bf16.xpose.msra.mxu1 %v827_v25 }
 0x1e5   : > { %1640 = vmatprep.subr.bf16.mxu1 %v2142_v0 }
 0x1e7   : > { %1162 = vrot.lane.b32.xlu1 %v817_v22, %s2144_s29 }
 0x1eb   : > { %1631 = vmatmul.mubr.msk.bf16.vlgmr.msra.gmra.mrb[4].mxu1 %vm822_vm3, %v817_v22  ;;  %724 = vrot.lane.b32.xlu1 %v2584_v31, %s2145_s14 }
 0x1ec   : > { %1642 = vmatprep.mubr.msk.bf16.mxu1 %vm2143_vm0, %v2142_v0 }
 0x24d   : > { %v740_v35 = vpop.permute.xlu1 %739  ;;  %v717_v36 = vpop.permute.xlu0 %716 }
 0x24e   : > { %743 = vst.msk [vmem:[#allocation2 + $0xc] sm:$0xf] %vm710_vm2, %v740_v35  ;;  %720 = vst.msk [vmem:[#allocation2 + $0x4] sm:$0xf] %vm710_vm2, %v717_v36 }
 0x251   : > { %v730_v37 = vpop.permute.xlu0 %729 }
 0x252   : > { %733 = vst.msk [vmem:[#allocation2 + $0x8] sm:$0xf] %vm710_vm2, %v730_v37 }
 0x255   : > { %v934_v38 = vld [vmem:[#allocation2 + $0x4] sm:$0xf]  ;;  %v939_v41 = vpop.permute.xlu1 %938  ;;  %v1159_v43 = vld [vmem:[#allocation2 + $0xc] sm:$0xf]  ;;  %v1051_v44 = vpop.permute.xlu0 %1050 }
 0x256   : > { %v944_v39 = vsel %vm822_vm3, %v934_v38, 0  ;;  %v1168_v45 = vsel %vm822_vm3, %v1159_v43, 0 }
 0x257   : > { %1641 = vmatpush3.bf16.xpose.msra.mxu1 %v944_v39 }
 0x258   : > { %1652 = vmatprep.subr.bf16.mxu1 %v2142_v0 }
 0x259   : > { %v1047_v40 = vld [vmem:[#allocation2 + $0x8] sm:$0xf]  ;;  %v1163_v46 = vpop.permute.xlu1 %1162 }
 0x25a   : > { %v1056_v42 = vsel %vm822_vm3, %v1047_v40, 0 }
 0x25d   : > { %v725_v58 = vpop.permute.xlu1 %724 }
 0x25e   : > { %1643 = vmatmul.mubr.msk.bf16.vlgmr.msra.gmra.mrb[8].mxu1 %vm822_vm3, %v939_v41  ;;  %728 = vst.msk [vmem:[#allocation3 + $0x4] sm:$0xf] %vm710_vm2, %v725_v58 }
 0x25f   : > { %1653 = vmatpush3.bf16.xpose.msra.mxu1 %v1056_v42  ;;  %1654 = vmatprep.mubr.msk.bf16.mxu1 %vm2143_vm0, %v2142_v0 }
 0x260   : > { %1664 = vmatprep.subr.bf16.mxu1 %v2142_v0 }
 0x265   : > { %v936_v17 = vld [vmem:[#allocation3 + $0x4] sm:$0xf] }
 0x266   : > { %1655 = vmatmul.mubr.msk.bf16.vlgmr.msra.gmra.mrb[12].mxu1 %vm822_vm3, %v1051_v44  ;;  %v1001_v20 = vsel %vm886_vm4, %v936_v17, 0 }
 0x267   : > { %1665 = vmatpush3.bf16.xpose.msra.mxu1 %v1168_v45  ;;  %1666 = vmatprep.mubr.msk.bf16.mxu1 %vm2143_vm0, %v2142_v0 }
 0x268   : > { %1676 = vmatprep.subr.bf16.mxu1 %v2142_v0 }
 0x26e   : > { %1667 = vmatmul.mubr.msk.bf16.vlgmr.msra.gmra.mrb[16].mxu1 %vm822_vm3, %v1163_v46 }
 0x26f   : > { %1680 = vmatprep.mubr.msk.bf16.mxu1 %vm2143_vm0, %v2142_v0 }
 0x2be   : > { %v863_v52 = vpop.f32.mrb[4].mxu1 }
 0x2bf   : > { %v872_v53 = vsel %vm2610_vm6, %v863_v52, -1e+09  ;;  %v1632_v54 = vpop.f32.mrb[5].mxu1 }
 0x2c0   : > { %v866_v55 = vpop.f32.mrb[6].mxu1  ;;  %v873_v56 = vsel %vm822_vm3, %v872_v53, -inf }
 0x2c1   : > { %874 = vmax.xlane.f32.xlu0 %v873_v56  ;;  %v1633_v57 = vpop.f32.mrb[7].mxu1 }
 0x331   : > { %v980_v59 = vpop.f32.mrb[8].mxu1 }
 0x332   : > { %v986_v60 = vsel %vm2610_vm6, %v980_v59, -1e+09  ;;  %v1644_v61 = vpop.f32.mrb[9].mxu1  ;;  %v1811_v59 = vld [vmem:[%s2800_s1] sm:$0xff]  }
 0x333   : > { %v983_v62 = vpop.f32.mrb[10].mxu1  ;;  %v987_v63 = vsel %vm822_vm3, %v986_v60, -inf  ;;  %1677 = vmatpush3.bf16.msra.mxu1 %v1811_v59 }
 0x334   : > { %988 = vmax.xlane.f32.xlu1 %v987_v63  ;;  %v1645_v1 = vpop.f32.mrb[11].mxu1  ;;  %1678 = vmatprep.subr.bf16.mxu1 %v2142_v0 }
 0x339   : > { %v1092_v2 = vpop.f32.mrb[12].mxu1 }
 0x33a   : > { %v1098_v3 = vsel %vm2610_vm6, %v1092_v2, -1e+09  ;;  %v1656_v4 = vpop.f32.mrb[13].mxu1 }
 0x33b   : > { %v1095_v5 = vpop.f32.mrb[14].mxu1  ;;  %v1099_v6 = vsel %vm822_vm3, %v1098_v3, -inf }
 0x33c   : > { %1100 = vmax.xlane.f32.xlu0 %v1099_v6  ;;  %v1657_v7 = vpop.f32.mrb[15].mxu1 }
 0x341   : > { %v1204_v8 = vpop.f32.mrb[16].mxu1 }
 0x342   : > { %v1210_v9 = vsel %vm2610_vm6, %v1204_v8, -1e+09  ;;  %v1668_v10 = vpop.f32.mrb[17].mxu1 }
 0x343   : > { %v1207_v11 = vpop.f32.mrb[18].mxu1  ;;  %v1211_v12 = vsel %vm822_vm3, %v1210_v9, -inf }
 0x344   : > { %1212 = vmax.xlane.f32.xlu0 %v1211_v12  ;;  %v1669_v13 = vpop.f32.mrb[19].mxu1 }
 0x345   : > { %744 = vrot.lane.b32.xlu1 %v2584_v31, %s2144_s29 }
 0x34e   : > { %v875_v14 = vpop.xlane.xlu0 %874 }
 0x34f   : > { %v876_v15 = vsub.f32 %v872_v53, %v875_v14 }
 0x351   : > { %v877_v16 = vmul.f32 1.442695, %v876_v15 }
 0x353   : > { %1813 = vpow2.f32 %v877_v16 }
 0x35a   : > { %734 = vrot.lane.b32.xlu0 %v2584_v31, %s2146_s6  ;;  %s1369_s6 = sshll.u32 %s565_s21, 4  ;;  %s2671_s6 = int_to_ptr.vmem [resolvable:$true] %s1369_s6 }
 0x35b   : > { %s2033_s15 = scalar_lea.vmem %s2671_s6, 128 }
 0x35c   : > { %p2034_p5 = scmp.ne.s32.totalorder %s2671_s6, %s2033_s15 }
 0x35d   : > { %v1814_v18 = vpop.eup %1813 }
 0x35e   : > { %v882_v19 = vpack.c.bf16 %v1814_v18, %v1814_v18  ;;  %v879_v35 = vsel %vm822_vm3, %v1814_v18, 0.0  ;;  %p2035_p13 = pnand %p2034_p5, %p2803_p11 }
 0x360   : > { %1637 = vmatmul.mubr.msk.bf16.vlgmr.msra.gmra.mrb[8].mxu0 %vm822_vm3, %v882_v19  ;;  %p2036_p3 = pneg %p2035_p13 }
 0x361   : > { %1647 = vmatpush3.bf16.msra.mxu0 %v1001_v20  ;;  %1648 = vmatprep.mubr.msk.bf16.mxu0 %vm2143_vm0, %v2142_v0 }
 0x362   : > { %1658 = vmatprep.subr.bf16.mxu0 %v2142_v0 }
 0x3c1   : > { %v989_v21 = vpop.xlane.xlu1 %988 }
 0x3c2   : > { %v990_v22 = vsub.f32 %v986_v60, %v989_v21  ;;  %v1812_v60 = vld [vmem:[%s2800_s1 + $0x8] sm:$0xff]  }
 0x3c3   : > { %1679 = vmatpush3.bf16.msra.mxu1 %v1812_v60 }
 0x3c4   : > { %v991_v23 = vmul.f32 1.442695, %v990_v22  ;;  %v1566_v22 = vld [vmem:[%s2801_s17] ss:$0 sm:$0xff] }
 0x3c5   : > { %v745_v24 = vpop.permute.xlu1 %744 }
 0x3c6   : > { %1815 = vpow2.f32 %v991_v23  ;;  %748 = vst.msk [vmem:[#allocation3 + $0xc] sm:$0xf] %vm710_vm2, %v745_v24 }
 0x3c9   : > { %v1101_v25 = vpop.xlane.xlu0 %1100 }
 0x3ca   : > { %v1102_v26 = vsub.f32 %v1098_v3, %v1101_v25 }
 0x3cc   : > { %v1103_v27 = vmul.f32 1.442695, %v1102_v26 }
 0x3cd   : > { %v1161_v40 = vld [vmem:[#allocation3 + $0xc] sm:$0xf] }
 0x3ce   : > { %1817 = vpow2.f32 %v1103_v27  ;;  %v1225_v44 = vsel %vm886_vm4, %v1161_v40, 0 }
 0x3d0   : > { %v1816_v28 = vpop.eup %1815 }
 0x3d1   : > { %v1213_v29 = vpop.xlane.xlu0 %1212  ;;  %v993_v30 = vsel %vm822_vm3, %v1816_v28, 0.0  ;;  %v996_v31 = vpack.c.bf16 %v1816_v28, %v1816_v28 }
 0x3d2   : > { %v1214_v32 = vsub.f32 %v1210_v9, %v1213_v29  ;;  %994 = vadd.xlane.f32.xlu1 %v993_v30 }
 0x3d3   : > { %1649 = vmatmul.mubr.msk.bf16.vlgmr.msra.gmra.mrb[12].mxu0 %vm822_vm3, %v996_v31 }
 0x3d4   : > { %v1215_v33 = vmul.f32 1.442695, %v1214_v32  ;;  %1660 = vmatprep.mubr.msk.bf16.mxu0 %vm2143_vm0, %v2142_v0 }
 0x3d5   : > { %v735_v34 = vpop.permute.xlu0 %734 }
 0x3d6   : > { %1819 = vpow2.f32 %v1215_v33  ;;  %738 = vst.msk [vmem:[#allocation3 + $0x8] sm:$0xf] %vm710_vm2, %v735_v34  ;;  %880 = vadd.xlane.f32.xlu1 %v879_v35 }
 0x3d8   : > { %v1818_v36 = vpop.eup %1817 }
 0x3d9   : > { %v1105_v37 = vsel %vm822_vm3, %v1818_v36, 0.0  ;;  %v1108_v42 = vpack.c.bf16 %v1818_v36, %v1818_v36 }
 0x3da   : > { %1106 = vadd.xlane.f32.xlu0 %v1105_v37 }
 0x3dd   : > { %v1049_v38 = vld [vmem:[#allocation3 + $0x8] sm:$0xf] }
 0x3de   : > { %v1113_v39 = vsel %vm886_vm4, %v1049_v38, 0 }
 0x3df   : > { %1659 = vmatpush3.bf16.msra.mxu0 %v1113_v39 }
 0x3e0   : > { %v1820_v41 = vpop.eup %1819  ;;  %1670 = vmatprep.subr.bf16.mxu0 %v2142_v0 }
 0x3e1   : > { %v1217_v43 = vsel %vm822_vm3, %v1820_v41, 0.0  ;;  %v1220_v45 = vpack.c.bf16 %v1820_v41, %v1820_v41 }
 0x3e2   : > { %1218 = vadd.xlane.f32.xlu0 %v1217_v43  ;;  %1661 = vmatmul.mubr.msk.bf16.vlgmr.msra.gmra.mrb[16].mxu0 %vm822_vm3, %v1108_v42 }
 0x3e3   : > { %1671 = vmatpush3.bf16.msra.mxu0 %v1225_v44  ;;  %1672 = vmatprep.mubr.msk.bf16.mxu0 %vm2143_vm0, %v2142_v0 }
 0x3ea   : > { %1673 = vmatmul.mubr.msk.bf16.vlgmr.msra.gmra.mrb[20].mxu0 %vm822_vm3, %v1220_v45 }
 0x433   : > { %v924_v46 = vpop.f32.mrb[8].mxu0 }
 0x434   : > { %v1638_v47 = vpop.f32.mrb[9].mxu0 }
 0x435   : > { %v927_v48 = vpop.f32.mrb[10].mxu0 }
 0x436   : > { %v1639_v49 = vpop.f32.mrb[11].mxu0 }
 0x45f   : > { %v995_v50 = vpop.xlane.xlu1 %994 }
 0x460   : > { %1821 = vrcp.f32 %v995_v50 }
 0x463   : > { %v881_v0 = vpop.xlane.xlu1 %880 }
 0x467   : > { %v1107_v55 = vpop.xlane.xlu0 %1106 }
 0x468   : > { %1823 = vrcp.f32 %v1107_v55 }
 0x46a   : > { %v1822_v51 = vpop.eup %1821 }
 0x46f   : > { %v1219_v61 = vpop.xlane.xlu0 %1218 }
 0x470   : > { %1825 = vrcp.f32 %v1219_v61 }
 0x471   : > { %1827 = vrcp.f32 %v881_v0 }
 0x472   : > { %v1824_v62 = vpop.eup %1823 }
 0x47a   : > { %v1826_v6 = vpop.eup %1825 }
 0x47b   : > { %v1828_v13 = vpop.eup %1827 }
 0x47c   : > { %v931_v14 = vmul.f32 %v1828_v13, %v924_v46 }
 0x47e   : > { %v932_v17 = vpack.c.bf16 %v931_v14, %v931_v14 }
 0x4a6   : > { %v1037_v52 = vpop.f32.mrb[12].mxu0 }
 0x4a7   : > { %v1044_v53 = vmul.f32 %v1822_v51, %v1037_v52  ;;  %v1650_v54 = vpop.f32.mrb[13].mxu0 }
 0x4a8   : > { %v1040_v56 = vpop.f32.mrb[14].mxu0 }
 0x4a9   : > { %v1045_v57 = vpack.c.bf16 %v1044_v53, %v1044_v53  ;;  %v1651_v58 = vpop.f32.mrb[15].mxu0 }
 0x4ab   : > { %1271 = vrot.lane.b32.xlu0 %v1045_v57, %s2148_s30 }
 0x4b5   : > { %v1149_v63 = vpop.f32.mrb[16].mxu0 }
 0x4b6   : > { %v1156_v1 = vmul.f32 %v1824_v62, %v1149_v63  ;;  %v1662_v2 = vpop.f32.mrb[17].mxu0 }
 0x4b7   : > { %v1152_v3 = vpop.f32.mrb[18].mxu0 }
 0x4b8   : > { %v1157_v4 = vpack.c.bf16 %v1156_v1, %v1156_v1  ;;  %v1663_v5 = vpop.f32.mrb[19].mxu0 }
 0x4ba   : > { %1274 = vrot.lane.b32.xlu1 %v1157_v4, %s2149_s7  ;;  %s2151_s7 = smov [#allocation16]  }
 0x4bd   : > { %v1261_v7 = vpop.f32.mrb[20].mxu0 }
 0x4be   : > { %v1268_v8 = vmul.f32 %v1826_v6, %v1261_v7  ;;  %v1674_v9 = vpop.f32.mrb[21].mxu0 }
 0x4bf   : > { %v1264_v10 = vpop.f32.mrb[22].mxu0 }
 0x4c0   : > { %v1269_v11 = vpack.c.bf16 %v1268_v8, %v1268_v8  ;;  %v1675_v12 = vpop.f32.mrb[23].mxu0 }
 0x4c2   : > { %1277 = vrot.lane.b32.xlu1 %v1269_v11, %s2150_s20  ;;  %s2037_s20 = sshll.u32 %s2151_s7, 4  ;;  %s2038_s20 = int_to_ptr.vmem [resolvable:$false] %s2037_s20 }
 0x4c3   : > { %s2039_s28 = scalar_lea.vmem %s2038_s20, 256  ;;  %p2040_p0 = scmp.lt.s32.totalorder %s2671_s6, %s2038_s20 }
 0x4c4   : > { %p2041_p2 = scmp.lt.s32.totalorder %s2039_s28, %s2033_s15 }
 0x4c6   : > { %p2042_p7 = por %p2041_p2, %p2040_p0 }
 0x4c8   : > { %p2043_p9 = pnand %p2042_p7, %p2036_p3 }
 0x51d   : > { %v1272_v15 = vpop.permute.xlu0 %1271 }
 0x51e   : > { %v1281_v18 = vsel %vm822_vm3, %v932_v17, %v1272_v15 }
 0x52c   : > { %v1275_v16 = vpop.permute.xlu1 %1274 }
 0x52d   : > { %v1284_v19 = vsel %vm1282_vm7, %v1281_v18, %v1275_v16 }
 0x534   : > { %v1278_v20 = vpop.permute.xlu1 %1277 }
 0x535   : > { %v1287_v21 = vsel %vm1285_vm8, %v1284_v19, %v1278_v20 }
 0x536   : > { %1681 = vmatmul.mubr.msk.bf16.vlgmr.msra.gmra.mrb[20].mxu1 %vm597_vm1, %v1287_v21 }
 0x609   : > { %v1347_v23 = vpop.f32.mrb[20].mxu1 }
 0x60a   : > { %v1348_v24 = vadd.f32 %v1566_v22, %v1347_v23  ;;  %v1682_v25 = vpop.f32.mrb[21].mxu1 }
 0x60b   : > { %v1350_v26 = vpop.f32.mrb[22].mxu1 }
 0x60c   : > { %v1683_v27 = vpop.f32.mrb[23].mxu1  ;;  %1353 = vst.msk [vmem:[%s565_s21] sm:$0xff] %vm597_vm1, %v1348_v24 }
 0x60d   : > { %2046 = shalt.err (!%p2043_p9)
}
 0x60e   : > { %s2047_s19 = scalar_lea.hbm %s2669_s27, 128  ;;  %s2051_s17 = scalar_lea.hbm %s2802_s3, 256 }
 0x60f   : > { %p2048_p6 = scmp.ne.s32.totalorder %s2669_s27, %s2047_s19  ;;  %p2052_p12 = scmp.lt.u32.totalorder %s2669_s27, %s2802_s3 }
 0x610   : > { %p2053_p1 = scmp.lt.u32.totalorder %s2051_s17, %s2047_s19  ;;  %p2055_p5 = scmp.lt.u32.totalorder %s2047_s19, %s2669_s27 }
 0x611   : > { %p2049_p10 = pnand %p2048_p6, %p2803_p11 }
 0x612   : > { %p2054_p8 = por %p2053_p1, %p2052_p12 }
 0x613   : > { %p2050_p4 = pneg %p2049_p10 }
 0x614   : > { %p2056_p13 = por %p2055_p5, %p2054_p8 }
 0x616   : > { %p2057_p3 = pnand %p2056_p13, %p2050_p4 }
 0x618   : > { %2060 = shalt.err (!%p2057_p3)
}
 0x619   : > { %1704 = dma.vmem_to_hbm [thread:$0]  (%p2803_p11), %s2671_s6, 128, %s2669_s27, %s1355_s24  }
 0x61a PF: > { %s2804_s30 = sld [smem:[#allocation23_spill]]  ;;  %s2805_s13 = sld [smem:[#allocation25_spill]] }
 0x61b   : > { %p2807_p2 = scmp.ge.s32.totalorder %s2131_s26, 2 }
 0x620   : > { %s1381_s15 = sand.u32 1, %s2804_s30   ;;  %p2806_p0 = scmp.ne.s32.totalorder %s2805_s13, 0 }
 0x621   : > { %s1382_s7 = scalar_lea.sflag [#allocation6], %s1381_s15 }
 0x622   : > { %p1730_p7 = pnand %p2807_p2, %p2806_p0 }
 0x624   : > { %2106 = dma.done.wait (!%p1730_p7), %s1382_s7, 128  }
 0x625   : > { %2108 = vsyncadd (!%p1730_p7), %s1382_s7, 4294967168  ;;  %s33_s26 = sadd.s32 1, %s2131_s26   ;;  %s2808_s21 = smov %s2115_s22 }
 0x626   : > { %p30_p9 = scmp.ge.s32.totalorder %s33_s26, 4   ;;  %s2809_s22 = smov %s2119_s23 }
 0x627   : > { %s2810_s23 = smov %s2437_s10  ;;  %s2811_s24 = smov %s2127_s25 }
 0x628   : > { %s2812_s25 = smov %s2814_s11  ;;  %32 = sbr.rel (!%p30_p9) target bundleno = 20 (0x14), region = 164 }
 0x62f   :  { %1387 = vsyncpa [#allocation5], 1 }
 0x630   :  { %1389 = vsyncpa [#allocation5 + $0x1], 1 }
 0x631   :  { %1390 = vsyncpa [#allocation8], 1 }
 0x632   :  { %1391 = vsyncpa [#allocation11], 1 }
 0x633   :  { %1393 = vsyncpa [#allocation11 + $0x1], 1 }
 0x634   :  { %1394 = vsyncpa [#allocation14], 1 }
 0x635   :  { %1395 = vsyncpa [#allocation6], 1 }
 0x636   :  { %1397 = vsyncpa [#allocation6 + $0x1], 1 }

// kernel: tpu_custom_call.1
= control target key start
LH: loop header
LB: loop body
LE: loop exit
PB: predicated region body
PF: predicated region fallthrough
CT: control target
= control target key end

     0   :  { %s2784_s0 = inlined_call_operand.hbm [shape: bf16[2,8,32], index: 0, kind: input, shape index: {}]   ;;  %s2785_s1 = inlined_call_operand.hbm [shape: bf16[2,8,32], index: 1, kind: input, shape index: {}]   ;;  %s2786_s2 = inlined_call_operand.hbm [shape: bf16[2,8,32], index: 2, kind: input, shape index: {}]   ;;  %s2787_s3 = inlined_call_operand.hbm [shape: s8[2,8,8], index: 3, kind: input, shape index: {}]   ;;  %s2788_s4 = inlined_call_operand.hbm [shape: bf16[32,32], index: 4, kind: input, shape index: {}]   ;;  %s2789_s5 = inlined_call_operand.vmem [shape: f32[1,32], index: 5, kind: input, shape index: {}]   ;;  %s2790_s6 = inlined_call_operand.vmem [shape: bf16[32,32], index: 6, kind: input, shape index: {}]   ;;  %s2791_s7 = inlined_call_operand.vmem [shape: f32[1,32], index: 7, kind: input, shape index: {}]   ;;  %s2792_s8 = inlined_call_operand.hbm [shape: bf16[32,32], index: 8, kind: input, shape index: {}]   ;;  %s2793_s9 = inlined_call_operand.hbm [shape: f32[1,32], index: 9, kind: input, shape index: {}]   ;;  %s2794_s10 = inlined_call_operand.vmem [shape: bf16[32,32], index: 10, kind: input, shape index: {}]   ;;  %s2795_s11 = inlined_call_operand.vmem [shape: f32[1,32], index: 11, kind: input, shape index: {}]   ;;  %s2796_s12 = inlined_call_operand.hbm [shape: f32[2,8,32], index: 12, kind: output, shape index: {}]  }
   0x1   :  { %2815 = sst [smem:[#allocation30_spill]] %s2785_s1 }
   0x2   :  { %2816 = sst [smem:[#allocation31_spill]] %s2788_s4 }
   0x3   :  { %2817 = sst [smem:[#allocation32_spill]] %s2789_s5 }
   0x4   :  { %2818 = sst [smem:[#allocation33_spill]] %s2791_s7 }
   0x5   :  { %2819 = sst [smem:[#allocation34_spill]] %s2792_s8 }
   0x6   :  { %2820 = sst [smem:[#allocation35_spill]] %s2794_s10 }
   0x7   :  { %2821 = sst [smem:[#allocation36_spill]] %s2795_s11 }
   0x8   :  { %2822 = sst [smem:[#allocation37_spill]] %s2796_s12 }
   0x9   :  { %17 = vsyncpa [#allocation5], 0 }
   0xa   :  { %19 = vsyncpa [#allocation5 + $0x1], 0 }
   0xb   :  { %20 = vsyncpa [#allocation8], 0 }
   0xc   :  { %22 = vsyncpa [#allocation8 + $0x1], 0 }
   0xd   :  { %23 = vsyncpa [#allocation11], 0 }
   0xe   :  { %25 = vsyncpa [#allocation11 + $0x1], 0 }
   0xf   :  { %26 = vsyncpa [#allocation14], 0 }
  0x10   :  { %27 = vsyncpa [#allocation6], 0 }
  0x11   :  { %29 = vsyncpa [#allocation6 + $0x1], 0  ;;  %s2271_s21 = smov 0   ;;  %s2273_s22 = smov 0  }
  0x12   :  { %s2275_s23 = smov 0   ;;  %s2277_s24 = smov 0  }
  0x13   :  { %s2279_s25 = smov 0   ;;  %s2281_s26 = smov 0  }
  0x14 LB: > { %2823 = sst [smem:[#allocation23_spill]] %s2165_s21  ;;  %s2302_s27 = sadd.s32 4294967295, %s2185_s26   ;;  %s2185_s26 = sphi %s2281_s26, %s35_s26   ;;  %s2181_s25 = sphi %s2279_s25, %s2874_s25   ;;  %s2177_s24 = sphi %s2277_s24, %s2873_s24   ;;  %s2173_s23 = sphi %s2275_s23, %s2869_s23   ;;  %s2169_s22 = sphi %s2273_s22, %s2872_s22   ;;  %s2165_s21 = sphi %s2271_s21, %s2871_s21  }
  0x15   : > { %2824 = sst [smem:[#allocation24_spill]] %s2173_s23  ;;  %s1577_s28 = sadd.s32 4294967294, %s2185_s26  }
  0x16   : > { %2825 = sst [smem:[#allocation25_spill]] %s2177_s24  ;;  %p69_p0 = scmp.ne.s32.totalorder %s2169_s22, %s2165_s21 }
  0x17   : > { %p2800_p1 = scmp.eq.s32.totalorder %s2302_s27, 0  ;;  %p349_p3 = scmp.eq.s32.totalorder %s1577_s28, 1 }
  0x18   : > { %p1578_p5 = scmp.ge.s32.totalorder %s2185_s26, 1  ;;  %p356_p7 = scmp.lt.s32.totalorder %s2185_s26, 3 }
  0x19   : > { %p2311_p4 = por %p2800_p1, %p69_p0  ;;  %p2316_p6 = por %p349_p3, %p69_p0 }
  0x1a   : > { %p2321_p8 = pnand %p1578_p5, %p356_p7  ;;  %s2187_s14 = smov [#allocation12]  }
  0x1b   : > { %s2826_s29 = scalar_select %p2311_p4, 1, 0 }
  0x1c   : > { %s2827_s30 = scalar_select %p2316_p6, 1, 0 }
  0x1d   : > { %s2829_s13 = scalar_select %p2321_p8, 1, 0 }
  0x1e   : > { %2828 = sst [smem:[#allocation26_spill]] %s2827_s30  ;;  %s368_s15 = sshll.u32 %s2187_s14, 4  ;;  %s2325_s15 = int_to_ptr.vmem [resolvable:$true] %s368_s15 }
  0x1f   : > { %p1762_p9 = pneg %p2321_p8  ;;  %s2188_s17 = smov [#allocation13]  }
  0x20   : > { %s390_s18 = sshll.u32 %s2188_s17, 4  ;;  %s2831_s4 = sld [smem:[#allocation31_spill]]  ;;  %s2336_s18 = int_to_ptr.vmem [resolvable:$true] %s390_s18 }
  0x21   : > { %p2332_p11 = pnand %p1762_p9, %p2800_p1 }
  0x23   : > { %s2830_s16 = scalar_select %p2332_p11, 1, 0 }
  0x24   : > { %p2346_p13 = pneg %p2332_p11 }
  0x26   : > { %s1883_s28 = scalar_lea.hbm %s2831_s4, 256 }
  0x27   : > { %p1884_p12 = scmp.ne.s32.totalorder %s2831_s4, %s1883_s28  ;;  %p1890_p5 = scmp.lt.u32.totalorder %s1883_s28, %s2831_s4 }
  0x28   : > { %s2832_s21 = scalar_select %p2346_p13, 1, 0 }
  0x29   : > { %p1886_p0 = pnand %p2346_p13, %p1884_p12 }
  0x2b   : > { %p1887_p3 = pneg %p1886_p0 }
  0x2d   : > { %p1892_p7 = pnand %p1890_p5, %p1887_p3 }
  0x2f   : > { %1895 = shalt.err (!%p1892_p7)
}
  0x30   : > { %s1896_s30 = scalar_lea.vmem %s2325_s15, 256  ;;  %p1904_p2 = scmp.lt.s32.totalorder %s2325_s15, %s2325_s15 }
  0x31   : > { %p1897_p9 = scmp.ne.s32.totalorder %s2325_s15, %s1896_s30  ;;  %p1905_p6 = scmp.lt.s32.totalorder %s1896_s30, %s1896_s30 }
  0x33   : > { %p1899_p10 = pnand %p1897_p9, %p2346_p13  ;;  %p1906_p12 = por %p1905_p6, %p1904_p2 }
  0x35   : > { %p1900_p1 = pneg %p1899_p10 }
  0x37   : > { %p1907_p0 = pnand %p1906_p12, %p1900_p1 }
  0x39   : > { %1910 = shalt.err (!%p1907_p0)
}
  0x3a   : > { %s2189_s19 = smov 64   ;;  %s2190_s12 = smov 4  }
  0x3b   : > { %1765 = dma.hbm_to_vmem [thread:$0]  (!%p2332_p11), %s2831_s4, 256, %s2325_s15, [#allocation11], %s2189_s19, %s2189_s19, %s2190_s12  }
  0x3c   : > { %s2833_s8 = sld [smem:[#allocation34_spill]] }
  0x42   : > { %s1911_s11 = scalar_lea.hbm %s2833_s8, 256 }
  0x43   : > { %p1912_p2 = scmp.ne.s32.totalorder %s2833_s8, %s1911_s11  ;;  %p1918_p10 = scmp.lt.u32.totalorder %s1911_s11, %s2833_s8 }
  0x45   : > { %p1914_p1 = pnand %p1912_p2, %p2346_p13 }
  0x47   : > { %p1915_p6 = pneg %p1914_p1 }
  0x49   : > { %p1920_p3 = pnand %p1918_p10, %p1915_p6 }
  0x4b   : > { %1923 = shalt.err (!%p1920_p3)
}
  0x4c   : > { %s1924_s15 = scalar_lea.vmem %s2336_s18, 256  ;;  %p1932_p12 = scmp.lt.s32.totalorder %s2336_s18, %s2336_s18 }
  0x4d   : > { %p1925_p5 = scmp.ne.s32.totalorder %s2336_s18, %s1924_s15  ;;  %p1933_p0 = scmp.lt.s32.totalorder %s1924_s15, %s1924_s15 }
  0x4f   : > { %p1927_p7 = pnand %p1925_p5, %p2346_p13  ;;  %p1934_p2 = por %p1933_p0, %p1932_p12 }
  0x51   : > { %p1928_p9 = pneg %p1927_p7 }
  0x53   : > { %p1935_p1 = pnand %p1934_p2, %p1928_p9 }
  0x55   : > { %1938 = shalt.err (!%p1935_p1)
}
  0x56   : > { %1768 = dma.hbm_to_vmem [thread:$0]  (!%p2332_p11), %s2833_s8, 256, %s2336_s18, [#allocation14], %s2189_s19, %s2189_s19, %s2190_s12  }
  0x57   : > { %s47_s11 = sadd.s32 1, %s2181_s25  ;;  %s56_s24 = sadd.s32 1, %s2173_s23 }
  0x58   : > { %p49_p6 = scmp.ge.s32.totalorder %s47_s11, 2  ;;  %p63_p10 = scmp.ne.s32.totalorder %s2173_s23, %s2169_s22 }
  0x59   : > { %p64_p3 = scmp.eq.s32.totalorder %s2185_s26, 0  ;;  %p1792_p5 = scmp.lt.s32.totalorder %s2185_s26, 2 }
  0x5a   : > { %s2876_s11 = smov (%p49_p6, %s47_s11), 0  ;;  %p2835_p9 = scmp.eq.s32.totalorder %s2302_s27, 1 }
  0x5b   : > { %2834 = sst [smem:[#allocation27_spill]] %s2876_s11  ;;  %p65_p7 = por %p64_p3, %p63_p10 }
  0x5c   : > { %p2400_p12 = por %p2835_p9, %p63_p10  ;;  %s51_s28 = ssub.s32 %s2181_s25, %s2876_s11 }
  0x5d   : > { %s2407_s18 = sand.u32 1, %s2173_s23   ;;  %p54_p0 = scmp.eq.s32.totalorder %s51_s28, 0 }
  0x5e   : > { %s2836_s20 = scalar_select %p2400_p12, 1, 0 }
  0x5f   : > { %s2410_s19 = sshll.u32 %s2407_s18, 2  ;;  %s2413_s12 = sshll.u32 %s2181_s25, 6 }
  0x60   : > { %2837 = sst [smem:[#allocation28_spill]] %s2836_s20  ;;  %p2415_p2 = pnand %p1792_p5, %p65_p7 }
  0x61   : > { %s2420_s17 = scalar_select %p54_p0, %s2173_s23, %s56_s24  }
  0x62   : > { %s2838_s14 = scalar_select %p2415_p2, 1, 0 }
  0x63   : > { %2839 = sst [smem:[#allocation29_spill]] %s2420_s17  ;;  %s2806_s30 = sand.u32 1, %s2185_s26  }
  0x64   : > { %s2840_s1 = sld [smem:[#allocation30_spill]]  ;;  %s444_s28 = scalar_lea.vmem [#allocation7], %s2410_s19 }
  0x65   : > { %s451_s4 = sshll.u32 %s444_s28, 4  ;;  %s2434_s8 = scalar_lea.sflag [#allocation8], %s2806_s30  ;;  %s2430_s4 = int_to_ptr.vmem [resolvable:$true] %s451_s4 }
  0x66   : > { %p2440_p6 = pneg %p2415_p2 }
  0x6a   : > { %s2427_s10 = scalar_lea.hbm %s2840_s1, %s2413_s12  ;;  %s1944_s28 = scalar_lea.hbm %s2840_s1, 128 }
  0x6b   : > { %s1939_s11 = scalar_lea.hbm %s2427_s10, 64  ;;  %p1945_p5 = scmp.lt.u32.totalorder %s2427_s10, %s2840_s1 }
  0x6c   : > { %p1940_p1 = scmp.ne.s32.totalorder %s2427_s10, %s1939_s11  ;;  %p1946_p7 = scmp.lt.u32.totalorder %s1944_s28, %s1939_s11 }
  0x6d   : > { %p1948_p0 = scmp.lt.u32.totalorder %s1939_s11, %s2427_s10 }
  0x6e   : > { %p1942_p10 = pnand %p2440_p6, %p1940_p1  ;;  %p1947_p9 = por %p1946_p7, %p1945_p5 }
  0x70   : > { %p1943_p3 = pneg %p1942_p10  ;;  %p1949_p12 = por %p1948_p0, %p1947_p9 }
  0x72   : > { %p1950_p4 = pnand %p1949_p12, %p1943_p3 }
  0x74   : > { %1953 = shalt.err (!%p1950_p4)
}
  0x75   : > { %s1954_s30 = scalar_lea.vmem %s2430_s4, 64  ;;  %s2191_s15 = smov [#allocation7]  }
  0x76   : > { %p1955_p1 = scmp.ne.s32.totalorder %s2430_s4, %s1954_s30  ;;  %s1959_s5 = sshll.u32 %s2191_s15, 4  ;;  %s1960_s5 = int_to_ptr.vmem [resolvable:$false] %s1959_s5 }
  0x77   : > { %s1961_s23 = scalar_lea.vmem %s1960_s5, 128  ;;  %p1962_p11 = scmp.lt.s32.totalorder %s2430_s4, %s1960_s5 }
  0x78   : > { %p1957_p10 = pnand %p1955_p1, %p2440_p6  ;;  %p1963_p13 = scmp.lt.s32.totalorder %s1961_s23, %s1954_s30 }
  0x7a   : > { %p1958_p8 = pneg %p1957_p10  ;;  %p1964_p5 = por %p1963_p13, %p1962_p11 }
  0x7c   : > { %p1965_p7 = pnand %p1964_p5, %p1958_p8 }
  0x7e   : > { %1968 = shalt.err (!%p1965_p7)
}
  0x7f   : > { %1778 = dma.hbm_to_vmem [thread:$0]  (!%p2415_p2), %s2427_s10, 64, %s2430_s4, %s2434_s8  }
  0x80   : > { %s2192_s11 = smov [#allocation15]   ;;  %s2468_s1 = scalar_lea.hbm %s2784_s0, %s2413_s12 }
  0x81   : > { %s404_s17 = sshll.u32 %s2192_s11, 4  ;;  %s1969_s23 = scalar_lea.hbm %s2793_s9, 16  ;;  %s405_s17 = int_to_ptr.vmem [resolvable:$true] %s404_s17 }
  0x82   : > { %p1970_p4 = scmp.ne.s32.totalorder %s2793_s9, %s1969_s23  ;;  %p2842_p8 = scmp.ne.s32.totalorder %s2832_s21, 0 }
  0x83   : > { %p1976_p12 = scmp.lt.u32.totalorder %s1969_s23, %s2793_s9 }
  0x84   : > { %p1972_p11 = pnand %p1970_p4, %p2842_p8 }
  0x86   : > { %p1973_p13 = pneg %p1972_p11 }
  0x88   : > { %p1978_p3 = pnand %p1976_p12, %p1973_p13 }
  0x8a   : > { %1981 = shalt.err (!%p1978_p3)
}
  0x8b   : > { %s1982_s11 = scalar_lea.vmem %s405_s17, 16  ;;  %s1989_s28 = scalar_lea.vmem %s405_s17, 32 }
  0x8c   : > { %p1983_p9 = scmp.ne.s32.totalorder %s405_s17, %s1982_s11  ;;  %p1990_p10 = scmp.lt.s32.totalorder %s405_s17, %s405_s17 }
  0x8d   : > { %p1991_p5 = scmp.lt.s32.totalorder %s1989_s28, %s1982_s11 }
  0x8e   : > { %p1985_p0 = pnand %p1983_p9, %p2842_p8 }
  0x8f   : > { %p1992_p7 = por %p1991_p5, %p1990_p10 }
  0x90   : > { %p1986_p1 = pneg %p1985_p0 }
  0x92   : > { %p1993_p2 = pnand %p1992_p7, %p1986_p1 }
  0x94   : > { %1996 = shalt.err (!%p1993_p2)
}
  0x95   : > { %p2843_p4 = scmp.ne.s32.totalorder %s2830_s16, 0  ;;  %s425_s21 = scalar_lea.vmem [#allocation4], %s2410_s19 }
  0x96   : > { %s433_s15 = sshll.u32 %s425_s21, 4  ;;  %s2495_s16 = scalar_lea.hbm %s2786_s2, %s2413_s12  ;;  %s2489_s15 = int_to_ptr.vmem [resolvable:$true] %s433_s15 }
  0x97   : > { %1771 = dma.hbm_to_vmem [thread:$0]  (!%p2843_p4), %s2793_s9, 16, %s405_s17, [#allocation14]  }
  0x98   : > { %s422_s23 = scalar_lea.sflag [#allocation5], %s2407_s18  ;;  %s1997_s4 = scalar_lea.hbm %s2468_s1, 64 }
  0x99   : > { %p1998_p2 = scmp.ne.s32.totalorder %s2468_s1, %s1997_s4  ;;  %s2002_s28 = scalar_lea.hbm %s2784_s0, 128 }
  0x9a   : > { %p2003_p13 = scmp.lt.u32.totalorder %s2468_s1, %s2784_s0  ;;  %p2004_p12 = scmp.lt.u32.totalorder %s2002_s28, %s1997_s4 }
  0x9b   : > { %p2000_p8 = pnand %p1998_p2, %p2440_p6  ;;  %p2006_p9 = scmp.lt.u32.totalorder %s1997_s4, %s2468_s1 }
  0x9c   : > { %p2005_p3 = por %p2004_p12, %p2003_p13 }
  0x9d   : > { %p2001_p11 = pneg %p2000_p8 }
  0x9e   : > { %p2007_p0 = por %p2006_p9, %p2005_p3 }
  0xa0   : > { %p2008_p1 = pnand %p2007_p0, %p2001_p11 }
  0xa2   : > { %2011 = shalt.err (!%p2008_p1)
}
  0xa3   : > { %s2012_s12 = scalar_lea.vmem %s2489_s15, 64  ;;  %s2193_s20 = smov [#allocation4]  }
  0xa4   : > { %p2013_p10 = scmp.ne.s32.totalorder %s2489_s15, %s2012_s12  ;;  %s2017_s21 = sshll.u32 %s2193_s20, 4  ;;  %s2018_s21 = int_to_ptr.vmem [resolvable:$false] %s2017_s21 }
  0xa5   : > { %s2019_s30 = scalar_lea.vmem %s2018_s21, 128  ;;  %p2020_p4 = scmp.lt.s32.totalorder %s2489_s15, %s2018_s21 }
  0xa6   : > { %p2015_p5 = pnand %p2013_p10, %p2440_p6  ;;  %p2021_p2 = scmp.lt.s32.totalorder %s2019_s30, %s2012_s12 }
  0xa8   : > { %p2016_p7 = pneg %p2015_p5  ;;  %p2022_p8 = por %p2021_p2, %p2020_p4 }
  0xaa   : > { %p2023_p13 = pnand %p2022_p8, %p2016_p7 }
  0xac   : > { %2026 = shalt.err (!%p2023_p13)
}
  0xad   : > { %p2844_p11 = scmp.ne.s32.totalorder %s2838_s14, 0  ;;  %s462_s5 = scalar_lea.vmem [#allocation9], %s2410_s19 }
  0xae   : > { %s469_s4 = sshll.u32 %s462_s5, 4  ;;  %s1589_s10 = sshll.u32 %s2407_s18, 1  ;;  %s470_s4 = int_to_ptr.vmem [resolvable:$true] %s469_s4 }
  0xaf   : > { %1775 = dma.hbm_to_vmem [thread:$0]  (!%p2844_p11), %s2468_s1, 64, %s2489_s15, %s422_s23  }
  0xb0   : > { %s2027_s11 = scalar_lea.hbm %s2495_s16, 64  ;;  %s2032_s7 = scalar_lea.hbm %s2786_s2, 128 }
  0xb1   : > { %p2028_p12 = scmp.ne.s32.totalorder %s2495_s16, %s2027_s11  ;;  %p2033_p0 = scmp.lt.u32.totalorder %s2495_s16, %s2786_s2 }
  0xb2   : > { %p2034_p1 = scmp.lt.u32.totalorder %s2032_s7, %s2027_s11  ;;  %p2036_p5 = scmp.lt.u32.totalorder %s2027_s11, %s2495_s16 }
  0xb3   : > { %p2030_p3 = pnand %p2028_p12, %p2440_p6 }
  0xb4   : > { %p2035_p10 = por %p2034_p1, %p2033_p0 }
  0xb5   : > { %p2031_p9 = pneg %p2030_p3 }
  0xb6   : > { %p2037_p7 = por %p2036_p5, %p2035_p10 }
  0xb8   : > { %p2038_p4 = pnand %p2037_p7, %p2031_p9 }
  0xba   : > { %2041 = shalt.err (!%p2038_p4)
}
  0xbb   : > { %s2042_s1 = scalar_lea.vmem %s470_s4, 64  ;;  %s2194_s19 = smov [#allocation9]  }
  0xbc   : > { %p2043_p2 = scmp.ne.s32.totalorder %s470_s4, %s2042_s1  ;;  %s2047_s15 = sshll.u32 %s2194_s19, 4  ;;  %s2048_s15 = int_to_ptr.vmem [resolvable:$false] %s2047_s15 }
  0xbd   : > { %s2049_s23 = scalar_lea.vmem %s2048_s15, 128  ;;  %p2050_p12 = scmp.lt.s32.totalorder %s470_s4, %s2048_s15 }
  0xbe   : > { %p2045_p8 = pnand %p2043_p2, %p2440_p6  ;;  %p2051_p3 = scmp.lt.s32.totalorder %s2049_s23, %s2042_s1 }
  0xc0   : > { %p2046_p13 = pneg %p2045_p8  ;;  %p2052_p11 = por %p2051_p3, %p2050_p12 }
  0xc2   : > { %p2053_p0 = pnand %p2052_p11, %p2046_p13 }
  0xc4   : > { %2056 = shalt.err (!%p2053_p0)
}
  0xc5   : > { %p2845_p1 = scmp.ne.s32.totalorder %s2838_s14, 0  ;;  %s1590_s21 = sshll.u32 %s2181_s25, 5 }
  0xc6   : > { %s480_s30 = scalar_lea.vmem [#allocation10], %s1589_s10  ;;  %s2545_s17 = scalar_lea.hbm %s2787_s3, %s1590_s21 }
  0xc7   : > { %1781 = dma.hbm_to_vmem [thread:$0]  (!%p2845_p1), %s2495_s16, 64, %s470_s4, %s2434_s8  }
  0xc8   : > { %s488_s5 = sshll.u32 %s480_s30, 4  ;;  %s2846_s7 = sand.u32 1, %s2185_s26   ;;  %s489_s5 = int_to_ptr.vmem [resolvable:$true] %s488_s5 }
  0xc9   : > { %s477_s12 = scalar_lea.sflag [#allocation11], %s2846_s7  ;;  %s2057_s20 = scalar_lea.hbm %s2545_s17, 32 }
  0xca   : > { %p2058_p11 = scmp.ne.s32.totalorder %s2545_s17, %s2057_s20  ;;  %s2062_s16 = scalar_lea.hbm %s2787_s3, 64 }
  0xcb   : > { %p2063_p5 = scmp.lt.u32.totalorder %s2545_s17, %s2787_s3  ;;  %p2064_p7 = scmp.lt.u32.totalorder %s2062_s16, %s2057_s20 }
  0xcc   : > { %p2060_p9 = pnand %p2058_p11, %p2440_p6  ;;  %p2066_p2 = scmp.lt.u32.totalorder %s2057_s20, %s2545_s17 }
  0xcd   : > { %p2065_p4 = por %p2064_p7, %p2063_p5 }
  0xce   : > { %p2061_p10 = pneg %p2060_p9 }
  0xcf   : > { %p2067_p8 = por %p2066_p2, %p2065_p4 }
  0xd1   : > { %p2068_p13 = pnand %p2067_p8, %p2061_p10 }
  0xd3   : > { %2071 = shalt.err (!%p2068_p13)
}
  0xd4   : > { %s2072_s1 = scalar_lea.vmem %s489_s5, 32  ;;  %s2195_s19 = smov [#allocation10]  }
  0xd5   : > { %p2073_p12 = scmp.ne.s32.totalorder %s489_s5, %s2072_s1  ;;  %s2077_s15 = sshll.u32 %s2195_s19, 4  ;;  %s2078_s15 = int_to_ptr.vmem [resolvable:$false] %s2077_s15 }
  0xd6   : > { %s2079_s23 = scalar_lea.vmem %s2078_s15, 64  ;;  %p2080_p11 = scmp.lt.s32.totalorder %s489_s5, %s2078_s15 }
  0xd7   : > { %p2075_p3 = pnand %p2073_p12, %p2440_p6  ;;  %p2081_p9 = scmp.lt.s32.totalorder %s2079_s23, %s2072_s1 }
  0xd9   : > { %p2076_p0 = pneg %p2075_p3  ;;  %p2082_p1 = por %p2081_p9, %p2080_p11 }
  0xdb   : > { %p2083_p5 = pnand %p2082_p1, %p2076_p0 }
  0xdd   : > { %2086 = shalt.err (!%p2083_p5)
}
  0xde   : > { %p2847_p7 = scmp.ne.s32.totalorder %s2838_s14, 0  ;;  %p2848_p10 = scmp.ne.s32.totalorder %s2829_s13, 0 }
  0xdf   : > { %s2569_s24 = sand.u32 (!%p2848_p10), 1, %s2169_s22   ;;  %p2849_p6 = scmp.ne.s32.totalorder (!%p2848_p10), %s2826_s29, 0 }
  0xe0   : > { %1784 = dma.hbm_to_vmem [thread:$0]  (!%p2847_p7), %s2545_s17, 32, %s489_s5, %s477_s12  }
  0xe1   : > { %497 = sbr.rel (%p2848_p10) target bundleno = 1558 (0x616), region = 68  ;;  %s2572_s21 = sshll.u32 (!%p2848_p10), %s2569_s24, 2 }
  0xe2   : > { %s500_s30 = scalar_lea.sflag (!%p2848_p10), [#allocation5], %s2569_s24  ;;  %s503_s11 = scalar_lea.vmem (!%p2848_p10), [#allocation4], %s2572_s21 }
  0xe8   : > { %2140 = dma.done.wait (%p2849_p6), %s500_s30, 64  }
  0xe9   : > { %2142 = vsyncadd (%p2849_p6), %s500_s30, 4294967232  ;;  %s508_s13 = sand.u32 1, %s2302_s27   ;;  %s512_s5 = scalar_lea.vmem [#allocation7], %s2572_s21 }
  0xea   : > { %s509_s14 = scalar_lea.sflag [#allocation8], %s508_s13 }
  0xeb   : > { %2144 = dma.done.wait (%p2849_p6), %s509_s14, 128  }
  0xec   : > { %2146 = vsyncadd (%p2849_p6), %s509_s14, 4294967168  ;;  %s1595_s28 = sshll.u32 %s2569_s24, 1  ;;  %s521_s17 = scalar_lea.vmem [#allocation9], %s2572_s21 }
  0xed   : > { %s527_s7 = scalar_lea.sflag [#allocation11], %s508_s13  ;;  %s2588_s12 = scalar_lea.vmem [#allocation10], %s1595_s28 }
  0xee   : > { %2148 = dma.done.wait (%p2849_p6), %s527_s7, 32  }
  0xef   : > { %2150 = vsyncadd (%p2849_p6), %s527_s7, 4294967264  ;;  %p2850_p1 = scmp.eq.s32.totalorder %s2302_s27, 0 }
  0xf1   : > { %2152 = dma.done.wait (%p2850_p1), [#allocation11], 256   ;;  %p2851_p4 = pmov %p2850_p1 }
  0xf2   : > { %p2852_p2 = pmov %p2850_p1 }
  0xf3   : > { %2154 = vsyncadd (%p2851_p4), [#allocation11], 4294967040 }
  0xf4   : > { %2156 = dma.done.wait (%p2852_p2), [#allocation14], 272   ;;  %p2853_p8 = pmov %p2850_p1 }
  0xf5   : > { %v2196_v0 = vmov 0.0   ;;  %vm2197_vm0 = vmmov 0   ;;  %v1859_v1 = vld [vmem:[%s2790_s6] sm:$0xff]   ;;  %v1860_v2 = vld [vmem:[%s2790_s6 + $0x8] sm:$0xff]   ;;  %vm629_vm1 = vcmask 261120   ;;  %v1864_v8 = vld [vmem:[#allocation13 + $0x8] sm:$0xff]  }
  0xf6   : > { %2158 = vsyncadd (%p2853_p8), [#allocation14], 4294967024  ;;  %1660 = vmatprep.subr.bf16.mxu0 %v2196_v0  ;;  %1664 = vmatprep.mubr.msk.bf16.mxu0 %vm2197_vm0, %v2196_v0  ;;  %v605_v3 = vld [vmem:[%s512_s5] sm:$0xf]  ;;  %v1861_v4 = vld [vmem:[#allocation12] sm:$0xff]   ;;  %s2854_s4 = sld [smem:[#allocation33_spill]] }
  0xf7   : > { %1668 = vmatprep.subr.bf16.mxu1 %v2196_v0  ;;  %1672 = vmatprep.mubr.msk.bf16.mxu1 %vm2197_vm0, %v2196_v0  ;;  %v1862_v5 = vld [vmem:[#allocation12 + $0x8] sm:$0xff]   ;;  %v1863_v7 = vld [vmem:[#allocation13] sm:$0xff]   ;;  %vm742_vm2 = vcmask 60416   ;;  %s2198_s10 = smov 104   ;;  %s2199_s1 = smov 120   ;;  %vm854_vm3 = vcmask 64512  }
  0xf8   : > { %1661 = vmatpush3.bf16.msra.mxu0 %v1859_v1  ;;  %v781_v6 = vld [vmem:[%s503_s11] sm:$0xf]  ;;  %1669 = vmatpush3.bf16.msra.mxu1 %v1863_v7  ;;  %v674_v9 = vld [vmem:[%s521_s17] sm:$0xf]  ;;  %s2855_s23 = sld [smem:[#allocation32_spill]]  ;;  %s2200_s21 = smov 112  }
  0xf9   : > { %1662 = vmatprep.subr.bf16.mxu0 %v2196_v0  ;;  %1670 = vmatprep.subr.bf16.mxu1 %v2196_v0  ;;  %v1604_v26 = vld [vmem:[#allocation15] ss:$0 sm:$0xff]  ;;  %vm918_vm4 = vcmask 1043456   ;;  %v850_v47 = vld [vmem:[%s2588_s12] sm:$0x3]  ;;  %v2201_v48 = vmov 0  }
  0xfa   : > { %vm851_vm5 = vnez %v850_v47  ;;  %s2202_s30 = smov 8   ;;  %s2858_s14 = sld [smem:[#allocation35_spill]]  ;;  %vm1314_vm7 = vcmask 130048   ;;  %vm1317_vm8 = vcmask 195584  }
  0xfb   : > { %v901_v49 = vsel %vm851_vm5, 16843009, %v2201_v48  ;;  %s2203_s17 = smov 16   ;;  %s2204_s7 = smov 24  }
  0xfc   : > { %1663 = vmatpush3.bf16.msra.mxu0 %v1860_v2  ;;  %1671 = vmatpush3.bf16.msra.mxu1 %v1864_v8  ;;  %v1600_v10 = vld [vmem:[%s2854_s4] ss:$0 sm:$0xff]  ;;  %v902_v50 = vunpack.c.0.s8 %v901_v49  ;;  %s2859_s12 = sld [smem:[#allocation25_spill]]  ;;  %s1599_s29 = sshll.u32 %s2569_s24, 3 }
  0xfd   : > { %1676 = vmatprep.subr.bf16.mxu0 %v2196_v0  ;;  %1684 = vmatprep.subr.bf16.mxu1 %v2196_v0  ;;  %s2860_s8 = sld [smem:[#allocation36_spill]]  ;;  %s597_s4 = scalar_lea.vmem [#allocation16], %s1599_s29 }
  0xfe   : > { %v1610_v17 = vld [vmem:[%s2855_s23] ss:$0 sm:$0xff]  ;;  %vm2675_vm6 = vcmp.ne.s32.totalorder %v902_v50, 0  ;;  %s2861_s18 = sld [smem:[#allocation28_spill]]  ;;  %s2862_s15 = sld [smem:[#allocation37_spill]] }
  0xff   : > { %1665 = vmatmul.mubr.msk.bf16.vlgmr.msra.gmra.mrb[0].mxu0 %vm629_vm1, %v605_v3  ;;  %1673 = vmatmul.mubr.msk.bf16.vlgmr.msra.gmra.mrb[0].mxu1 %vm629_vm1, %v674_v9  ;;  %s2205_s11 = smov [#allocation16]  }
 0x100   : > { %1677 = vmatpush3.bf16.msra.mxu0 %v1861_v4  ;;  %1680 = vmatprep.mubr.msk.bf16.mxu0 %vm2197_vm0, %v2196_v0  ;;  %s2091_s13 = sshll.u32 %s2205_s11, 4  ;;  %s2092_s13 = int_to_ptr.vmem [resolvable:$false] %s2091_s13 }
 0x101   : > { %1678 = vmatprep.subr.bf16.mxu0 %v2196_v0  ;;  %1686 = vmatprep.mubr.msk.bf16.mxu1 %vm2197_vm0, %v2196_v0  ;;  %s2093_s5 = scalar_lea.vmem %s2092_s13, 256 }
 0x102   : > { %s1627_s16 = sshll.u32 %s2859_s12, 7 }
 0x104   : > { %1679 = vmatpush3.bf16.msra.mxu0 %v1862_v5  ;;  %s2734_s23 = scalar_lea.hbm %s2862_s15, %s1627_s16  ;;  %p2863_p12 = scmp.ne.s32.totalorder %s2861_s18, 0 }
 0x105   : > { %1690 = vmatprep.subr.bf16.mxu0 %v2196_v0 }
 0x107   : > { %1681 = vmatmul.mubr.msk.bf16.vlgmr.msra.gmra.mrb[4].mxu0 %vm629_vm1, %v781_v6 }
 0x108   : > { %1692 = vmatprep.mubr.msk.bf16.mxu0 %vm2197_vm0, %v2196_v0 }
 0x1d2   : > { %v667_v11 = vpop.f32.mrb[0].mxu0  ;;  %v735_v27 = vpop.f32.mrb[0].mxu1 }
 0x1d3   : > { %v668_v12 = vadd.f32 %v1600_v10, %v667_v11  ;;  %v1666_v13 = vpop.f32.mrb[1].mxu0  ;;  %v736_v28 = vadd.f32 %v1604_v26, %v735_v27  ;;  %v1674_v29 = vpop.f32.mrb[1].mxu1 }
 0x1d4   : > { %v670_v14 = vpop.f32.mrb[2].mxu0  ;;  %v738_v30 = vpop.f32.mrb[2].mxu1 }
 0x1d5   : > { %v673_v15 = vpack.c.bf16 %v668_v12, %v668_v12  ;;  %v1667_v16 = vpop.f32.mrb[3].mxu0  ;;  %v2649_v31 = vpack.c.bf16 %v736_v28, %v736_v28  ;;  %v1675_v32 = vpop.f32.mrb[3].mxu1 }
 0x1d7   : > { %743 = vst.msk [vmem:[#allocation2] sm:$0xf] %vm742_vm2, %v673_v15  ;;  %771 = vrot.lane.b32.xlu1 %v673_v15, %s2198_s10  ;;  %748 = vrot.lane.b32.xlu0 %v673_v15, %s2199_s1  ;;  %744 = vst.msk [vmem:[#allocation3] sm:$0xf] %vm742_vm2, %v2649_v31 }
 0x1da   : > { %v843_v18 = vpop.f32.mrb[4].mxu0 }
 0x1db   : > { %761 = vrot.lane.b32.xlu0 %v673_v15, %s2200_s21  ;;  %v844_v19 = vadd.f32 %v1610_v17, %v843_v18  ;;  %v1682_v20 = vpop.f32.mrb[5].mxu0 }
 0x1dc   : > { %v846_v21 = vpop.f32.mrb[6].mxu0 }
 0x1dd   : > { %v849_v22 = vpack.c.bf16 %v844_v19, %v844_v19  ;;  %v1683_v23 = vpop.f32.mrb[7].mxu0 }
 0x1de   : > { %v852_v24 = vld [vmem:[#allocation2] sm:$0xf]  ;;  %v853_v33 = vld [vmem:[#allocation3] sm:$0xf] }
 0x1df   : > { %v859_v25 = vsel %vm854_vm3, %v852_v24, 0  ;;  %970 = vrot.lane.b32.xlu1 %v849_v22, %s2199_s1  ;;  %1082 = vrot.lane.b32.xlu0 %v849_v22, %s2200_s21  ;;  %v920_v34 = vsel %vm918_vm4, %v853_v33, 0 }
 0x1e0   : > { %1685 = vmatpush3.bf16.xpose.msra.mxu1 %v859_v25  ;;  %1691 = vmatpush3.bf16.msra.mxu0 %v920_v34 }
 0x1e1   : > { %1696 = vmatprep.subr.bf16.mxu1 %v2196_v0  ;;  %1702 = vmatprep.subr.bf16.mxu0 %v2196_v0 }
 0x1e3   : > { %1194 = vrot.lane.b32.xlu1 %v849_v22, %s2198_s10 }
 0x1e7   : > { %1687 = vmatmul.mubr.msk.bf16.vlgmr.msra.gmra.mrb[4].mxu1 %vm854_vm3, %v849_v22  ;;  %756 = vrot.lane.b32.xlu1 %v2649_v31, %s2199_s1 }
 0x1e8   : > { %1698 = vmatprep.mubr.msk.bf16.mxu1 %vm2197_vm0, %v2196_v0 }
 0x249   : > { %v772_v35 = vpop.permute.xlu1 %771  ;;  %v749_v36 = vpop.permute.xlu0 %748 }
 0x24a   : > { %775 = vst.msk [vmem:[#allocation2 + $0xc] sm:$0xf] %vm742_vm2, %v772_v35  ;;  %752 = vst.msk [vmem:[#allocation2 + $0x4] sm:$0xf] %vm742_vm2, %v749_v36 }
 0x24d   : > { %v762_v37 = vpop.permute.xlu0 %761 }
 0x24e   : > { %765 = vst.msk [vmem:[#allocation2 + $0x8] sm:$0xf] %vm742_vm2, %v762_v37 }
 0x251   : > { %v966_v38 = vld [vmem:[#allocation2 + $0x4] sm:$0xf]  ;;  %v971_v41 = vpop.permute.xlu1 %970  ;;  %v1191_v43 = vld [vmem:[#allocation2 + $0xc] sm:$0xf]  ;;  %v1083_v44 = vpop.permute.xlu0 %1082 }
 0x252   : > { %v976_v39 = vsel %vm854_vm3, %v966_v38, 0  ;;  %v1200_v45 = vsel %vm854_vm3, %v1191_v43, 0 }
 0x253   : > { %1697 = vmatpush3.bf16.xpose.msra.mxu1 %v976_v39 }
 0x254   : > { %1708 = vmatprep.subr.bf16.mxu1 %v2196_v0 }
 0x255   : > { %v1079_v40 = vld [vmem:[#allocation2 + $0x8] sm:$0xf]  ;;  %v1195_v46 = vpop.permute.xlu1 %1194 }
 0x256   : > { %v1088_v42 = vsel %vm854_vm3, %v1079_v40, 0 }
 0x259   : > { %v757_v58 = vpop.permute.xlu1 %756 }
 0x25a   : > { %1699 = vmatmul.mubr.msk.bf16.vlgmr.msra.gmra.mrb[8].mxu1 %vm854_vm3, %v971_v41  ;;  %760 = vst.msk [vmem:[#allocation3 + $0x4] sm:$0xf] %vm742_vm2, %v757_v58 }
 0x25b   : > { %1709 = vmatpush3.bf16.xpose.msra.mxu1 %v1088_v42  ;;  %1710 = vmatprep.mubr.msk.bf16.mxu1 %vm2197_vm0, %v2196_v0 }
 0x25c   : > { %1720 = vmatprep.subr.bf16.mxu1 %v2196_v0 }
 0x261   : > { %v968_v17 = vld [vmem:[#allocation3 + $0x4] sm:$0xf] }
 0x262   : > { %1711 = vmatmul.mubr.msk.bf16.vlgmr.msra.gmra.mrb[12].mxu1 %vm854_vm3, %v1083_v44  ;;  %v1033_v20 = vsel %vm918_vm4, %v968_v17, 0 }
 0x263   : > { %1721 = vmatpush3.bf16.xpose.msra.mxu1 %v1200_v45  ;;  %1722 = vmatprep.mubr.msk.bf16.mxu1 %vm2197_vm0, %v2196_v0 }
 0x264   : > { %1732 = vmatprep.subr.bf16.mxu1 %v2196_v0 }
 0x26a   : > { %1723 = vmatmul.mubr.msk.bf16.vlgmr.msra.gmra.mrb[16].mxu1 %vm854_vm3, %v1195_v46 }
 0x26b   : > { %1736 = vmatprep.mubr.msk.bf16.mxu1 %vm2197_vm0, %v2196_v0 }
 0x2ba   : > { %v895_v52 = vpop.f32.mrb[4].mxu1 }
 0x2bb   : > { %v904_v53 = vsel %vm2675_vm6, %v895_v52, -1e+09  ;;  %v1688_v54 = vpop.f32.mrb[5].mxu1 }
 0x2bc   : > { %v898_v55 = vpop.f32.mrb[6].mxu1  ;;  %v905_v56 = vsel %vm854_vm3, %v904_v53, -inf }
 0x2bd   : > { %906 = vmax.xlane.f32.xlu0 %v905_v56  ;;  %v1689_v57 = vpop.f32.mrb[7].mxu1 }
 0x32d   : > { %v1012_v59 = vpop.f32.mrb[8].mxu1 }
 0x32e   : > { %v1018_v60 = vsel %vm2675_vm6, %v1012_v59, -1e+09  ;;  %v1700_v61 = vpop.f32.mrb[9].mxu1  ;;  %v1865_v59 = vld [vmem:[%s2858_s14] sm:$0xff]  }
 0x32f   : > { %v1015_v62 = vpop.f32.mrb[10].mxu1  ;;  %v1019_v63 = vsel %vm854_vm3, %v1018_v60, -inf  ;;  %1733 = vmatpush3.bf16.msra.mxu1 %v1865_v59 }
 0x330   : > { %1020 = vmax.xlane.f32.xlu1 %v1019_v63  ;;  %v1701_v1 = vpop.f32.mrb[11].mxu1  ;;  %1734 = vmatprep.subr.bf16.mxu1 %v2196_v0 }
 0x335   : > { %v1124_v2 = vpop.f32.mrb[12].mxu1 }
 0x336   : > { %v1130_v3 = vsel %vm2675_vm6, %v1124_v2, -1e+09  ;;  %v1712_v4 = vpop.f32.mrb[13].mxu1 }
 0x337   : > { %v1127_v5 = vpop.f32.mrb[14].mxu1  ;;  %v1131_v6 = vsel %vm854_vm3, %v1130_v3, -inf }
 0x338   : > { %1132 = vmax.xlane.f32.xlu0 %v1131_v6  ;;  %v1713_v7 = vpop.f32.mrb[15].mxu1 }
 0x33d   : > { %v1236_v8 = vpop.f32.mrb[16].mxu1 }
 0x33e   : > { %v1242_v9 = vsel %vm2675_vm6, %v1236_v8, -1e+09  ;;  %v1724_v10 = vpop.f32.mrb[17].mxu1 }
 0x33f   : > { %v1239_v11 = vpop.f32.mrb[18].mxu1  ;;  %v1243_v12 = vsel %vm854_vm3, %v1242_v9, -inf }
 0x340   : > { %1244 = vmax.xlane.f32.xlu0 %v1243_v12  ;;  %v1725_v13 = vpop.f32.mrb[19].mxu1 }
 0x341   : > { %776 = vrot.lane.b32.xlu1 %v2649_v31, %s2198_s10  ;;  %s1401_s10 = sshll.u32 %s597_s4, 4  ;;  %s2736_s10 = int_to_ptr.vmem [resolvable:$true] %s1401_s10 }
 0x342   : > { %p2094_p11 = scmp.lt.s32.totalorder %s2736_s10, %s2092_s13 }
 0x34a   : > { %v907_v14 = vpop.xlane.xlu0 %906 }
 0x34b   : > { %v908_v15 = vsub.f32 %v904_v53, %v907_v14 }
 0x34d   : > { %v909_v16 = vmul.f32 1.442695, %v908_v15 }
 0x34f   : > { %1867 = vpow2.f32 %v909_v16 }
 0x356   : > { %766 = vrot.lane.b32.xlu0 %v2649_v31, %s2200_s21  ;;  %s1387_s21 = scalar_lea.sflag [#allocation6], %s2569_s24 }
 0x359   : > { %v1868_v18 = vpop.eup %1867 }
 0x35a   : > { %v914_v19 = vpack.c.bf16 %v1868_v18, %v1868_v18  ;;  %v911_v35 = vsel %vm854_vm3, %v1868_v18, 0.0 }
 0x35c   : > { %1693 = vmatmul.mubr.msk.bf16.vlgmr.msra.gmra.mrb[8].mxu0 %vm854_vm3, %v914_v19 }
 0x35d   : > { %1703 = vmatpush3.bf16.msra.mxu0 %v1033_v20  ;;  %1704 = vmatprep.mubr.msk.bf16.mxu0 %vm2197_vm0, %v2196_v0 }
 0x35e   : > { %1714 = vmatprep.subr.bf16.mxu0 %v2196_v0 }
 0x3bd   : > { %v1021_v21 = vpop.xlane.xlu1 %1020 }
 0x3be   : > { %v1022_v22 = vsub.f32 %v1018_v60, %v1021_v21  ;;  %v1866_v60 = vld [vmem:[%s2858_s14 + $0x8] sm:$0xff]  }
 0x3bf   : > { %1735 = vmatpush3.bf16.msra.mxu1 %v1866_v60 }
 0x3c0   : > { %v1023_v23 = vmul.f32 1.442695, %v1022_v22  ;;  %v1622_v22 = vld [vmem:[%s2860_s8] ss:$0 sm:$0xff] }
 0x3c1   : > { %v777_v24 = vpop.permute.xlu1 %776 }
 0x3c2   : > { %1869 = vpow2.f32 %v1023_v23  ;;  %780 = vst.msk [vmem:[#allocation3 + $0xc] sm:$0xf] %vm742_vm2, %v777_v24 }
 0x3c5   : > { %v1133_v25 = vpop.xlane.xlu0 %1132 }
 0x3c6   : > { %v1134_v26 = vsub.f32 %v1130_v3, %v1133_v25 }
 0x3c8   : > { %v1135_v27 = vmul.f32 1.442695, %v1134_v26 }
 0x3c9   : > { %v1193_v40 = vld [vmem:[#allocation3 + $0xc] sm:$0xf] }
 0x3ca   : > { %1871 = vpow2.f32 %v1135_v27  ;;  %v1257_v44 = vsel %vm918_vm4, %v1193_v40, 0 }
 0x3cc   : > { %v1870_v28 = vpop.eup %1869 }
 0x3cd   : > { %v1245_v29 = vpop.xlane.xlu0 %1244  ;;  %v1025_v30 = vsel %vm854_vm3, %v1870_v28, 0.0  ;;  %v1028_v31 = vpack.c.bf16 %v1870_v28, %v1870_v28 }
 0x3ce   : > { %v1246_v32 = vsub.f32 %v1242_v9, %v1245_v29  ;;  %1026 = vadd.xlane.f32.xlu1 %v1025_v30 }
 0x3cf   : > { %1705 = vmatmul.mubr.msk.bf16.vlgmr.msra.gmra.mrb[12].mxu0 %vm854_vm3, %v1028_v31 }
 0x3d0   : > { %v1247_v33 = vmul.f32 1.442695, %v1246_v32  ;;  %1716 = vmatprep.mubr.msk.bf16.mxu0 %vm2197_vm0, %v2196_v0 }
 0x3d1   : > { %v767_v34 = vpop.permute.xlu0 %766 }
 0x3d2   : > { %1873 = vpow2.f32 %v1247_v33  ;;  %770 = vst.msk [vmem:[#allocation3 + $0x8] sm:$0xf] %vm742_vm2, %v767_v34  ;;  %912 = vadd.xlane.f32.xlu1 %v911_v35 }
 0x3d4   : > { %v1872_v36 = vpop.eup %1871 }
 0x3d5   : > { %v1137_v37 = vsel %vm854_vm3, %v1872_v36, 0.0  ;;  %v1140_v42 = vpack.c.bf16 %v1872_v36, %v1872_v36 }
 0x3d6   : > { %1138 = vadd.xlane.f32.xlu0 %v1137_v37 }
 0x3d9   : > { %v1081_v38 = vld [vmem:[#allocation3 + $0x8] sm:$0xf] }
 0x3da   : > { %v1145_v39 = vsel %vm918_vm4, %v1081_v38, 0 }
 0x3db   : > { %1715 = vmatpush3.bf16.msra.mxu0 %v1145_v39 }
 0x3dc   : > { %v1874_v41 = vpop.eup %1873  ;;  %1726 = vmatprep.subr.bf16.mxu0 %v2196_v0 }
 0x3dd   : > { %v1249_v43 = vsel %vm854_vm3, %v1874_v41, 0.0  ;;  %v1252_v45 = vpack.c.bf16 %v1874_v41, %v1874_v41 }
 0x3de   : > { %1250 = vadd.xlane.f32.xlu0 %v1249_v43  ;;  %1717 = vmatmul.mubr.msk.bf16.vlgmr.msra.gmra.mrb[16].mxu0 %vm854_vm3, %v1140_v42 }
 0x3df   : > { %1727 = vmatpush3.bf16.msra.mxu0 %v1257_v44  ;;  %1728 = vmatprep.mubr.msk.bf16.mxu0 %vm2197_vm0, %v2196_v0 }
 0x3e6   : > { %1729 = vmatmul.mubr.msk.bf16.vlgmr.msra.gmra.mrb[20].mxu0 %vm854_vm3, %v1252_v45 }
 0x42f   : > { %v956_v46 = vpop.f32.mrb[8].mxu0 }
 0x430   : > { %v1694_v47 = vpop.f32.mrb[9].mxu0 }
 0x431   : > { %v959_v48 = vpop.f32.mrb[10].mxu0 }
 0x432   : > { %v1695_v49 = vpop.f32.mrb[11].mxu0 }
 0x45b   : > { %v1027_v50 = vpop.xlane.xlu1 %1026 }
 0x45c   : > { %1875 = vrcp.f32 %v1027_v50 }
 0x45f   : > { %v913_v0 = vpop.xlane.xlu1 %912 }
 0x463   : > { %v1139_v55 = vpop.xlane.xlu0 %1138 }
 0x464   : > { %1877 = vrcp.f32 %v1139_v55 }
 0x466   : > { %v1876_v51 = vpop.eup %1875 }
 0x46b   : > { %v1251_v61 = vpop.xlane.xlu0 %1250 }
 0x46c   : > { %1879 = vrcp.f32 %v1251_v61 }
 0x46d   : > { %1881 = vrcp.f32 %v913_v0 }
 0x46e   : > { %v1878_v62 = vpop.eup %1877 }
 0x476   : > { %v1880_v6 = vpop.eup %1879 }
 0x477   : > { %v1882_v13 = vpop.eup %1881 }
 0x478   : > { %v963_v14 = vmul.f32 %v1882_v13, %v956_v46 }
 0x47a   : > { %v964_v17 = vpack.c.bf16 %v963_v14, %v963_v14 }
 0x4a2   : > { %v1069_v52 = vpop.f32.mrb[12].mxu0 }
 0x4a3   : > { %v1076_v53 = vmul.f32 %v1876_v51, %v1069_v52  ;;  %v1706_v54 = vpop.f32.mrb[13].mxu0 }
 0x4a4   : > { %v1072_v56 = vpop.f32.mrb[14].mxu0 }
 0x4a5   : > { %v1077_v57 = vpack.c.bf16 %v1076_v53, %v1076_v53  ;;  %v1707_v58 = vpop.f32.mrb[15].mxu0 }
 0x4a7   : > { %1303 = vrot.lane.b32.xlu0 %v1077_v57, %s2202_s30  ;;  %s2087_s30 = scalar_lea.vmem %s2736_s10, 128 }
 0x4a8   : > { %p2088_p13 = scmp.ne.s32.totalorder %s2736_s10, %s2087_s30  ;;  %p2095_p9 = scmp.lt.s32.totalorder %s2093_s5, %s2087_s30 }
 0x4aa   : > { %p2089_p3 = pnand %p2088_p13, %p2863_p12  ;;  %p2096_p5 = por %p2095_p9, %p2094_p11 }
 0x4ac   : > { %p2090_p0 = pneg %p2089_p3 }
 0x4ae   : > { %p2097_p7 = pnand %p2096_p5, %p2090_p0 }
 0x4b1   : > { %v1181_v63 = vpop.f32.mrb[16].mxu0 }
 0x4b2   : > { %v1188_v1 = vmul.f32 %v1878_v62, %v1181_v63  ;;  %v1718_v2 = vpop.f32.mrb[17].mxu0 }
 0x4b3   : > { %v1184_v3 = vpop.f32.mrb[18].mxu0 }
 0x4b4   : > { %v1189_v4 = vpack.c.bf16 %v1188_v1, %v1188_v1  ;;  %v1719_v5 = vpop.f32.mrb[19].mxu0 }
 0x4b6   : > { %1306 = vrot.lane.b32.xlu1 %v1189_v4, %s2203_s17 }
 0x4b9   : > { %v1293_v7 = vpop.f32.mrb[20].mxu0 }
 0x4ba   : > { %v1300_v8 = vmul.f32 %v1880_v6, %v1293_v7  ;;  %v1730_v9 = vpop.f32.mrb[21].mxu0 }
 0x4bb   : > { %v1296_v10 = vpop.f32.mrb[22].mxu0 }
 0x4bc   : > { %v1301_v11 = vpack.c.bf16 %v1300_v8, %v1300_v8  ;;  %v1731_v12 = vpop.f32.mrb[23].mxu0 }
 0x4be   : > { %1309 = vrot.lane.b32.xlu1 %v1301_v11, %s2204_s7 }
 0x519   : > { %v1304_v15 = vpop.permute.xlu0 %1303 }
 0x51a   : > { %v1313_v18 = vsel %vm854_vm3, %v964_v17, %v1304_v15 }
 0x528   : > { %v1307_v16 = vpop.permute.xlu1 %1306 }
 0x529   : > { %v1316_v19 = vsel %vm1314_vm7, %v1313_v18, %v1307_v16 }
 0x530   : > { %v1310_v20 = vpop.permute.xlu1 %1309 }
 0x531   : > { %v1319_v21 = vsel %vm1317_vm8, %v1316_v19, %v1310_v20 }
 0x532   : > { %1737 = vmatmul.mubr.msk.bf16.vlgmr.msra.gmra.mrb[20].mxu1 %vm629_vm1, %v1319_v21 }
 0x605   : > { %v1379_v23 = vpop.f32.mrb[20].mxu1 }
 0x606   : > { %v1380_v24 = vadd.f32 %v1622_v22, %v1379_v23  ;;  %v1738_v25 = vpop.f32.mrb[21].mxu1 }
 0x607   : > { %v1382_v26 = vpop.f32.mrb[22].mxu1 }
 0x608   : > { %v1739_v27 = vpop.f32.mrb[23].mxu1  ;;  %1385 = vst.msk [vmem:[%s597_s4] sm:$0xff] %vm629_vm1, %v1380_v24 }
 0x609   : > { %2100 = shalt.err (!%p2097_p7)
}
 0x60a   : > { %s2101_s24 = scalar_lea.hbm %s2734_s23, 128  ;;  %s2105_s7 = scalar_lea.hbm %s2862_s15, 256 }
 0x60b   : > { %p2102_p10 = scmp.ne.s32.totalorder %s2734_s23, %s2101_s24  ;;  %p2106_p4 = scmp.lt.u32.totalorder %s2734_s23, %s2862_s15 }
 0x60c   : > { %p2107_p2 = scmp.lt.u32.totalorder %s2105_s7, %s2101_s24  ;;  %p2109_p13 = scmp.lt.u32.totalorder %s2101_s24, %s2734_s23 }
 0x60d   : > { %p2103_p6 = pnand %p2102_p10, %p2863_p12 }
 0x60e   : > { %p2108_p8 = por %p2107_p2, %p2106_p4 }
 0x60f   : > { %p2104_p1 = pneg %p2103_p6 }
 0x610   : > { %p2110_p3 = por %p2109_p13, %p2108_p8 }
 0x612   : > { %p2111_p0 = pnand %p2110_p3, %p2104_p1 }
 0x614   : > { %2114 = shalt.err (!%p2111_p0)
}
 0x615   : > { %1760 = dma.vmem_to_hbm [thread:$0]  (%p2863_p12), %s2736_s10, 128, %s2734_s23, %s1387_s21  }
 0x616 PF: > { %s2864_s20 = sld [smem:[#allocation23_spill]]  ;;  %s2865_s27 = sld [smem:[#allocation26_spill]] }
 0x617   : > { %p2867_p9 = scmp.ge.s32.totalorder %s2185_s26, 2 }
 0x61c   : > { %s1413_s8 = sand.u32 1, %s2864_s20   ;;  %p2866_p11 = scmp.ne.s32.totalorder %s2865_s27, 0 }
 0x61d   : > { %s1414_s16 = scalar_lea.sflag [#allocation6], %s1413_s8 }
 0x61e   : > { %p1786_p5 = pnand %p2867_p9, %p2866_p11 }
 0x620   : > { %2160 = dma.done.wait (!%p1786_p5), %s1414_s16, 128  }
 0x621   : > { %2162 = vsyncadd (!%p1786_p5), %s1414_s16, 4294967168  ;;  %s35_s26 = sadd.s32 1, %s2185_s26   ;;  %s2868_s4 = sld [smem:[#allocation24_spill]] }
 0x622   : > { %p32_p7 = scmp.ge.s32.totalorder %s35_s26, 4   ;;  %s2869_s23 = sld [smem:[#allocation29_spill]] }
 0x623   : > { %s2870_s18 = sld [smem:[#allocation27_spill]]  ;;  %s2871_s21 = smov %s2169_s22 }
 0x624   : > { %s2873_s24 = smov %s2181_s25  ;;  %34 = sbr.rel (!%p32_p7) target bundleno = 20 (0x14), region = 178 }
 0x627   : > { %s2872_s22 = smov %s2868_s4 }
 0x629   : > { %s2874_s25 = smov %s2870_s18 }
 0x62b   :  { %1419 = vsyncpa [#allocation5], 1 }
 0x62c   :  { %1421 = vsyncpa [#allocation5 + $0x1], 1 }
 0x62d   :  { %1422 = vsyncpa [#allocation8], 1 }
 0x62e   :  { %1424 = vsyncpa [#allocation8 + $0x1], 1 }
 0x62f   :  { %1425 = vsyncpa [#allocation11], 1 }
 0x630   :  { %1427 = vsyncpa [#allocation11 + $0x1], 1 }
 0x631   :  { %1428 = vsyncpa [#allocation14], 1 }
 0x632   :  { %1429 = vsyncpa [#allocation6], 1 }
 0x633   :  { %1431 = vsyncpa [#allocation6 + $0x1], 1 }

// kernel: tpu_custom_call.1
= control target key start
LH: loop header
LB: loop body
LE: loop exit
PB: predicated region body
PF: predicated region fallthrough
CT: control target
= control target key end

     0   :  { %s2735_s0 = inlined_call_operand.hbm [shape: bf16[2,8,32], index: 0, kind: input, shape index: {}]   ;;  %s2736_s1 = inlined_call_operand.hbm [shape: bf16[2,8,32], index: 1, kind: input, shape index: {}]   ;;  %s2737_s2 = inlined_call_operand.hbm [shape: bf16[2,8,32], index: 2, kind: input, shape index: {}]   ;;  %s2738_s3 = inlined_call_operand.hbm [shape: s8[2,8,8], index: 3, kind: input, shape index: {}]   ;;  %s2739_s4 = inlined_call_operand.hbm [shape: bf16[32,32], index: 4, kind: input, shape index: {}]   ;;  %s2740_s5 = inlined_call_operand.vmem [shape: f32[1,32], index: 5, kind: input, shape index: {}]   ;;  %s2741_s6 = inlined_call_operand.vmem [shape: bf16[32,32], index: 6, kind: input, shape index: {}]   ;;  %s2742_s7 = inlined_call_operand.vmem [shape: f32[1,32], index: 7, kind: input, shape index: {}]   ;;  %s2743_s8 = inlined_call_operand.hbm [shape: bf16[32,32], index: 8, kind: input, shape index: {}]   ;;  %s2744_s9 = inlined_call_operand.hbm [shape: f32[1,32], index: 9, kind: input, shape index: {}]   ;;  %s2745_s10 = inlined_call_operand.vmem [shape: bf16[32,32], index: 10, kind: input, shape index: {}]   ;;  %s2746_s11 = inlined_call_operand.vmem [shape: f32[1,32], index: 11, kind: input, shape index: {}]   ;;  %s2747_s12 = inlined_call_operand.hbm [shape: f32[2,8,32], index: 12, kind: output, shape index: {}]  }
   0x1   :  { %2771 = sst [smem:[#allocation28_spill]] %s2735_s0 }
   0x2   :  { %2772 = sst [smem:[#allocation29_spill]] %s2736_s1 }
   0x3   :  { %2773 = sst [smem:[#allocation30_spill]] %s2738_s3 }
   0x4   :  { %2774 = sst [smem:[#allocation31_spill]] %s2740_s5 }
   0x5   :  { %2775 = sst [smem:[#allocation32_spill]] %s2741_s6 }
   0x6   :  { %2776 = sst [smem:[#allocation33_spill]] %s2742_s7 }
   0x7   :  { %2777 = sst [smem:[#allocation34_spill]] %s2745_s10 }
   0x8   :  { %2778 = sst [smem:[#allocation35_spill]] %s2746_s11 }
   0x9   :  { %2779 = sst [smem:[#allocation36_spill]] %s2747_s12 }
   0xa   :  { %17 = vsyncpa [#allocation6], 0 }
   0xb   :  { %19 = vsyncpa [#allocation6 + $0x1], 0 }
   0xc   :  { %20 = vsyncpa [#allocation9], 0 }
   0xd   :  { %21 = vsyncpa [#allocation12], 0 }
   0xe   :  { %23 = vsyncpa [#allocation12 + $0x1], 0 }
   0xf   :  { %24 = vsyncpa [#allocation15], 0 }
  0x10   :  { %25 = vsyncpa [#allocation7], 0 }
  0x11   :  { %27 = vsyncpa [#allocation7 + $0x1], 0  ;;  %s2233_s21 = smov 0   ;;  %s2235_s22 = smov 0  }
  0x12   :  { %s2237_s23 = smov 0   ;;  %s2239_s24 = smov 0  }
  0x13   :  { %s2241_s25 = smov 0   ;;  %s2243_s26 = smov 0  }
  0x14 LB: > { %2780 = sst [smem:[#allocation24_spill]] %s2127_s21  ;;  %s2264_s27 = sadd.s32 4294967295, %s2147_s26   ;;  %s2147_s26 = sphi %s2243_s26, %s33_s26   ;;  %s2143_s25 = sphi %s2241_s25, %s2828_s25   ;;  %s2139_s24 = sphi %s2239_s24, %s2827_s24   ;;  %s2135_s23 = sphi %s2237_s23, %s2826_s23   ;;  %s2131_s22 = sphi %s2235_s22, %s2825_s22   ;;  %s2127_s21 = sphi %s2233_s21, %s2824_s21  }
  0x15   : > { %s1535_s28 = sadd.s32 4294967294, %s2147_s26   ;;  %p67_p0 = scmp.ne.s32.totalorder %s2131_s22, %s2127_s21 }
  0x16   : > { %p2752_p1 = scmp.eq.s32.totalorder %s2264_s27, 0  ;;  %p347_p3 = scmp.eq.s32.totalorder %s1535_s28, 1 }
  0x17   : > { %p1536_p5 = scmp.ge.s32.totalorder %s2147_s26, 1  ;;  %p354_p7 = scmp.lt.s32.totalorder %s2147_s26, 3 }
  0x18   : > { %p2273_p4 = por %p2752_p1, %p67_p0  ;;  %p2278_p6 = por %p347_p3, %p67_p0 }
  0x19   : > { %s2748_s13 = sshll.u32 %s2139_s24, 6  ;;  %p2284_p8 = pnand %p1536_p5, %p354_p7 }
  0x1a   : > { %s2781_s29 = scalar_select %p2273_p4, 1, 0 }
  0x1b   : > { %s2783_s30 = scalar_select %p2278_p6, 1, 0 }
  0x1c   : > { %2782 = sst [smem:[#allocation25_spill]] %s2781_s29  ;;  %s2787_s1 = sld [smem:[#allocation29_spill]] }
  0x1d   : > { %2784 = sst [smem:[#allocation26_spill]] %s2783_s30  ;;  %s2149_s18 = smov [#allocation8]  }
  0x1e   : > { %s2785_s14 = scalar_select %p2284_p8, 1, 0 }
  0x1f   : > { %s369_s19 = sshll.u32 %s2149_s18, 4  ;;  %p1722_p9 = pneg %p2284_p8  ;;  %s2297_s19 = int_to_ptr.vmem [resolvable:$true] %s369_s19 }
  0x20   : > { %2786 = sst [smem:[#allocation27_spill]] %s2785_s14  ;;  %s2150_s28 = smov [#allocation13]  }
  0x21   : > { %p2302_p11 = pnand %p1722_p9, %p2273_p4  ;;  %s392_s15 = sshll.u32 %s2150_s28, 4  ;;  %s2306_s15 = int_to_ptr.vmem [resolvable:$true] %s392_s15 }
  0x22   : > { %s2293_s17 = scalar_lea.hbm %s2787_s1, %s2748_s13  ;;  %p2310_p12 = pnand %p1722_p9, %p2752_p1 }
  0x23   : > { %s2788_s20 = scalar_select %p2302_p11, 1, 0 }
  0x24   : > { %s2789_s16 = scalar_select %p2310_p12, 1, 0 }
  0x25   : > { %s1845_s18 = scalar_lea.hbm %s2293_s17, 64  ;;  %p2764_p0 = pneg %p2302_p11 }
  0x26   : > { %p1846_p13 = scmp.ne.s32.totalorder %s2293_s17, %s1845_s18  ;;  %s1850_s21 = scalar_lea.hbm %s2787_s1, 128 }
  0x27   : > { %p1851_p7 = scmp.lt.u32.totalorder %s2293_s17, %s2787_s1  ;;  %p1852_p9 = scmp.lt.u32.totalorder %s1850_s21, %s1845_s18 }
  0x28   : > { %p1848_p3 = pnand %p2764_p0, %p1846_p13  ;;  %p1854_p1 = scmp.lt.u32.totalorder %s1845_s18, %s2293_s17 }
  0x29   : > { %p1853_p10 = por %p1852_p9, %p1851_p7 }
  0x2a   : > { %p1849_p5 = pneg %p1848_p3 }
  0x2b   : > { %p1855_p2 = por %p1854_p1, %p1853_p10 }
  0x2d   : > { %p1856_p6 = pnand %p1855_p2, %p1849_p5 }
  0x2f   : > { %1859 = shalt.err (!%p1856_p6)
}
  0x30   : > { %s1860_s11 = scalar_lea.vmem %s2297_s19, 64  ;;  %p1868_p8 = scmp.lt.s32.totalorder %s2297_s19, %s2297_s19 }
  0x31   : > { %p1861_p13 = scmp.ne.s32.totalorder %s2297_s19, %s1860_s11  ;;  %p1869_p12 = scmp.lt.s32.totalorder %s1860_s11, %s1860_s11 }
  0x33   : > { %p1863_p3 = pnand %p1861_p13, %p2764_p0  ;;  %p1870_p7 = por %p1869_p12, %p1868_p8 }
  0x35   : > { %p1864_p4 = pneg %p1863_p3 }
  0x37   : > { %p1871_p9 = pnand %p1870_p7, %p1864_p4 }
  0x39   : > { %1874 = shalt.err (!%p1871_p9)
}
  0x3a   : > { %1725 = dma.hbm_to_vmem [thread:$0]  (!%p2302_p11), %s2293_s17, 64, %s2297_s19, [#allocation9]  }
  0x3b   : > { %s1875_s30 = scalar_lea.hbm %s2739_s4, 256  ;;  %p2790_p2 = scmp.ne.s32.totalorder %s2789_s16, 0 }
  0x3c   : > { %p1876_p1 = scmp.ne.s32.totalorder %s2739_s4, %s1875_s30  ;;  %p1882_p10 = scmp.lt.u32.totalorder %s1875_s30, %s2739_s4 }
  0x3d   : > { %p2348_p6 = pneg %p2790_p2 }
  0x3f   : > { %s2791_s11 = scalar_select %p2348_p6, 1, 0 }
  0x40   : > { %p1878_p4 = pnand %p2348_p6, %p1876_p1 }
  0x42   : > { %p1879_p8 = pneg %p1878_p4 }
  0x44   : > { %p1884_p12 = pnand %p1882_p10, %p1879_p8 }
  0x46   : > { %1887 = shalt.err (!%p1884_p12)
}
  0x47   : > { %s1888_s17 = scalar_lea.vmem %s2306_s15, 256  ;;  %p1896_p7 = scmp.lt.s32.totalorder %s2306_s15, %s2306_s15 }
  0x48   : > { %p1889_p5 = scmp.ne.s32.totalorder %s2306_s15, %s1888_s17  ;;  %p1897_p9 = scmp.lt.s32.totalorder %s1888_s17, %s1888_s17 }
  0x4a   : > { %p1891_p13 = pnand %p1889_p5, %p2348_p6  ;;  %p1898_p1 = por %p1897_p9, %p1896_p7 }
  0x4c   : > { %p1892_p3 = pneg %p1891_p13 }
  0x4e   : > { %p1899_p4 = pnand %p1898_p1, %p1892_p3 }
  0x50   : > { %1902 = shalt.err (!%p1899_p4)
}
  0x51   : > { %s2151_s19 = smov 64   ;;  %s2152_s1 = smov 4  }
  0x52   : > { %1731 = dma.hbm_to_vmem [thread:$0]  (!%p2790_p2), %s2739_s4, 256, %s2306_s15, [#allocation12], %s2151_s19, %s2151_s19, %s2152_s1  }
  0x53   : > { %s2792_s30 = sshll.u32 %s2139_s24, 6  ;;  %s2153_s17 = smov [#allocation14]  }
  0x54   : > { %s2374_s28 = scalar_lea.hbm %s2737_s2, %s2792_s30  ;;  %s414_s10 = sshll.u32 %s2153_s17, 4  ;;  %s415_s10 = int_to_ptr.vmem [resolvable:$true] %s414_s10 }
  0x55   : > { %s2154_s5 = smov [#allocation10]   ;;  %s1903_s14 = scalar_lea.hbm %s2743_s8, 256 }
  0x56   : > { %s382_s7 = sshll.u32 %s2154_s5, 4  ;;  %p1904_p8 = scmp.ne.s32.totalorder %s2743_s8, %s1903_s14  ;;  %s383_s7 = int_to_ptr.vmem [resolvable:$true] %s382_s7 }
  0x57   : > { %p1910_p5 = scmp.lt.u32.totalorder %s1903_s14, %s2743_s8 }
  0x58   : > { %p1906_p10 = pnand %p1904_p8, %p2348_p6 }
  0x5a   : > { %p1907_p12 = pneg %p1906_p10 }
  0x5c   : > { %p1912_p13 = pnand %p1910_p5, %p1907_p12 }
  0x5e   : > { %1915 = shalt.err (!%p1912_p13)
}
  0x5f   : > { %s1916_s21 = scalar_lea.vmem %s415_s10, 256  ;;  %p1924_p1 = scmp.lt.s32.totalorder %s415_s10, %s415_s10 }
  0x60   : > { %p1917_p3 = scmp.ne.s32.totalorder %s415_s10, %s1916_s21  ;;  %p1925_p4 = scmp.lt.s32.totalorder %s1916_s21, %s1916_s21 }
  0x62   : > { %p1919_p7 = pnand %p1917_p3, %p2348_p6  ;;  %p1926_p0 = por %p1925_p4, %p1924_p1 }
  0x64   : > { %p1920_p9 = pneg %p1919_p7 }
  0x66   : > { %p1927_p11 = pnand %p1926_p0, %p1920_p9 }
  0x68   : > { %1930 = shalt.err (!%p1927_p11)
}
  0x69   : > { %1734 = dma.hbm_to_vmem [thread:$0]  (!%p2790_p2), %s2743_s8, 256, %s415_s10, [#allocation15], %s2151_s19, %s2151_s19, %s2152_s1  }
  0x6a   : > { %s1931_s5 = scalar_lea.hbm %s2374_s28, 64  ;;  %p2793_p10 = scmp.ne.s32.totalorder %s2788_s20, 0 }
  0x6b   : > { %p1932_p8 = scmp.ne.s32.totalorder %s2374_s28, %s1931_s5  ;;  %s1936_s14 = scalar_lea.hbm %s2737_s2, 128 }
  0x6c   : > { %p2794_p12 = pneg %p2793_p10  ;;  %p1937_p11 = scmp.lt.u32.totalorder %s2374_s28, %s2737_s2 }
  0x6d   : > { %p1938_p0 = scmp.lt.u32.totalorder %s1936_s14, %s1931_s5  ;;  %p1940_p7 = scmp.lt.u32.totalorder %s1931_s5, %s2374_s28 }
  0x6e   : > { %p1934_p5 = pnand %p1932_p8, %p2794_p12 }
  0x6f   : > { %p1939_p3 = por %p1938_p0, %p1937_p11 }
  0x70   : > { %p1935_p13 = pneg %p1934_p5 }
  0x71   : > { %p1941_p9 = por %p1940_p7, %p1939_p3 }
  0x73   : > { %p1942_p1 = pnand %p1941_p9, %p1935_p13 }
  0x75   : > { %1945 = shalt.err (!%p1942_p1)
}
  0x76   : > { %s1946_s10 = scalar_lea.vmem %s383_s7, 64  ;;  %p2795_p8 = pmov %p2794_p12 }
  0x77   : > { %p1947_p4 = scmp.ne.s32.totalorder %s383_s7, %s1946_s10  ;;  %p1954_p2 = scmp.lt.s32.totalorder %s383_s7, %s383_s7 }
  0x78   : > { %p1955_p6 = scmp.lt.s32.totalorder %s1946_s10, %s1946_s10 }
  0x79   : > { %p1949_p12 = pnand %p1947_p4, %p2795_p8 }
  0x7a   : > { %p1956_p0 = por %p1955_p6, %p1954_p2 }
  0x7b   : > { %p1950_p5 = pneg %p1949_p12 }
  0x7d   : > { %p1957_p11 = pnand %p1956_p0, %p1950_p5 }
  0x7f   : > { %1960 = shalt.err (!%p1957_p11)
}
  0x80   : > { %1728 = dma.hbm_to_vmem [thread:$0]  (!%p2793_p10), %s2374_s28, 64, %s383_s7, [#allocation9]  }
  0x81   : > { %s2155_s19 = smov [#allocation16]   ;;  %s1961_s15 = scalar_lea.hbm %s2744_s9, 16 }
  0x82   : > { %s428_s1 = sshll.u32 %s2155_s19, 4  ;;  %p1962_p13 = scmp.ne.s32.totalorder %s2744_s9, %s1961_s15  ;;  %s429_s1 = int_to_ptr.vmem [resolvable:$true] %s428_s1 }
  0x83   : > { %p2796_p3 = scmp.ne.s32.totalorder %s2791_s11, 0  ;;  %p1968_p7 = scmp.lt.u32.totalorder %s1961_s15, %s2744_s9 }
  0x85   : > { %p1964_p2 = pnand %p1962_p13, %p2796_p3 }
  0x87   : > { %p1965_p6 = pneg %p1964_p2 }
  0x89   : > { %p1970_p9 = pnand %p1968_p7, %p1965_p6 }
  0x8b   : > { %1973 = shalt.err (!%p1970_p9)
}
  0x8c   : > { %s1974_s7 = scalar_lea.vmem %s429_s1, 16  ;;  %s1981_s20 = scalar_lea.vmem %s429_s1, 32 }
  0x8d   : > { %p1975_p10 = scmp.ne.s32.totalorder %s429_s1, %s1974_s7  ;;  %p1982_p8 = scmp.lt.s32.totalorder %s429_s1, %s429_s1 }
  0x8e   : > { %p1983_p12 = scmp.lt.s32.totalorder %s1981_s20, %s1974_s7 }
  0x8f   : > { %p1977_p1 = pnand %p1975_p10, %p2796_p3 }
  0x90   : > { %p1984_p5 = por %p1983_p12, %p1982_p8 }
  0x91   : > { %p1978_p4 = pneg %p1977_p1 }
  0x93   : > { %p1985_p0 = pnand %p1984_p5, %p1978_p4 }
  0x95   : > { %1988 = shalt.err (!%p1985_p0)
}
  0x96   : > { %p2797_p11 = scmp.ne.s32.totalorder %s2789_s16, 0  ;;  %s45_s11 = sadd.s32 1, %s2143_s25 }
  0x97   : > { %s54_s6 = sadd.s32 1, %s2135_s23  ;;  %p47_p13 = scmp.ge.s32.totalorder %s45_s11, 2 }
  0x98   : > { %1737 = dma.hbm_to_vmem [thread:$0]  (!%p2797_p11), %s2744_s9, 16, %s429_s1, [#allocation15]  }
  0x99   : > { %p61_p3 = scmp.ne.s32.totalorder %s2135_s23, %s2131_s22  ;;  %p62_p2 = scmp.eq.s32.totalorder %s2147_s26, 0 }
  0x9a   : > { %p1752_p6 = scmp.lt.s32.totalorder %s2147_s26, 2  ;;  %s2830_s11 = smov (%p47_p13, %s45_s11), 0 }
  0x9b   : > { %p63_p7 = por %p62_p2, %p61_p3  ;;  %p2798_p9 = scmp.eq.s32.totalorder %s2264_s27, 1 }
  0x9c   : > { %s49_s29 = ssub.s32 %s2143_s25, %s2830_s11  ;;  %s2448_s14 = sand.u32 1, %s2135_s23  }
  0x9d   : > { %p2441_p10 = por %p2798_p9, %p61_p3  ;;  %p52_p1 = scmp.eq.s32.totalorder %s49_s29, 0 }
  0x9e   : > { %s1543_s30 = sshll.u32 %s2448_s14, 2  ;;  %s1544_s13 = sshll.u32 %s2143_s25, 6 }
  0x9f   : > { %s2799_s16 = scalar_select %p2441_p10, 1, 0 }
  0xa0   : > { %s2453_s10 = scalar_select %p52_p1, %s2135_s23, %s54_s6  }
  0xa1   : > { %s2800_s18 = sld [smem:[#allocation28_spill]]  ;;  %s449_s15 = scalar_lea.vmem [#allocation5], %s1543_s30 }
  0xa2   : > { %s457_s12 = sshll.u32 %s449_s15, 4  ;;  %p2462_p4 = pnand %p1752_p6, %p63_p7  ;;  %s2466_s12 = int_to_ptr.vmem [resolvable:$true] %s457_s12 }
  0xa3   : > { %s464_s0 = sand.u32 1, %s2147_s26   ;;  %s446_s3 = scalar_lea.sflag [#allocation6], %s2448_s14 }
  0xa4   : > { %p1991_p12 = pneg %p2462_p4 }
  0xa7   : > { %s2458_s17 = scalar_lea.hbm %s2800_s18, %s1544_s13  ;;  %s1994_s5 = scalar_lea.hbm %s2800_s18, 128 }
  0xa8   : > { %s1989_s7 = scalar_lea.hbm %s2458_s17, 64  ;;  %p1995_p11 = scmp.lt.u32.totalorder %s2458_s17, %s2800_s18 }
  0xa9   : > { %p1990_p8 = scmp.ne.s32.totalorder %s2458_s17, %s1989_s7  ;;  %p1996_p13 = scmp.lt.u32.totalorder %s1994_s5, %s1989_s7 }
  0xaa   : > { %p1998_p2 = scmp.lt.u32.totalorder %s1989_s7, %s2458_s17 }
  0xab   : > { %p1992_p5 = pnand %p1991_p12, %p1990_p8  ;;  %p1997_p3 = por %p1996_p13, %p1995_p11 }
  0xad   : > { %p1993_p0 = pneg %p1992_p5  ;;  %p1999_p6 = por %p1998_p2, %p1997_p3 }
  0xaf   : > { %p2000_p7 = pnand %p1999_p6, %p1993_p0 }
  0xb1   : > { %2003 = shalt.err (!%p2000_p7)
}
  0xb2   : > { %s2004_s30 = scalar_lea.vmem %s2466_s12, 64  ;;  %s2156_s13 = smov [#allocation5]  }
  0xb3   : > { %p2005_p9 = scmp.ne.s32.totalorder %s2466_s12, %s2004_s30  ;;  %s2009_s19 = sshll.u32 %s2156_s13, 4  ;;  %s2010_s19 = int_to_ptr.vmem [resolvable:$false] %s2009_s19 }
  0xb4   : > { %s2011_s1 = scalar_lea.vmem %s2010_s19, 128  ;;  %p2012_p5 = scmp.lt.s32.totalorder %s2466_s12, %s2010_s19 }
  0xb5   : > { %p2007_p1 = pnand %p2005_p9, %p1991_p12  ;;  %p2013_p11 = scmp.lt.s32.totalorder %s2011_s1, %s2004_s30 }
  0xb7   : > { %p2008_p8 = pneg %p2007_p1  ;;  %p2014_p13 = por %p2013_p11, %p2012_p5 }
  0xb9   : > { %p2015_p3 = pnand %p2014_p13, %p2008_p8 }
  0xbb   : > { %2018 = shalt.err (!%p2015_p3)
}
  0xbc   : > { %1741 = dma.hbm_to_vmem [thread:$0]  (!%p2462_p4), %s2458_s17, 64, %s2466_s12, %s446_s3  }
  0xbd   : > { %s1545_s15 = sshll.u32 %s2448_s14, 1  ;;  %s1546_s7 = sshll.u32 %s2143_s25, 5 }
  0xbe   : > { %s2802_s5 = sld [smem:[#allocation30_spill]]  ;;  %s468_s29 = scalar_lea.vmem [#allocation11], %s1545_s15 }
  0xbf   : > { %s476_s30 = sshll.u32 %s468_s29, 4  ;;  %s465_s13 = scalar_lea.sflag [#allocation12], %s464_s0  ;;  %s477_s30 = int_to_ptr.vmem [resolvable:$true] %s476_s30 }
  0xc4   : > { %s2500_s6 = scalar_lea.hbm %s2802_s5, %s1546_s7  ;;  %s2024_s12 = scalar_lea.hbm %s2802_s5, 64 }
  0xc5   : > { %s2019_s19 = scalar_lea.hbm %s2500_s6, 32  ;;  %p2025_p7 = scmp.lt.u32.totalorder %s2500_s6, %s2802_s5 }
  0xc6   : > { %p2020_p0 = scmp.ne.s32.totalorder %s2500_s6, %s2019_s19  ;;  %p2026_p9 = scmp.lt.u32.totalorder %s2024_s12, %s2019_s19 }
  0xc7   : > { %p2028_p8 = scmp.lt.u32.totalorder %s2019_s19, %s2500_s6 }
  0xc8   : > { %p2022_p2 = pnand %p2020_p0, %p1991_p12  ;;  %p2027_p1 = por %p2026_p9, %p2025_p7 }
  0xca   : > { %p2023_p6 = pneg %p2022_p2  ;;  %p2029_p5 = por %p2028_p8, %p2027_p1 }
  0xcc   : > { %p2030_p11 = pnand %p2029_p5, %p2023_p6 }
  0xce   : > { %2033 = shalt.err (!%p2030_p11)
}
  0xcf   : > { %s2034_s0 = scalar_lea.vmem %s477_s30, 32  ;;  %s2157_s15 = smov [#allocation11]  }
  0xd0   : > { %p2035_p13 = scmp.ne.s32.totalorder %s477_s30, %s2034_s0  ;;  %s2039_s7 = sshll.u32 %s2157_s15, 4  ;;  %s2040_s7 = int_to_ptr.vmem [resolvable:$false] %s2039_s7 }
  0xd1   : > { %s2041_s20 = scalar_lea.vmem %s2040_s7, 64  ;;  %p2042_p2 = scmp.lt.s32.totalorder %s477_s30, %s2040_s7 }
  0xd2   : > { %p2037_p3 = pnand %p2035_p13, %p1991_p12  ;;  %p2043_p10 = scmp.lt.s32.totalorder %s2041_s20, %s2034_s0 }
  0xd4   : > { %p2038_p0 = pneg %p2037_p3  ;;  %p2044_p7 = por %p2043_p10, %p2042_p2 }
  0xd6   : > { %p2045_p9 = pnand %p2044_p7, %p2038_p0 }
  0xd8   : > { %2048 = shalt.err (!%p2045_p9)
}
  0xd9   : > { %1744 = dma.hbm_to_vmem [thread:$0]  (!%p2462_p4), %s2500_s6, 32, %s477_s30, %s465_s13  }
  0xda   : > { %s2803_s28 = sld [smem:[#allocation27_spill]] }
  0xe0   : > { %p2804_p6 = scmp.ne.s32.totalorder %s2803_s28, 0 }
  0xe1   : > { %s2805_s29 = sld [smem:[#allocation25_spill]] (!%p2804_p6)  ;;  %s2526_s19 = sand.u32 (!%p2804_p6), 1, %s2131_s22  }
  0xe2   : > { %485 = sbr.rel (%p2804_p6) target bundleno = 1569 (0x621), region = 68  ;;  %s1548_s14 = sshll.u32 (!%p2804_p6), %s2526_s19, 2 }
  0xe3   : > { %s488_s17 = scalar_lea.sflag (!%p2804_p6), [#allocation6], %s2526_s19  ;;  %s2530_s12 = scalar_lea.vmem (!%p2804_p6), [#allocation5], %s1548_s14 }
  0xe7   : > { %p2806_p10 = scmp.ne.s32.totalorder (!%p2804_p6), %s2805_s29, 0 }
  0xe9   : > { %2102 = dma.done.wait (%p2806_p10), %s488_s17, 64  }
  0xea   : > { %2104 = vsyncadd (%p2806_p10), %s488_s17, 4294967232 }
  0xeb   : > { %2106 = dma.done.wait (%p2806_p10), [#allocation9], 128  }
  0xec   : > { %2108 = vsyncadd (%p2806_p10), [#allocation9], 4294967168  ;;  %s504_s21 = sand.u32 1, %s2264_s27   ;;  %s1549_s6 = sshll.u32 %s2526_s19, 1 }
  0xed   : > { %s505_s30 = scalar_lea.sflag [#allocation12], %s504_s21  ;;  %s2542_s13 = scalar_lea.vmem [#allocation11], %s1549_s6 }
  0xee   : > { %2110 = dma.done.wait (%p2806_p10), %s505_s30, 32  }
  0xef   : > { %2112 = vsyncadd (%p2806_p10), %s505_s30, 4294967264  ;;  %p2807_p4 = scmp.eq.s32.totalorder %s2264_s27, 0 }
  0xf1   : > { %2114 = dma.done.wait (%p2807_p4), [#allocation12], 256   ;;  %p2808_p12 = pmov %p2807_p4 }
  0xf2   : > { %p2809_p1 = pmov %p2807_p4 }
  0xf3   : > { %2116 = vsyncadd (%p2808_p12), [#allocation12], 4294967040 }
  0xf4   : > { %2118 = dma.done.wait (%p2809_p1), [#allocation15], 272   ;;  %p2810_p8 = pmov %p2809_p1 }
  0xf5   : > { %v2158_v0 = vmov 0.0   ;;  %vm2159_vm0 = vmmov 0   ;;  %s2811_s0 = sld [smem:[#allocation32_spill]]  ;;  %v573_v3 = vld [vmem:[#allocation8] sm:$0xf]  ;;  %vm597_vm1 = vcmask 261120  }
  0xf6   : > { %2120 = vsyncadd (%p2810_p8), [#allocation15], 4294967024  ;;  %1620 = vmatprep.subr.bf16.mxu0 %v2158_v0  ;;  %1624 = vmatprep.mubr.msk.bf16.mxu0 %vm2159_vm0, %v2158_v0  ;;  %v1823_v4 = vld [vmem:[#allocation13] sm:$0xff]   ;;  %v1824_v5 = vld [vmem:[#allocation13 + $0x8] sm:$0xff]   ;;  %s2812_s28 = sld [smem:[#allocation33_spill]]  ;;  %vm710_vm2 = vcmask 60416  }
  0xf7   : > { %1628 = vmatprep.subr.bf16.mxu1 %v2158_v0  ;;  %1632 = vmatprep.mubr.msk.bf16.mxu1 %vm2159_vm0, %v2158_v0  ;;  %v749_v6 = vld [vmem:[%s2530_s12] sm:$0xf]  ;;  %v1826_v8 = vld [vmem:[#allocation14 + $0x8] sm:$0xff]   ;;  %s2160_s29 = smov 104   ;;  %s2161_s14 = smov 120   ;;  %vm822_vm3 = vcmask 64512  }
  0xf8   : > { %v1825_v7 = vld [vmem:[#allocation14] sm:$0xff]   ;;  %v642_v9 = vld [vmem:[#allocation10] sm:$0xf]  ;;  %s2813_s21 = sld [smem:[#allocation31_spill]]  ;;  %s2162_s6 = smov 112   ;;  %vm886_vm4 = vcmask 1043456  }
  0xf9   : > { %1629 = vmatpush3.bf16.msra.mxu1 %v1825_v7  ;;  %v1558_v26 = vld [vmem:[#allocation16] ss:$0 sm:$0xff]  ;;  %v818_v47 = vld [vmem:[%s2542_s13] sm:$0x3]  ;;  %v2163_v48 = vmov 0   ;;  %s2164_s30 = smov 8  }
  0xfa   : > { %1630 = vmatprep.subr.bf16.mxu1 %v2158_v0  ;;  %vm819_vm5 = vnez %v818_v47  ;;  %s2816_s1 = sld [smem:[#allocation34_spill]]  ;;  %s2165_s7 = smov 16   ;;  %vm1054_vm7 = vcmask 126016   ;;  %vm1174_vm8 = vcmask 191616   ;;  %vm1294_vm9 = vcmask 257216  }
  0xfb   : > { %v1821_v1 = vld [vmem:[%s2811_s0] sm:$0xff]   ;;  %v1822_v2 = vld [vmem:[%s2811_s0 + $0x8] sm:$0xff]   ;;  %v869_v49 = vsel %vm819_vm5, 16843009, %v2163_v48  ;;  %s2166_s20 = smov 24   ;;  %s2817_s17 = sld [smem:[#allocation35_spill]] }
  0xfc   : > { %1621 = vmatpush3.bf16.msra.mxu0 %v1821_v1  ;;  %v1554_v10 = vld [vmem:[%s2812_s28] ss:$0 sm:$0xff]  ;;  %v870_v50 = vunpack.c.0.s8 %v869_v49  ;;  %s1553_s28 = sshll.u32 %s2526_s19, 3  ;;  %s1584_s12 = sshll.u32 %s2139_s24, 7 }
  0xfd   : > { %1622 = vmatprep.subr.bf16.mxu0 %v2158_v0  ;;  %1631 = vmatpush3.bf16.msra.mxu1 %v1826_v8  ;;  %s2818_s3 = sld [smem:[#allocation36_spill]]  ;;  %s1365_s24 = scalar_lea.sflag [#allocation7], %s2526_s19 }
  0xfe   : > { %1644 = vmatprep.subr.bf16.mxu1 %v2158_v0  ;;  %v1564_v17 = vld [vmem:[%s2813_s21] ss:$0 sm:$0xff]  ;;  %vm2626_vm6 = vcmp.ne.s32.totalorder %v870_v50, 0  ;;  %s565_s21 = scalar_lea.vmem [#allocation17], %s1553_s28  ;;  %p2819_p11 = scmp.ne.s32.totalorder %s2799_s16, 0 }
 0x100   : > { %1623 = vmatpush3.bf16.msra.mxu0 %v1822_v2  ;;  %1633 = vmatmul.mubr.msk.bf16.vlgmr.msra.gmra.mrb[0].mxu1 %vm597_vm1, %v642_v9 }
 0x101   : > { %1636 = vmatprep.subr.bf16.mxu0 %v2158_v0  ;;  %1646 = vmatprep.mubr.msk.bf16.mxu1 %vm2159_vm0, %v2158_v0 }
 0x103   : > { %1625 = vmatmul.mubr.msk.bf16.vlgmr.msra.gmra.mrb[0].mxu0 %vm597_vm1, %v573_v3  ;;  %s2685_s27 = scalar_lea.hbm %s2818_s3, %s1584_s12 }
 0x104   : > { %1637 = vmatpush3.bf16.msra.mxu0 %v1823_v4  ;;  %1640 = vmatprep.mubr.msk.bf16.mxu0 %vm2159_vm0, %v2158_v0 }
 0x105   : > { %1638 = vmatprep.subr.bf16.mxu0 %v2158_v0 }
 0x108   : > { %1639 = vmatpush3.bf16.msra.mxu0 %v1824_v5 }
 0x109   : > { %1650 = vmatprep.subr.bf16.mxu0 %v2158_v0 }
 0x10b   : > { %1641 = vmatmul.mubr.msk.bf16.vlgmr.msra.gmra.mrb[4].mxu0 %vm597_vm1, %v749_v6 }
 0x10c   : > { %1652 = vmatprep.mubr.msk.bf16.mxu0 %vm2159_vm0, %v2158_v0 }
 0x1d3   : > { %v703_v27 = vpop.f32.mrb[0].mxu1 }
 0x1d4   : > { %v704_v28 = vadd.f32 %v1558_v26, %v703_v27  ;;  %v1634_v29 = vpop.f32.mrb[1].mxu1 }
 0x1d5   : > { %v706_v30 = vpop.f32.mrb[2].mxu1 }
 0x1d6   : > { %v635_v11 = vpop.f32.mrb[0].mxu0  ;;  %v2600_v31 = vpack.c.bf16 %v704_v28, %v704_v28  ;;  %v1635_v32 = vpop.f32.mrb[3].mxu1 }
 0x1d7   : > { %v636_v12 = vadd.f32 %v1554_v10, %v635_v11  ;;  %v1626_v13 = vpop.f32.mrb[1].mxu0 }
 0x1d8   : > { %v638_v14 = vpop.f32.mrb[2].mxu0  ;;  %712 = vst.msk [vmem:[#allocation3] sm:$0xf] %vm710_vm2, %v2600_v31 }
 0x1d9   : > { %v641_v15 = vpack.c.bf16 %v636_v12, %v636_v12  ;;  %v1627_v16 = vpop.f32.mrb[3].mxu0 }
 0x1db   : > { %711 = vst.msk [vmem:[#allocation2] sm:$0xf] %vm710_vm2, %v641_v15  ;;  %739 = vrot.lane.b32.xlu1 %v641_v15, %s2160_s29  ;;  %716 = vrot.lane.b32.xlu0 %v641_v15, %s2161_s14 }
 0x1de   : > { %v811_v18 = vpop.f32.mrb[4].mxu0 }
 0x1df   : > { %729 = vrot.lane.b32.xlu0 %v641_v15, %s2162_s6  ;;  %v812_v19 = vadd.f32 %v1564_v17, %v811_v18  ;;  %v1642_v20 = vpop.f32.mrb[5].mxu0  ;;  %v821_v33 = vld [vmem:[#allocation3] sm:$0xf] }
 0x1e0   : > { %v814_v21 = vpop.f32.mrb[6].mxu0  ;;  %v888_v34 = vsel %vm886_vm4, %v821_v33, 0 }
 0x1e1   : > { %v817_v22 = vpack.c.bf16 %v812_v19, %v812_v19  ;;  %v1643_v23 = vpop.f32.mrb[7].mxu0  ;;  %1651 = vmatpush3.bf16.msra.mxu0 %v888_v34 }
 0x1e2   : > { %v820_v24 = vld [vmem:[#allocation2] sm:$0xf]  ;;  %1662 = vmatprep.subr.bf16.mxu0 %v2158_v0 }
 0x1e3   : > { %v827_v25 = vsel %vm822_vm3, %v820_v24, 0  ;;  %940 = vrot.lane.b32.xlu1 %v817_v22, %s2161_s14  ;;  %1060 = vrot.lane.b32.xlu0 %v817_v22, %s2162_s6 }
 0x1e4   : > { %1645 = vmatpush3.bf16.xpose.msra.mxu1 %v827_v25 }
 0x1e5   : > { %1656 = vmatprep.subr.bf16.mxu1 %v2158_v0 }
 0x1e7   : > { %1180 = vrot.lane.b32.xlu1 %v817_v22, %s2160_s29 }
 0x1eb   : > { %1647 = vmatmul.mubr.msk.bf16.vlgmr.msra.gmra.mrb[4].mxu1 %vm822_vm3, %v817_v22  ;;  %724 = vrot.lane.b32.xlu1 %v2600_v31, %s2161_s14 }
 0x1ec   : > { %1658 = vmatprep.mubr.msk.bf16.mxu1 %vm2159_vm0, %v2158_v0 }
 0x24d   : > { %v740_v35 = vpop.permute.xlu1 %739  ;;  %v717_v36 = vpop.permute.xlu0 %716 }
 0x24e   : > { %743 = vst.msk [vmem:[#allocation2 + $0xc] sm:$0xf] %vm710_vm2, %v740_v35  ;;  %720 = vst.msk [vmem:[#allocation2 + $0x4] sm:$0xf] %vm710_vm2, %v717_v36 }
 0x251   : > { %v730_v37 = vpop.permute.xlu0 %729 }
 0x252   : > { %733 = vst.msk [vmem:[#allocation2 + $0x8] sm:$0xf] %vm710_vm2, %v730_v37 }
 0x255   : > { %v936_v38 = vld [vmem:[#allocation2 + $0x4] sm:$0xf]  ;;  %v941_v41 = vpop.permute.xlu1 %940  ;;  %v1177_v43 = vld [vmem:[#allocation2 + $0xc] sm:$0xf]  ;;  %v1061_v44 = vpop.permute.xlu0 %1060 }
 0x256   : > { %v946_v39 = vsel %vm822_vm3, %v936_v38, 0  ;;  %v1186_v45 = vsel %vm822_vm3, %v1177_v43, 0 }
 0x257   : > { %1657 = vmatpush3.bf16.xpose.msra.mxu1 %v946_v39 }
 0x258   : > { %1668 = vmatprep.subr.bf16.mxu1 %v2158_v0 }
 0x259   : > { %v1057_v40 = vld [vmem:[#allocation2 + $0x8] sm:$0xf]  ;;  %v1181_v46 = vpop.permute.xlu1 %1180 }
 0x25a   : > { %v1066_v42 = vsel %vm822_vm3, %v1057_v40, 0 }
 0x25d   : > { %v725_v58 = vpop.permute.xlu1 %724 }
 0x25e   : > { %1659 = vmatmul.mubr.msk.bf16.vlgmr.msra.gmra.mrb[8].mxu1 %vm822_vm3, %v941_v41  ;;  %728 = vst.msk [vmem:[#allocation3 + $0x4] sm:$0xf] %vm710_vm2, %v725_v58 }
 0x25f   : > { %1669 = vmatpush3.bf16.xpose.msra.mxu1 %v1066_v42  ;;  %1670 = vmatprep.mubr.msk.bf16.mxu1 %vm2159_vm0, %v2158_v0 }
 0x260   : > { %1680 = vmatprep.subr.bf16.mxu1 %v2158_v0 }
 0x265   : > { %v938_v17 = vld [vmem:[#allocation3 + $0x4] sm:$0xf] }
 0x266   : > { %1671 = vmatmul.mubr.msk.bf16.vlgmr.msra.gmra.mrb[12].mxu1 %vm822_vm3, %v1061_v44  ;;  %v1003_v20 = vsel %vm886_vm4, %v938_v17, 0 }
 0x267   : > { %1681 = vmatpush3.bf16.xpose.msra.mxu1 %v1186_v45  ;;  %1682 = vmatprep.mubr.msk.bf16.mxu1 %vm2159_vm0, %v2158_v0 }
 0x268   : > { %1692 = vmatprep.subr.bf16.mxu1 %v2158_v0 }
 0x26e   : > { %1683 = vmatmul.mubr.msk.bf16.vlgmr.msra.gmra.mrb[16].mxu1 %vm822_vm3, %v1181_v46 }
 0x26f   : > { %1696 = vmatprep.mubr.msk.bf16.mxu1 %vm2159_vm0, %v2158_v0 }
 0x2be   : > { %v863_v52 = vpop.f32.mrb[4].mxu1 }
 0x2bf   : > { %v872_v53 = vsel %vm2626_vm6, %v863_v52, -1e+09  ;;  %v1648_v54 = vpop.f32.mrb[5].mxu1 }
 0x2c0   : > { %v866_v55 = vpop.f32.mrb[6].mxu1  ;;  %v873_v56 = vsel %vm822_vm3, %v872_v53, -inf }
 0x2c1   : > { %874 = vmax.xlane.f32.xlu0 %v873_v56  ;;  %v1649_v57 = vpop.f32.mrb[7].mxu1 }
 0x331   : > { %v982_v59 = vpop.f32.mrb[8].mxu1 }
 0x332   : > { %v988_v60 = vsel %vm2626_vm6, %v982_v59, -1e+09  ;;  %v1660_v61 = vpop.f32.mrb[9].mxu1 }
 0x333   : > { %v985_v62 = vpop.f32.mrb[10].mxu1  ;;  %v989_v63 = vsel %vm822_vm3, %v988_v60, -inf }
 0x334   : > { %990 = vmax.xlane.f32.xlu1 %v989_v63  ;;  %v1661_v1 = vpop.f32.mrb[11].mxu1 }
 0x335   : > { %v1827_v1 = vld [vmem:[%s2816_s1] sm:$0xff]  }
 0x336   : > { %1693 = vmatpush3.bf16.msra.mxu1 %v1827_v1 }
 0x337   : > { %1694 = vmatprep.subr.bf16.mxu1 %v2158_v0 }
 0x339   : > { %v1102_v2 = vpop.f32.mrb[12].mxu1 }
 0x33a   : > { %v1108_v3 = vsel %vm2626_vm6, %v1102_v2, -1e+09  ;;  %v1672_v4 = vpop.f32.mrb[13].mxu1 }
 0x33b   : > { %v1105_v5 = vpop.f32.mrb[14].mxu1  ;;  %v1109_v6 = vsel %vm822_vm3, %v1108_v3, -inf }
 0x33c   : > { %1110 = vmax.xlane.f32.xlu0 %v1109_v6  ;;  %v1673_v7 = vpop.f32.mrb[15].mxu1  ;;  %v1828_v6 = vld [vmem:[%s2816_s1 + $0x8] sm:$0xff]  }
 0x33d   : > { %1695 = vmatpush3.bf16.msra.mxu1 %v1828_v6 }
 0x341   : > { %v1222_v8 = vpop.f32.mrb[16].mxu1 }
 0x342   : > { %v1228_v9 = vsel %vm2626_vm6, %v1222_v8, -1e+09  ;;  %v1684_v10 = vpop.f32.mrb[17].mxu1 }
 0x343   : > { %v1225_v11 = vpop.f32.mrb[18].mxu1  ;;  %v1229_v12 = vsel %vm822_vm3, %v1228_v9, -inf }
 0x344   : > { %1230 = vmax.xlane.f32.xlu0 %v1229_v12  ;;  %v1685_v13 = vpop.f32.mrb[19].mxu1 }
 0x345   : > { %744 = vrot.lane.b32.xlu1 %v2600_v31, %s2160_s29 }
 0x34e   : > { %v875_v14 = vpop.xlane.xlu0 %874 }
 0x34f   : > { %v876_v15 = vsub.f32 %v872_v53, %v875_v14 }
 0x351   : > { %v877_v16 = vmul.f32 1.442695, %v876_v15 }
 0x353   : > { %1829 = vpow2.f32 %v877_v16 }
 0x35a   : > { %734 = vrot.lane.b32.xlu0 %v2600_v31, %s2162_s6  ;;  %s1379_s6 = sshll.u32 %s565_s21, 4  ;;  %s2687_s6 = int_to_ptr.vmem [resolvable:$true] %s1379_s6 }
 0x35b   : > { %s2049_s15 = scalar_lea.vmem %s2687_s6, 128 }
 0x35c   : > { %p2050_p5 = scmp.ne.s32.totalorder %s2687_s6, %s2049_s15 }
 0x35d   : > { %v1830_v18 = vpop.eup %1829 }
 0x35e   : > { %v882_v19 = vpack.c.bf16 %v1830_v18, %v1830_v18  ;;  %v879_v35 = vsel %vm822_vm3, %v1830_v18, 0.0  ;;  %p2051_p13 = pnand %p2050_p5, %p2819_p11 }
 0x360   : > { %1653 = vmatmul.mubr.msk.bf16.vlgmr.msra.gmra.mrb[8].mxu0 %vm822_vm3, %v882_v19  ;;  %p2052_p3 = pneg %p2051_p13 }
 0x361   : > { %1663 = vmatpush3.bf16.msra.mxu0 %v1003_v20  ;;  %1664 = vmatprep.mubr.msk.bf16.mxu0 %vm2159_vm0, %v2158_v0  ;;  %v1579_v20 = vld [vmem:[%s2817_s17] ss:$0 sm:$0xff] }
 0x362   : > { %1674 = vmatprep.subr.bf16.mxu0 %v2158_v0 }
 0x3c1   : > { %v991_v21 = vpop.xlane.xlu1 %990 }
 0x3c2   : > { %v992_v22 = vsub.f32 %v988_v60, %v991_v21 }
 0x3c4   : > { %v993_v23 = vmul.f32 1.442695, %v992_v22 }
 0x3c5   : > { %v745_v24 = vpop.permute.xlu1 %744 }
 0x3c6   : > { %1831 = vpow2.f32 %v993_v23  ;;  %748 = vst.msk [vmem:[#allocation3 + $0xc] sm:$0xf] %vm710_vm2, %v745_v24 }
 0x3c9   : > { %v1111_v25 = vpop.xlane.xlu0 %1110 }
 0x3ca   : > { %v1112_v26 = vsub.f32 %v1108_v3, %v1111_v25 }
 0x3cc   : > { %v1113_v27 = vmul.f32 1.442695, %v1112_v26 }
 0x3cd   : > { %v1179_v40 = vld [vmem:[#allocation3 + $0xc] sm:$0xf] }
 0x3ce   : > { %1833 = vpow2.f32 %v1113_v27  ;;  %v1243_v44 = vsel %vm886_vm4, %v1179_v40, 0 }
 0x3d0   : > { %v1832_v28 = vpop.eup %1831 }
 0x3d1   : > { %v1231_v29 = vpop.xlane.xlu0 %1230  ;;  %v995_v30 = vsel %vm822_vm3, %v1832_v28, 0.0  ;;  %v998_v31 = vpack.c.bf16 %v1832_v28, %v1832_v28 }
 0x3d2   : > { %v1232_v32 = vsub.f32 %v1228_v9, %v1231_v29  ;;  %996 = vadd.xlane.f32.xlu1 %v995_v30 }
 0x3d3   : > { %1665 = vmatmul.mubr.msk.bf16.vlgmr.msra.gmra.mrb[12].mxu0 %vm822_vm3, %v998_v31 }
 0x3d4   : > { %v1233_v33 = vmul.f32 1.442695, %v1232_v32  ;;  %1676 = vmatprep.mubr.msk.bf16.mxu0 %vm2159_vm0, %v2158_v0 }
 0x3d5   : > { %v735_v34 = vpop.permute.xlu0 %734 }
 0x3d6   : > { %1835 = vpow2.f32 %v1233_v33  ;;  %738 = vst.msk [vmem:[#allocation3 + $0x8] sm:$0xf] %vm710_vm2, %v735_v34  ;;  %880 = vadd.xlane.f32.xlu1 %v879_v35 }
 0x3d8   : > { %v1834_v36 = vpop.eup %1833 }
 0x3d9   : > { %v1115_v37 = vsel %vm822_vm3, %v1834_v36, 0.0  ;;  %v1118_v42 = vpack.c.bf16 %v1834_v36, %v1834_v36 }
 0x3da   : > { %1116 = vadd.xlane.f32.xlu0 %v1115_v37 }
 0x3dd   : > { %v1059_v38 = vld [vmem:[#allocation3 + $0x8] sm:$0xf] }
 0x3de   : > { %v1123_v39 = vsel %vm886_vm4, %v1059_v38, 0 }
 0x3df   : > { %1675 = vmatpush3.bf16.msra.mxu0 %v1123_v39 }
 0x3e0   : > { %v1836_v41 = vpop.eup %1835  ;;  %1686 = vmatprep.subr.bf16.mxu0 %v2158_v0 }
 0x3e1   : > { %v1235_v43 = vsel %vm822_vm3, %v1836_v41, 0.0  ;;  %v1238_v45 = vpack.c.bf16 %v1836_v41, %v1836_v41 }
 0x3e2   : > { %1236 = vadd.xlane.f32.xlu0 %v1235_v43  ;;  %1677 = vmatmul.mubr.msk.bf16.vlgmr.msra.gmra.mrb[16].mxu0 %vm822_vm3, %v1118_v42 }
 0x3e3   : > { %1687 = vmatpush3.bf16.msra.mxu0 %v1243_v44  ;;  %1688 = vmatprep.mubr.msk.bf16.mxu0 %vm2159_vm0, %v2158_v0 }
 0x3ea   : > { %1689 = vmatmul.mubr.msk.bf16.vlgmr.msra.gmra.mrb[20].mxu0 %vm822_vm3, %v1238_v45 }
 0x433   : > { %v924_v46 = vpop.f32.mrb[8].mxu0 }
 0x434   : > { %v1654_v47 = vpop.f32.mrb[9].mxu0 }
 0x435   : > { %v927_v48 = vpop.f32.mrb[10].mxu0 }
 0x436   : > { %v1655_v49 = vpop.f32.mrb[11].mxu0 }
 0x45f   : > { %v997_v50 = vpop.xlane.xlu1 %996 }
 0x463   : > { %v881_v51 = vpop.xlane.xlu1 %880 }
 0x464   : > { %1837 = vrcp.f32 %v881_v51 }
 0x465   : > { %1839 = vrcp.f32 %v997_v50 }
 0x467   : > { %v1117_v59 = vpop.xlane.xlu0 %1116 }
 0x468   : > { %1841 = vrcp.f32 %v1117_v59 }
 0x46e   : > { %v1838_v52 = vpop.eup %1837 }
 0x46f   : > { %v931_v53 = vmul.f32 %v1838_v52, %v924_v46  ;;  %v1840_v55 = vpop.eup %1839  ;;  %v1237_v63 = vpop.xlane.xlu0 %1236 }
 0x470   : > { %1843 = vrcp.f32 %v1237_v63 }
 0x471   : > { %v932_v54 = vpack.c.bf16 %v931_v53, %v931_v53 }
 0x472   : > { %v1842_v2 = vpop.eup %1841 }
 0x473   : > { %934 = vst.msk [vmem:[#allocation4] sm:$0xf] %vm710_vm2, %v932_v54 }
 0x47a   : > { %v1844_v10 = vpop.eup %1843 }
 0x4a6   : > { %v1039_v56 = vpop.f32.mrb[12].mxu0 }
 0x4a7   : > { %v1046_v57 = vmul.f32 %v1840_v55, %v1039_v56  ;;  %v1666_v58 = vpop.f32.mrb[13].mxu0 }
 0x4a8   : > { %v1042_v60 = vpop.f32.mrb[14].mxu0 }
 0x4a9   : > { %v1589_v61 = vpack.c.bf16 %v1046_v57, %v1046_v57  ;;  %v1667_v62 = vpop.f32.mrb[15].mxu0 }
 0x4ab   : > { %1051 = vrot.lane.b32.xlu0 %v1589_v61, %s2164_s30 }
 0x4b5   : > { %v1159_v3 = vpop.f32.mrb[16].mxu0 }
 0x4b6   : > { %v1166_v4 = vmul.f32 %v1842_v2, %v1159_v3  ;;  %v1678_v5 = vpop.f32.mrb[17].mxu0 }
 0x4b7   : > { %v1162_v7 = vpop.f32.mrb[18].mxu0 }
 0x4b8   : > { %v1590_v8 = vpack.c.bf16 %v1166_v4, %v1166_v4  ;;  %v1679_v9 = vpop.f32.mrb[19].mxu0 }
 0x4ba   : > { %1171 = vrot.lane.b32.xlu1 %v1590_v8, %s2165_s7  ;;  %s2167_s7 = smov [#allocation17]  }
 0x4bd   : > { %v1279_v11 = vpop.f32.mrb[20].mxu0 }
 0x4be   : > { %v1286_v12 = vmul.f32 %v1844_v10, %v1279_v11  ;;  %v1690_v13 = vpop.f32.mrb[21].mxu0 }
 0x4bf   : > { %v1282_v14 = vpop.f32.mrb[22].mxu0 }
 0x4c0   : > { %v1591_v15 = vpack.c.bf16 %v1286_v12, %v1286_v12  ;;  %v1691_v16 = vpop.f32.mrb[23].mxu0 }
 0x4c2   : > { %1291 = vrot.lane.b32.xlu1 %v1591_v15, %s2166_s20  ;;  %s2053_s20 = sshll.u32 %s2167_s7, 4  ;;  %s2054_s20 = int_to_ptr.vmem [resolvable:$false] %s2053_s20 }
 0x4c3   : > { %s2055_s28 = scalar_lea.vmem %s2054_s20, 256  ;;  %p2056_p0 = scmp.lt.s32.totalorder %s2687_s6, %s2054_s20 }
 0x4c4   : > { %p2057_p2 = scmp.lt.s32.totalorder %s2055_s28, %s2049_s15 }
 0x4c6   : > { %p2058_p7 = por %p2057_p2, %p2056_p0 }
 0x4c8   : > { %p2059_p9 = pnand %p2058_p7, %p2052_p3 }
 0x51d   : > { %v1052_v17 = vpop.permute.xlu0 %1051 }
 0x51e   : > { %1055 = vst.msk [vmem:[#allocation4] sm:$0xf] %vm1054_vm7, %v1052_v17 }
 0x52c   : > { %v1172_v0 = vpop.permute.xlu1 %1171 }
 0x52d   : > { %1175 = vst.msk [vmem:[#allocation4] sm:$0xf] %vm1174_vm8, %v1172_v0 }
 0x534   : > { %v1292_v18 = vpop.permute.xlu1 %1291 }
 0x535   : > { %1295 = vst.msk [vmem:[#allocation4] sm:$0xf] %vm1294_vm9, %v1292_v18 }
 0x53c   : > { %v1296_v19 = vld [vmem:[#allocation4] sm:$0xf] }
 0x53d   : > { %1697 = vmatmul.mubr.msk.bf16.vlgmr.msra.gmra.mrb[20].mxu1 %vm597_vm1, %v1296_v19 }
 0x610   : > { %v1357_v21 = vpop.f32.mrb[20].mxu1 }
 0x611   : > { %v1358_v22 = vadd.f32 %v1579_v20, %v1357_v21  ;;  %v1698_v23 = vpop.f32.mrb[21].mxu1 }
 0x612   : > { %v1360_v24 = vpop.f32.mrb[22].mxu1 }
 0x613   : > { %v1699_v25 = vpop.f32.mrb[23].mxu1  ;;  %1363 = vst.msk [vmem:[%s565_s21] sm:$0xff] %vm597_vm1, %v1358_v22 }
 0x614   : > { %2062 = shalt.err (!%p2059_p9)
}
 0x615   : > { %s2063_s19 = scalar_lea.hbm %s2685_s27, 128  ;;  %s2067_s17 = scalar_lea.hbm %s2818_s3, 256 }
 0x616   : > { %p2064_p6 = scmp.ne.s32.totalorder %s2685_s27, %s2063_s19  ;;  %p2068_p12 = scmp.lt.u32.totalorder %s2685_s27, %s2818_s3 }
 0x617   : > { %p2069_p1 = scmp.lt.u32.totalorder %s2067_s17, %s2063_s19  ;;  %p2071_p5 = scmp.lt.u32.totalorder %s2063_s19, %s2685_s27 }
 0x618   : > { %p2065_p10 = pnand %p2064_p6, %p2819_p11 }
 0x619   : > { %p2070_p8 = por %p2069_p1, %p2068_p12 }
 0x61a   : > { %p2066_p4 = pneg %p2065_p10 }
 0x61b   : > { %p2072_p13 = por %p2071_p5, %p2070_p8 }
 0x61d   : > { %p2073_p3 = pnand %p2072_p13, %p2066_p4 }
 0x61f   : > { %2076 = shalt.err (!%p2073_p3)
}
 0x620   : > { %1720 = dma.vmem_to_hbm [thread:$0]  (%p2819_p11), %s2687_s6, 128, %s2685_s27, %s1365_s24  }
 0x621 PF: > { %s2820_s30 = sld [smem:[#allocation24_spill]]  ;;  %s2821_s13 = sld [smem:[#allocation26_spill]] }
 0x622   : > { %p2823_p2 = scmp.ge.s32.totalorder %s2147_s26, 2 }
 0x627   : > { %s1391_s15 = sand.u32 1, %s2820_s30   ;;  %p2822_p0 = scmp.ne.s32.totalorder %s2821_s13, 0 }
 0x628   : > { %s1392_s7 = scalar_lea.sflag [#allocation7], %s1391_s15 }
 0x629   : > { %p1746_p7 = pnand %p2823_p2, %p2822_p0 }
 0x62b   : > { %2122 = dma.done.wait (!%p1746_p7), %s1392_s7, 128  }
 0x62c   : > { %2124 = vsyncadd (!%p1746_p7), %s1392_s7, 4294967168  ;;  %s33_s26 = sadd.s32 1, %s2147_s26   ;;  %s2824_s21 = smov %s2131_s22 }
 0x62d   : > { %p30_p9 = scmp.ge.s32.totalorder %s33_s26, 4   ;;  %s2825_s22 = smov %s2135_s23 }
 0x62e   : > { %s2826_s23 = smov %s2453_s10  ;;  %s2827_s24 = smov %s2143_s25 }
 0x62f   : > { %s2828_s25 = smov %s2830_s11  ;;  %32 = sbr.rel (!%p30_p9) target bundleno = 20 (0x14), region = 164 }
 0x636   :  { %1397 = vsyncpa [#allocation6], 1 }
 0x637   :  { %1399 = vsyncpa [#allocation6 + $0x1], 1 }
 0x638   :  { %1400 = vsyncpa [#allocation9], 1 }
 0x639   :  { %1401 = vsyncpa [#allocation12], 1 }
 0x63a   :  { %1403 = vsyncpa [#allocation12 + $0x1], 1 }
 0x63b   :  { %1404 = vsyncpa [#allocation15], 1 }
 0x63c   :  { %1405 = vsyncpa [#allocation7], 1 }
 0x63d   :  { %1407 = vsyncpa [#allocation7 + $0x1], 1 }

// kernel: tpu_custom_call.1
= control target key start
LH: loop header
LB: loop body
LE: loop exit
PB: predicated region body
PF: predicated region fallthrough
CT: control target
= control target key end

     0   :  { %s2800_s0 = inlined_call_operand.hbm [shape: bf16[2,8,32], index: 0, kind: input, shape index: {}]   ;;  %s2801_s1 = inlined_call_operand.hbm [shape: bf16[2,8,32], index: 1, kind: input, shape index: {}]   ;;  %s2802_s2 = inlined_call_operand.hbm [shape: bf16[2,8,32], index: 2, kind: input, shape index: {}]   ;;  %s2803_s3 = inlined_call_operand.hbm [shape: s8[2,8,8], index: 3, kind: input, shape index: {}]   ;;  %s2804_s4 = inlined_call_operand.hbm [shape: bf16[32,32], index: 4, kind: input, shape index: {}]   ;;  %s2805_s5 = inlined_call_operand.vmem [shape: f32[1,32], index: 5, kind: input, shape index: {}]   ;;  %s2806_s6 = inlined_call_operand.vmem [shape: bf16[32,32], index: 6, kind: input, shape index: {}]   ;;  %s2807_s7 = inlined_call_operand.vmem [shape: f32[1,32], index: 7, kind: input, shape index: {}]   ;;  %s2808_s8 = inlined_call_operand.hbm [shape: bf16[32,32], index: 8, kind: input, shape index: {}]   ;;  %s2809_s9 = inlined_call_operand.hbm [shape: f32[1,32], index: 9, kind: input, shape index: {}]   ;;  %s2810_s10 = inlined_call_operand.vmem [shape: bf16[32,32], index: 10, kind: input, shape index: {}]   ;;  %s2811_s11 = inlined_call_operand.vmem [shape: f32[1,32], index: 11, kind: input, shape index: {}]   ;;  %s2812_s12 = inlined_call_operand.hbm [shape: f32[2,8,32], index: 12, kind: output, shape index: {}]  }
   0x1   :  { %2831 = sst [smem:[#allocation31_spill]] %s2801_s1 }
   0x2   :  { %2832 = sst [smem:[#allocation32_spill]] %s2804_s4 }
   0x3   :  { %2833 = sst [smem:[#allocation33_spill]] %s2805_s5 }
   0x4   :  { %2834 = sst [smem:[#allocation34_spill]] %s2807_s7 }
   0x5   :  { %2835 = sst [smem:[#allocation35_spill]] %s2808_s8 }
   0x6   :  { %2836 = sst [smem:[#allocation36_spill]] %s2810_s10 }
   0x7   :  { %2837 = sst [smem:[#allocation37_spill]] %s2811_s11 }
   0x8   :  { %2838 = sst [smem:[#allocation38_spill]] %s2812_s12 }
   0x9   :  { %17 = vsyncpa [#allocation6], 0 }
   0xa   :  { %19 = vsyncpa [#allocation6 + $0x1], 0 }
   0xb   :  { %20 = vsyncpa [#allocation9], 0 }
   0xc   :  { %22 = vsyncpa [#allocation9 + $0x1], 0 }
   0xd   :  { %23 = vsyncpa [#allocation12], 0 }
   0xe   :  { %25 = vsyncpa [#allocation12 + $0x1], 0 }
   0xf   :  { %26 = vsyncpa [#allocation15], 0 }
  0x10   :  { %27 = vsyncpa [#allocation7], 0 }
  0x11   :  { %29 = vsyncpa [#allocation7 + $0x1], 0  ;;  %s2287_s21 = smov 0   ;;  %s2289_s22 = smov 0  }
  0x12   :  { %s2291_s23 = smov 0   ;;  %s2293_s24 = smov 0  }
  0x13   :  { %s2295_s25 = smov 0   ;;  %s2297_s26 = smov 0  }
  0x14 LB: > { %2839 = sst [smem:[#allocation24_spill]] %s2181_s21  ;;  %s2318_s27 = sadd.s32 4294967295, %s2201_s26   ;;  %s2201_s26 = sphi %s2297_s26, %s35_s26   ;;  %s2197_s25 = sphi %s2295_s25, %s2890_s25   ;;  %s2193_s24 = sphi %s2293_s24, %s2889_s24   ;;  %s2189_s23 = sphi %s2291_s23, %s2885_s23   ;;  %s2185_s22 = sphi %s2289_s22, %s2888_s22   ;;  %s2181_s21 = sphi %s2287_s21, %s2887_s21  }
  0x15   : > { %2840 = sst [smem:[#allocation25_spill]] %s2189_s23  ;;  %s1587_s28 = sadd.s32 4294967294, %s2201_s26  }
  0x16   : > { %2841 = sst [smem:[#allocation26_spill]] %s2193_s24  ;;  %p69_p0 = scmp.ne.s32.totalorder %s2185_s22, %s2181_s21 }
  0x17   : > { %p2816_p1 = scmp.eq.s32.totalorder %s2318_s27, 0  ;;  %p349_p3 = scmp.eq.s32.totalorder %s1587_s28, 1 }
  0x18   : > { %p1588_p5 = scmp.ge.s32.totalorder %s2201_s26, 1  ;;  %p356_p7 = scmp.lt.s32.totalorder %s2201_s26, 3 }
  0x19   : > { %p2327_p4 = por %p2816_p1, %p69_p0  ;;  %p2332_p6 = por %p349_p3, %p69_p0 }
  0x1a   : > { %p2337_p8 = pnand %p1588_p5, %p356_p7  ;;  %s2203_s14 = smov [#allocation13]  }
  0x1b   : > { %s2842_s29 = scalar_select %p2327_p4, 1, 0 }
  0x1c   : > { %s2843_s30 = scalar_select %p2332_p6, 1, 0 }
  0x1d   : > { %s2845_s13 = scalar_select %p2337_p8, 1, 0 }
  0x1e   : > { %2844 = sst [smem:[#allocation27_spill]] %s2843_s30  ;;  %s368_s15 = sshll.u32 %s2203_s14, 4  ;;  %s2341_s15 = int_to_ptr.vmem [resolvable:$true] %s368_s15 }
  0x1f   : > { %p1778_p9 = pneg %p2337_p8  ;;  %s2204_s17 = smov [#allocation14]  }
  0x20   : > { %s390_s18 = sshll.u32 %s2204_s17, 4  ;;  %s2847_s4 = sld [smem:[#allocation32_spill]]  ;;  %s2352_s18 = int_to_ptr.vmem [resolvable:$true] %s390_s18 }
  0x21   : > { %p2348_p11 = pnand %p1778_p9, %p2816_p1 }
  0x23   : > { %s2846_s16 = scalar_select %p2348_p11, 1, 0 }
  0x24   : > { %p2362_p13 = pneg %p2348_p11 }
  0x26   : > { %s1899_s28 = scalar_lea.hbm %s2847_s4, 256 }
  0x27   : > { %p1900_p12 = scmp.ne.s32.totalorder %s2847_s4, %s1899_s28  ;;  %p1906_p5 = scmp.lt.u32.totalorder %s1899_s28, %s2847_s4 }
  0x28   : > { %s2848_s21 = scalar_select %p2362_p13, 1, 0 }
  0x29   : > { %p1902_p0 = pnand %p2362_p13, %p1900_p12 }
  0x2b   : > { %p1903_p3 = pneg %p1902_p0 }
  0x2d   : > { %p1908_p7 = pnand %p1906_p5, %p1903_p3 }
  0x2f   : > { %1911 = shalt.err (!%p1908_p7)
}
  0x30   : > { %s1912_s30 = scalar_lea.vmem %s2341_s15, 256  ;;  %p1920_p2 = scmp.lt.s32.totalorder %s2341_s15, %s2341_s15 }
  0x31   : > { %p1913_p9 = scmp.ne.s32.totalorder %s2341_s15, %s1912_s30  ;;  %p1921_p6 = scmp.lt.s32.totalorder %s1912_s30, %s1912_s30 }
  0x33   : > { %p1915_p10 = pnand %p1913_p9, %p2362_p13  ;;  %p1922_p12 = por %p1921_p6, %p1920_p2 }
  0x35   : > { %p1916_p1 = pneg %p1915_p10 }
  0x37   : > { %p1923_p0 = pnand %p1922_p12, %p1916_p1 }
  0x39   : > { %1926 = shalt.err (!%p1923_p0)
}
  0x3a   : > { %s2205_s19 = smov 64   ;;  %s2206_s12 = smov 4  }
  0x3b   : > { %1781 = dma.hbm_to_vmem [thread:$0]  (!%p2348_p11), %s2847_s4, 256, %s2341_s15, [#allocation12], %s2205_s19, %s2205_s19, %s2206_s12  }
  0x3c   : > { %s2849_s8 = sld [smem:[#allocation35_spill]] }
  0x42   : > { %s1927_s11 = scalar_lea.hbm %s2849_s8, 256 }
  0x43   : > { %p1928_p2 = scmp.ne.s32.totalorder %s2849_s8, %s1927_s11  ;;  %p1934_p10 = scmp.lt.u32.totalorder %s1927_s11, %s2849_s8 }
  0x45   : > { %p1930_p1 = pnand %p1928_p2, %p2362_p13 }
  0x47   : > { %p1931_p6 = pneg %p1930_p1 }
  0x49   : > { %p1936_p3 = pnand %p1934_p10, %p1931_p6 }
  0x4b   : > { %1939 = shalt.err (!%p1936_p3)
}
  0x4c   : > { %s1940_s15 = scalar_lea.vmem %s2352_s18, 256  ;;  %p1948_p12 = scmp.lt.s32.totalorder %s2352_s18, %s2352_s18 }
  0x4d   : > { %p1941_p5 = scmp.ne.s32.totalorder %s2352_s18, %s1940_s15  ;;  %p1949_p0 = scmp.lt.s32.totalorder %s1940_s15, %s1940_s15 }
  0x4f   : > { %p1943_p7 = pnand %p1941_p5, %p2362_p13  ;;  %p1950_p2 = por %p1949_p0, %p1948_p12 }
  0x51   : > { %p1944_p9 = pneg %p1943_p7 }
  0x53   : > { %p1951_p1 = pnand %p1950_p2, %p1944_p9 }
  0x55   : > { %1954 = shalt.err (!%p1951_p1)
}
  0x56   : > { %1784 = dma.hbm_to_vmem [thread:$0]  (!%p2348_p11), %s2849_s8, 256, %s2352_s18, [#allocation15], %s2205_s19, %s2205_s19, %s2206_s12  }
  0x57   : > { %s47_s11 = sadd.s32 1, %s2197_s25  ;;  %s56_s24 = sadd.s32 1, %s2189_s23 }
  0x58   : > { %p49_p6 = scmp.ge.s32.totalorder %s47_s11, 2  ;;  %p63_p10 = scmp.ne.s32.totalorder %s2189_s23, %s2185_s22 }
  0x59   : > { %p64_p3 = scmp.eq.s32.totalorder %s2201_s26, 0  ;;  %p1808_p5 = scmp.lt.s32.totalorder %s2201_s26, 2 }
  0x5a   : > { %s2892_s11 = smov (%p49_p6, %s47_s11), 0  ;;  %p2851_p9 = scmp.eq.s32.totalorder %s2318_s27, 1 }
  0x5b   : > { %2850 = sst [smem:[#allocation28_spill]] %s2892_s11  ;;  %p65_p7 = por %p64_p3, %p63_p10 }
  0x5c   : > { %p2416_p12 = por %p2851_p9, %p63_p10  ;;  %s51_s28 = ssub.s32 %s2197_s25, %s2892_s11 }
  0x5d   : > { %s2423_s18 = sand.u32 1, %s2189_s23   ;;  %p54_p0 = scmp.eq.s32.totalorder %s51_s28, 0 }
  0x5e   : > { %s2852_s20 = scalar_select %p2416_p12, 1, 0 }
  0x5f   : > { %s2426_s19 = sshll.u32 %s2423_s18, 2  ;;  %s2429_s12 = sshll.u32 %s2197_s25, 6 }
  0x60   : > { %2853 = sst [smem:[#allocation29_spill]] %s2852_s20  ;;  %p2431_p2 = pnand %p1808_p5, %p65_p7 }
  0x61   : > { %s2436_s17 = scalar_select %p54_p0, %s2189_s23, %s56_s24  }
  0x62   : > { %s2854_s14 = scalar_select %p2431_p2, 1, 0 }
  0x63   : > { %2855 = sst [smem:[#allocation30_spill]] %s2436_s17  ;;  %s2822_s30 = sand.u32 1, %s2201_s26  }
  0x64   : > { %s2856_s1 = sld [smem:[#allocation31_spill]]  ;;  %s444_s28 = scalar_lea.vmem [#allocation8], %s2426_s19 }
  0x65   : > { %s451_s4 = sshll.u32 %s444_s28, 4  ;;  %s2450_s8 = scalar_lea.sflag [#allocation9], %s2822_s30  ;;  %s2446_s4 = int_to_ptr.vmem [resolvable:$true] %s451_s4 }
  0x66   : > { %p2456_p6 = pneg %p2431_p2 }
  0x6a   : > { %s2443_s10 = scalar_lea.hbm %s2856_s1, %s2429_s12  ;;  %s1960_s28 = scalar_lea.hbm %s2856_s1, 128 }
  0x6b   : > { %s1955_s11 = scalar_lea.hbm %s2443_s10, 64  ;;  %p1961_p5 = scmp.lt.u32.totalorder %s2443_s10, %s2856_s1 }
  0x6c   : > { %p1956_p1 = scmp.ne.s32.totalorder %s2443_s10, %s1955_s11  ;;  %p1962_p7 = scmp.lt.u32.totalorder %s1960_s28, %s1955_s11 }
  0x6d   : > { %p1964_p0 = scmp.lt.u32.totalorder %s1955_s11, %s2443_s10 }
  0x6e   : > { %p1958_p10 = pnand %p2456_p6, %p1956_p1  ;;  %p1963_p9 = por %p1962_p7, %p1961_p5 }
  0x70   : > { %p1959_p3 = pneg %p1958_p10  ;;  %p1965_p12 = por %p1964_p0, %p1963_p9 }
  0x72   : > { %p1966_p4 = pnand %p1965_p12, %p1959_p3 }
  0x74   : > { %1969 = shalt.err (!%p1966_p4)
}
  0x75   : > { %s1970_s30 = scalar_lea.vmem %s2446_s4, 64  ;;  %s2207_s15 = smov [#allocation8]  }
  0x76   : > { %p1971_p1 = scmp.ne.s32.totalorder %s2446_s4, %s1970_s30  ;;  %s1975_s5 = sshll.u32 %s2207_s15, 4  ;;  %s1976_s5 = int_to_ptr.vmem [resolvable:$false] %s1975_s5 }
  0x77   : > { %s1977_s23 = scalar_lea.vmem %s1976_s5, 128  ;;  %p1978_p11 = scmp.lt.s32.totalorder %s2446_s4, %s1976_s5 }
  0x78   : > { %p1973_p10 = pnand %p1971_p1, %p2456_p6  ;;  %p1979_p13 = scmp.lt.s32.totalorder %s1977_s23, %s1970_s30 }
  0x7a   : > { %p1974_p8 = pneg %p1973_p10  ;;  %p1980_p5 = por %p1979_p13, %p1978_p11 }
  0x7c   : > { %p1981_p7 = pnand %p1980_p5, %p1974_p8 }
  0x7e   : > { %1984 = shalt.err (!%p1981_p7)
}
  0x7f   : > { %1794 = dma.hbm_to_vmem [thread:$0]  (!%p2431_p2), %s2443_s10, 64, %s2446_s4, %s2450_s8  }
  0x80   : > { %s2208_s11 = smov [#allocation16]   ;;  %s2484_s1 = scalar_lea.hbm %s2800_s0, %s2429_s12 }
  0x81   : > { %s404_s17 = sshll.u32 %s2208_s11, 4  ;;  %s1985_s23 = scalar_lea.hbm %s2809_s9, 16  ;;  %s405_s17 = int_to_ptr.vmem [resolvable:$true] %s404_s17 }
  0x82   : > { %p1986_p4 = scmp.ne.s32.totalorder %s2809_s9, %s1985_s23  ;;  %p2858_p8 = scmp.ne.s32.totalorder %s2848_s21, 0 }
  0x83   : > { %p1992_p12 = scmp.lt.u32.totalorder %s1985_s23, %s2809_s9 }
  0x84   : > { %p1988_p11 = pnand %p1986_p4, %p2858_p8 }
  0x86   : > { %p1989_p13 = pneg %p1988_p11 }
  0x88   : > { %p1994_p3 = pnand %p1992_p12, %p1989_p13 }
  0x8a   : > { %1997 = shalt.err (!%p1994_p3)
}
  0x8b   : > { %s1998_s11 = scalar_lea.vmem %s405_s17, 16  ;;  %s2005_s28 = scalar_lea.vmem %s405_s17, 32 }
  0x8c   : > { %p1999_p9 = scmp.ne.s32.totalorder %s405_s17, %s1998_s11  ;;  %p2006_p10 = scmp.lt.s32.totalorder %s405_s17, %s405_s17 }
  0x8d   : > { %p2007_p5 = scmp.lt.s32.totalorder %s2005_s28, %s1998_s11 }
  0x8e   : > { %p2001_p0 = pnand %p1999_p9, %p2858_p8 }
  0x8f   : > { %p2008_p7 = por %p2007_p5, %p2006_p10 }
  0x90   : > { %p2002_p1 = pneg %p2001_p0 }
  0x92   : > { %p2009_p2 = pnand %p2008_p7, %p2002_p1 }
  0x94   : > { %2012 = shalt.err (!%p2009_p2)
}
  0x95   : > { %p2859_p4 = scmp.ne.s32.totalorder %s2846_s16, 0  ;;  %s425_s21 = scalar_lea.vmem [#allocation5], %s2426_s19 }
  0x96   : > { %s433_s15 = sshll.u32 %s425_s21, 4  ;;  %s2511_s16 = scalar_lea.hbm %s2802_s2, %s2429_s12  ;;  %s2505_s15 = int_to_ptr.vmem [resolvable:$true] %s433_s15 }
  0x97   : > { %1787 = dma.hbm_to_vmem [thread:$0]  (!%p2859_p4), %s2809_s9, 16, %s405_s17, [#allocation15]  }
  0x98   : > { %s422_s23 = scalar_lea.sflag [#allocation6], %s2423_s18  ;;  %s2013_s4 = scalar_lea.hbm %s2484_s1, 64 }
  0x99   : > { %p2014_p2 = scmp.ne.s32.totalorder %s2484_s1, %s2013_s4  ;;  %s2018_s28 = scalar_lea.hbm %s2800_s0, 128 }
  0x9a   : > { %p2019_p13 = scmp.lt.u32.totalorder %s2484_s1, %s2800_s0  ;;  %p2020_p12 = scmp.lt.u32.totalorder %s2018_s28, %s2013_s4 }
  0x9b   : > { %p2016_p8 = pnand %p2014_p2, %p2456_p6  ;;  %p2022_p9 = scmp.lt.u32.totalorder %s2013_s4, %s2484_s1 }
  0x9c   : > { %p2021_p3 = por %p2020_p12, %p2019_p13 }
  0x9d   : > { %p2017_p11 = pneg %p2016_p8 }
  0x9e   : > { %p2023_p0 = por %p2022_p9, %p2021_p3 }
  0xa0   : > { %p2024_p1 = pnand %p2023_p0, %p2017_p11 }
  0xa2   : > { %2027 = shalt.err (!%p2024_p1)
}
  0xa3   : > { %s2028_s12 = scalar_lea.vmem %s2505_s15, 64  ;;  %s2209_s20 = smov [#allocation5]  }
  0xa4   : > { %p2029_p10 = scmp.ne.s32.totalorder %s2505_s15, %s2028_s12  ;;  %s2033_s21 = sshll.u32 %s2209_s20, 4  ;;  %s2034_s21 = int_to_ptr.vmem [resolvable:$false] %s2033_s21 }
  0xa5   : > { %s2035_s30 = scalar_lea.vmem %s2034_s21, 128  ;;  %p2036_p4 = scmp.lt.s32.totalorder %s2505_s15, %s2034_s21 }
  0xa6   : > { %p2031_p5 = pnand %p2029_p10, %p2456_p6  ;;  %p2037_p2 = scmp.lt.s32.totalorder %s2035_s30, %s2028_s12 }
  0xa8   : > { %p2032_p7 = pneg %p2031_p5  ;;  %p2038_p8 = por %p2037_p2, %p2036_p4 }
  0xaa   : > { %p2039_p13 = pnand %p2038_p8, %p2032_p7 }
  0xac   : > { %2042 = shalt.err (!%p2039_p13)
}
  0xad   : > { %p2860_p11 = scmp.ne.s32.totalorder %s2854_s14, 0  ;;  %s462_s5 = scalar_lea.vmem [#allocation10], %s2426_s19 }
  0xae   : > { %s469_s4 = sshll.u32 %s462_s5, 4  ;;  %s1599_s10 = sshll.u32 %s2423_s18, 1  ;;  %s470_s4 = int_to_ptr.vmem [resolvable:$true] %s469_s4 }
  0xaf   : > { %1791 = dma.hbm_to_vmem [thread:$0]  (!%p2860_p11), %s2484_s1, 64, %s2505_s15, %s422_s23  }
  0xb0   : > { %s2043_s11 = scalar_lea.hbm %s2511_s16, 64  ;;  %s2048_s7 = scalar_lea.hbm %s2802_s2, 128 }
  0xb1   : > { %p2044_p12 = scmp.ne.s32.totalorder %s2511_s16, %s2043_s11  ;;  %p2049_p0 = scmp.lt.u32.totalorder %s2511_s16, %s2802_s2 }
  0xb2   : > { %p2050_p1 = scmp.lt.u32.totalorder %s2048_s7, %s2043_s11  ;;  %p2052_p5 = scmp.lt.u32.totalorder %s2043_s11, %s2511_s16 }
  0xb3   : > { %p2046_p3 = pnand %p2044_p12, %p2456_p6 }
  0xb4   : > { %p2051_p10 = por %p2050_p1, %p2049_p0 }
  0xb5   : > { %p2047_p9 = pneg %p2046_p3 }
  0xb6   : > { %p2053_p7 = por %p2052_p5, %p2051_p10 }
  0xb8   : > { %p2054_p4 = pnand %p2053_p7, %p2047_p9 }
  0xba   : > { %2057 = shalt.err (!%p2054_p4)
}
  0xbb   : > { %s2058_s1 = scalar_lea.vmem %s470_s4, 64  ;;  %s2210_s19 = smov [#allocation10]  }
  0xbc   : > { %p2059_p2 = scmp.ne.s32.totalorder %s470_s4, %s2058_s1  ;;  %s2063_s15 = sshll.u32 %s2210_s19, 4  ;;  %s2064_s15 = int_to_ptr.vmem [resolvable:$false] %s2063_s15 }
  0xbd   : > { %s2065_s23 = scalar_lea.vmem %s2064_s15, 128  ;;  %p2066_p12 = scmp.lt.s32.totalorder %s470_s4, %s2064_s15 }
  0xbe   : > { %p2061_p8 = pnand %p2059_p2, %p2456_p6  ;;  %p2067_p3 = scmp.lt.s32.totalorder %s2065_s23, %s2058_s1 }
  0xc0   : > { %p2062_p13 = pneg %p2061_p8  ;;  %p2068_p11 = por %p2067_p3, %p2066_p12 }
  0xc2   : > { %p2069_p0 = pnand %p2068_p11, %p2062_p13 }
  0xc4   : > { %2072 = shalt.err (!%p2069_p0)
}
  0xc5   : > { %p2861_p1 = scmp.ne.s32.totalorder %s2854_s14, 0  ;;  %s1600_s21 = sshll.u32 %s2197_s25, 5 }
  0xc6   : > { %s480_s30 = scalar_lea.vmem [#allocation11], %s1599_s10  ;;  %s2561_s17 = scalar_lea.hbm %s2803_s3, %s1600_s21 }
  0xc7   : > { %1797 = dma.hbm_to_vmem [thread:$0]  (!%p2861_p1), %s2511_s16, 64, %s470_s4, %s2450_s8  }
  0xc8   : > { %s488_s5 = sshll.u32 %s480_s30, 4  ;;  %s2862_s7 = sand.u32 1, %s2201_s26   ;;  %s489_s5 = int_to_ptr.vmem [resolvable:$true] %s488_s5 }
  0xc9   : > { %s477_s12 = scalar_lea.sflag [#allocation12], %s2862_s7  ;;  %s2073_s20 = scalar_lea.hbm %s2561_s17, 32 }
  0xca   : > { %p2074_p11 = scmp.ne.s32.totalorder %s2561_s17, %s2073_s20  ;;  %s2078_s16 = scalar_lea.hbm %s2803_s3, 64 }
  0xcb   : > { %p2079_p5 = scmp.lt.u32.totalorder %s2561_s17, %s2803_s3  ;;  %p2080_p7 = scmp.lt.u32.totalorder %s2078_s16, %s2073_s20 }
  0xcc   : > { %p2076_p9 = pnand %p2074_p11, %p2456_p6  ;;  %p2082_p2 = scmp.lt.u32.totalorder %s2073_s20, %s2561_s17 }
  0xcd   : > { %p2081_p4 = por %p2080_p7, %p2079_p5 }
  0xce   : > { %p2077_p10 = pneg %p2076_p9 }
  0xcf   : > { %p2083_p8 = por %p2082_p2, %p2081_p4 }
  0xd1   : > { %p2084_p13 = pnand %p2083_p8, %p2077_p10 }
  0xd3   : > { %2087 = shalt.err (!%p2084_p13)
}
  0xd4   : > { %s2088_s1 = scalar_lea.vmem %s489_s5, 32  ;;  %s2211_s19 = smov [#allocation11]  }
  0xd5   : > { %p2089_p12 = scmp.ne.s32.totalorder %s489_s5, %s2088_s1  ;;  %s2093_s15 = sshll.u32 %s2211_s19, 4  ;;  %s2094_s15 = int_to_ptr.vmem [resolvable:$false] %s2093_s15 }
  0xd6   : > { %s2095_s23 = scalar_lea.vmem %s2094_s15, 64  ;;  %p2096_p11 = scmp.lt.s32.totalorder %s489_s5, %s2094_s15 }
  0xd7   : > { %p2091_p3 = pnand %p2089_p12, %p2456_p6  ;;  %p2097_p9 = scmp.lt.s32.totalorder %s2095_s23, %s2088_s1 }
  0xd9   : > { %p2092_p0 = pneg %p2091_p3  ;;  %p2098_p1 = por %p2097_p9, %p2096_p11 }
  0xdb   : > { %p2099_p5 = pnand %p2098_p1, %p2092_p0 }
  0xdd   : > { %2102 = shalt.err (!%p2099_p5)
}
  0xde   : > { %p2863_p7 = scmp.ne.s32.totalorder %s2854_s14, 0  ;;  %p2864_p10 = scmp.ne.s32.totalorder %s2845_s13, 0 }
  0xdf   : > { %s2585_s24 = sand.u32 (!%p2864_p10), 1, %s2185_s22   ;;  %p2865_p6 = scmp.ne.s32.totalorder (!%p2864_p10), %s2842_s29, 0 }
  0xe0   : > { %1800 = dma.hbm_to_vmem [thread:$0]  (!%p2863_p7), %s2561_s17, 32, %s489_s5, %s477_s12  }
  0xe1   : > { %497 = sbr.rel (%p2864_p10) target bundleno = 1565 (0x61d), region = 68  ;;  %s2588_s21 = sshll.u32 (!%p2864_p10), %s2585_s24, 2 }
  0xe2   : > { %s500_s30 = scalar_lea.sflag (!%p2864_p10), [#allocation6], %s2585_s24  ;;  %s503_s11 = scalar_lea.vmem (!%p2864_p10), [#allocation5], %s2588_s21 }
  0xe8   : > { %2156 = dma.done.wait (%p2865_p6), %s500_s30, 64  }
  0xe9   : > { %2158 = vsyncadd (%p2865_p6), %s500_s30, 4294967232  ;;  %s508_s13 = sand.u32 1, %s2318_s27   ;;  %s512_s5 = scalar_lea.vmem [#allocation8], %s2588_s21 }
  0xea   : > { %s509_s14 = scalar_lea.sflag [#allocation9], %s508_s13 }
  0xeb   : > { %2160 = dma.done.wait (%p2865_p6), %s509_s14, 128  }
  0xec   : > { %2162 = vsyncadd (%p2865_p6), %s509_s14, 4294967168  ;;  %s1605_s28 = sshll.u32 %s2585_s24, 1  ;;  %s521_s17 = scalar_lea.vmem [#allocation10], %s2588_s21 }
  0xed   : > { %s527_s7 = scalar_lea.sflag [#allocation12], %s508_s13  ;;  %s2604_s12 = scalar_lea.vmem [#allocation11], %s1605_s28 }
  0xee   : > { %2164 = dma.done.wait (%p2865_p6), %s527_s7, 32  }
  0xef   : > { %2166 = vsyncadd (%p2865_p6), %s527_s7, 4294967264  ;;  %p2866_p1 = scmp.eq.s32.totalorder %s2318_s27, 0 }
  0xf1   : > { %2168 = dma.done.wait (%p2866_p1), [#allocation12], 256   ;;  %p2867_p4 = pmov %p2866_p1 }
  0xf2   : > { %p2868_p2 = pmov %p2866_p1 }
  0xf3   : > { %2170 = vsyncadd (%p2867_p4), [#allocation12], 4294967040 }
  0xf4   : > { %2172 = dma.done.wait (%p2868_p2), [#allocation15], 272   ;;  %p2869_p8 = pmov %p2866_p1 }
  0xf5   : > { %v2212_v0 = vmov 0.0   ;;  %vm2213_vm0 = vmmov 0   ;;  %v1875_v1 = vld [vmem:[%s2806_s6] sm:$0xff]   ;;  %v1876_v2 = vld [vmem:[%s2806_s6 + $0x8] sm:$0xff]   ;;  %vm629_vm1 = vcmask 261120   ;;  %v1879_v7 = vld [vmem:[#allocation14] sm:$0xff]  }
  0xf6   : > { %2174 = vsyncadd (%p2869_p8), [#allocation15], 4294967024  ;;  %1676 = vmatprep.subr.bf16.mxu0 %v2212_v0  ;;  %1680 = vmatprep.mubr.msk.bf16.mxu0 %vm2213_vm0, %v2212_v0  ;;  %v605_v3 = vld [vmem:[%s512_s5] sm:$0xf]  ;;  %v1877_v4 = vld [vmem:[#allocation13] sm:$0xff]   ;;  %s2870_s4 = sld [smem:[#allocation34_spill]] }
  0xf7   : > { %1684 = vmatprep.subr.bf16.mxu1 %v2212_v0  ;;  %1688 = vmatprep.mubr.msk.bf16.mxu1 %vm2213_vm0, %v2212_v0  ;;  %v1878_v5 = vld [vmem:[#allocation13 + $0x8] sm:$0xff]   ;;  %v1880_v8 = vld [vmem:[#allocation14 + $0x8] sm:$0xff]   ;;  %vm742_vm2 = vcmask 60416   ;;  %s2214_s10 = smov 104   ;;  %s2215_s1 = smov 120   ;;  %vm854_vm3 = vcmask 64512  }
  0xf8   : > { %1677 = vmatpush3.bf16.msra.mxu0 %v1875_v1  ;;  %v781_v6 = vld [vmem:[%s503_s11] sm:$0xf]  ;;  %1685 = vmatpush3.bf16.msra.mxu1 %v1879_v7  ;;  %v674_v9 = vld [vmem:[%s521_s17] sm:$0xf]  ;;  %s2871_s23 = sld [smem:[#allocation33_spill]]  ;;  %s2216_s21 = smov 112  }
  0xf9   : > { %1678 = vmatprep.subr.bf16.mxu0 %v2212_v0  ;;  %1686 = vmatprep.subr.bf16.mxu1 %v2212_v0  ;;  %v1614_v26 = vld [vmem:[#allocation16] ss:$0 sm:$0xff]  ;;  %vm918_vm4 = vcmask 1043456   ;;  %v850_v47 = vld [vmem:[%s2604_s12] sm:$0x3]  ;;  %v2217_v48 = vmov 0  }
  0xfa   : > { %vm851_vm5 = vnez %v850_v47  ;;  %s2218_s30 = smov 8   ;;  %s2874_s14 = sld [smem:[#allocation36_spill]]  ;;  %vm1086_vm7 = vcmask 126016   ;;  %vm1206_vm8 = vcmask 191616   ;;  %vm1326_vm9 = vcmask 257216  }
  0xfb   : > { %v901_v49 = vsel %vm851_vm5, 16843009, %v2217_v48  ;;  %s2219_s17 = smov 16   ;;  %s2875_s7 = sld [smem:[#allocation26_spill]] }
  0xfc   : > { %1679 = vmatpush3.bf16.msra.mxu0 %v1876_v2  ;;  %1687 = vmatpush3.bf16.msra.mxu1 %v1880_v8  ;;  %v1610_v10 = vld [vmem:[%s2870_s4] ss:$0 sm:$0xff]  ;;  %v902_v50 = vunpack.c.0.s8 %v901_v49  ;;  %s2220_s12 = smov 24   ;;  %s1609_s29 = sshll.u32 %s2585_s24, 3 }
  0xfd   : > { %1692 = vmatprep.subr.bf16.mxu0 %v2212_v0  ;;  %1700 = vmatprep.subr.bf16.mxu1 %v2212_v0  ;;  %s2876_s8 = sld [smem:[#allocation37_spill]]  ;;  %s597_s4 = scalar_lea.vmem [#allocation17], %s1609_s29 }
  0xfe   : > { %v1620_v17 = vld [vmem:[%s2871_s23] ss:$0 sm:$0xff]  ;;  %vm2691_vm6 = vcmp.ne.s32.totalorder %v902_v50, 0  ;;  %s2877_s18 = sld [smem:[#allocation29_spill]]  ;;  %s2878_s15 = sld [smem:[#allocation38_spill]] }
  0xff   : > { %1681 = vmatmul.mubr.msk.bf16.vlgmr.msra.gmra.mrb[0].mxu0 %vm629_vm1, %v605_v3  ;;  %1689 = vmatmul.mubr.msk.bf16.vlgmr.msra.gmra.mrb[0].mxu1 %vm629_vm1, %v674_v9  ;;  %s2221_s11 = smov [#allocation17]  }
 0x100   : > { %1693 = vmatpush3.bf16.msra.mxu0 %v1877_v4  ;;  %1696 = vmatprep.mubr.msk.bf16.mxu0 %vm2213_vm0, %v2212_v0  ;;  %s2107_s13 = sshll.u32 %s2221_s11, 4  ;;  %s2108_s13 = int_to_ptr.vmem [resolvable:$false] %s2107_s13 }
 0x101   : > { %1694 = vmatprep.subr.bf16.mxu0 %v2212_v0  ;;  %1702 = vmatprep.mubr.msk.bf16.mxu1 %vm2213_vm0, %v2212_v0  ;;  %s1640_s16 = sshll.u32 %s2875_s7, 7  ;;  %s2109_s5 = scalar_lea.vmem %s2108_s13, 256 }
 0x104   : > { %1695 = vmatpush3.bf16.msra.mxu0 %v1878_v5  ;;  %s2750_s23 = scalar_lea.hbm %s2878_s15, %s1640_s16  ;;  %p2879_p12 = scmp.ne.s32.totalorder %s2877_s18, 0 }
 0x105   : > { %1706 = vmatprep.subr.bf16.mxu0 %v2212_v0 }
 0x107   : > { %1697 = vmatmul.mubr.msk.bf16.vlgmr.msra.gmra.mrb[4].mxu0 %vm629_vm1, %v781_v6 }
 0x108   : > { %1708 = vmatprep.mubr.msk.bf16.mxu0 %vm2213_vm0, %v2212_v0 }
 0x1d2   : > { %v667_v11 = vpop.f32.mrb[0].mxu0  ;;  %v735_v27 = vpop.f32.mrb[0].mxu1 }
 0x1d3   : > { %v668_v12 = vadd.f32 %v1610_v10, %v667_v11  ;;  %v1682_v13 = vpop.f32.mrb[1].mxu0  ;;  %v736_v28 = vadd.f32 %v1614_v26, %v735_v27  ;;  %v1690_v29 = vpop.f32.mrb[1].mxu1 }
 0x1d4   : > { %v670_v14 = vpop.f32.mrb[2].mxu0  ;;  %v738_v30 = vpop.f32.mrb[2].mxu1 }
 0x1d5   : > { %v673_v15 = vpack.c.bf16 %v668_v12, %v668_v12  ;;  %v1683_v16 = vpop.f32.mrb[3].mxu0  ;;  %v2665_v31 = vpack.c.bf16 %v736_v28, %v736_v28  ;;  %v1691_v32 = vpop.f32.mrb[3].mxu1 }
 0x1d7   : > { %743 = vst.msk [vmem:[#allocation2] sm:$0xf] %vm742_vm2, %v673_v15  ;;  %771 = vrot.lane.b32.xlu1 %v673_v15, %s2214_s10  ;;  %748 = vrot.lane.b32.xlu0 %v673_v15, %s2215_s1  ;;  %744 = vst.msk [vmem:[#allocation3] sm:$0xf] %vm742_vm2, %v2665_v31 }
 0x1da   : > { %v843_v18 = vpop.f32.mrb[4].mxu0 }
 0x1db   : > { %761 = vrot.lane.b32.xlu0 %v673_v15, %s2216_s21  ;;  %v844_v19 = vadd.f32 %v1620_v17, %v843_v18  ;;  %v1698_v20 = vpop.f32.mrb[5].mxu0 }
 0x1dc   : > { %v846_v21 = vpop.f32.mrb[6].mxu0 }
 0x1dd   : > { %v849_v22 = vpack.c.bf16 %v844_v19, %v844_v19  ;;  %v1699_v23 = vpop.f32.mrb[7].mxu0 }
 0x1de   : > { %v852_v24 = vld [vmem:[#allocation2] sm:$0xf]  ;;  %v853_v33 = vld [vmem:[#allocation3] sm:$0xf] }
 0x1df   : > { %v859_v25 = vsel %vm854_vm3, %v852_v24, 0  ;;  %972 = vrot.lane.b32.xlu1 %v849_v22, %s2215_s1  ;;  %1092 = vrot.lane.b32.xlu0 %v849_v22, %s2216_s21  ;;  %v920_v34 = vsel %vm918_vm4, %v853_v33, 0 }
 0x1e0   : > { %1701 = vmatpush3.bf16.xpose.msra.mxu1 %v859_v25  ;;  %1707 = vmatpush3.bf16.msra.mxu0 %v920_v34 }
 0x1e1   : > { %1712 = vmatprep.subr.bf16.mxu1 %v2212_v0  ;;  %1718 = vmatprep.subr.bf16.mxu0 %v2212_v0 }
 0x1e3   : > { %1212 = vrot.lane.b32.xlu1 %v849_v22, %s2214_s10 }
 0x1e7   : > { %1703 = vmatmul.mubr.msk.bf16.vlgmr.msra.gmra.mrb[4].mxu1 %vm854_vm3, %v849_v22  ;;  %756 = vrot.lane.b32.xlu1 %v2665_v31, %s2215_s1 }
 0x1e8   : > { %1714 = vmatprep.mubr.msk.bf16.mxu1 %vm2213_vm0, %v2212_v0 }
 0x249   : > { %v772_v35 = vpop.permute.xlu1 %771  ;;  %v749_v36 = vpop.permute.xlu0 %748 }
 0x24a   : > { %775 = vst.msk [vmem:[#allocation2 + $0xc] sm:$0xf] %vm742_vm2, %v772_v35  ;;  %752 = vst.msk [vmem:[#allocation2 + $0x4] sm:$0xf] %vm742_vm2, %v749_v36 }
 0x24d   : > { %v762_v37 = vpop.permute.xlu0 %761 }
 0x24e   : > { %765 = vst.msk [vmem:[#allocation2 + $0x8] sm:$0xf] %vm742_vm2, %v762_v37 }
 0x251   : > { %v968_v38 = vld [vmem:[#allocation2 + $0x4] sm:$0xf]  ;;  %v973_v41 = vpop.permute.xlu1 %972  ;;  %v1209_v43 = vld [vmem:[#allocation2 + $0xc] sm:$0xf]  ;;  %v1093_v44 = vpop.permute.xlu0 %1092 }
 0x252   : > { %v978_v39 = vsel %vm854_vm3, %v968_v38, 0  ;;  %v1218_v45 = vsel %vm854_vm3, %v1209_v43, 0 }
 0x253   : > { %1713 = vmatpush3.bf16.xpose.msra.mxu1 %v978_v39 }
 0x254   : > { %1724 = vmatprep.subr.bf16.mxu1 %v2212_v0 }
 0x255   : > { %v1089_v40 = vld [vmem:[#allocation2 + $0x8] sm:$0xf]  ;;  %v1213_v46 = vpop.permute.xlu1 %1212 }
 0x256   : > { %v1098_v42 = vsel %vm854_vm3, %v1089_v40, 0 }
 0x259   : > { %v757_v58 = vpop.permute.xlu1 %756 }
 0x25a   : > { %1715 = vmatmul.mubr.msk.bf16.vlgmr.msra.gmra.mrb[8].mxu1 %vm854_vm3, %v973_v41  ;;  %760 = vst.msk [vmem:[#allocation3 + $0x4] sm:$0xf] %vm742_vm2, %v757_v58 }
 0x25b   : > { %1725 = vmatpush3.bf16.xpose.msra.mxu1 %v1098_v42  ;;  %1726 = vmatprep.mubr.msk.bf16.mxu1 %vm2213_vm0, %v2212_v0 }
 0x25c   : > { %1736 = vmatprep.subr.bf16.mxu1 %v2212_v0 }
 0x261   : > { %v970_v17 = vld [vmem:[#allocation3 + $0x4] sm:$0xf] }
 0x262   : > { %1727 = vmatmul.mubr.msk.bf16.vlgmr.msra.gmra.mrb[12].mxu1 %vm854_vm3, %v1093_v44  ;;  %v1035_v20 = vsel %vm918_vm4, %v970_v17, 0 }
 0x263   : > { %1737 = vmatpush3.bf16.xpose.msra.mxu1 %v1218_v45  ;;  %1738 = vmatprep.mubr.msk.bf16.mxu1 %vm2213_vm0, %v2212_v0 }
 0x264   : > { %1748 = vmatprep.subr.bf16.mxu1 %v2212_v0 }
 0x26a   : > { %1739 = vmatmul.mubr.msk.bf16.vlgmr.msra.gmra.mrb[16].mxu1 %vm854_vm3, %v1213_v46 }
 0x26b   : > { %1752 = vmatprep.mubr.msk.bf16.mxu1 %vm2213_vm0, %v2212_v0 }
 0x2ba   : > { %v895_v52 = vpop.f32.mrb[4].mxu1 }
 0x2bb   : > { %v904_v53 = vsel %vm2691_vm6, %v895_v52, -1e+09  ;;  %v1704_v54 = vpop.f32.mrb[5].mxu1 }
 0x2bc   : > { %v898_v55 = vpop.f32.mrb[6].mxu1  ;;  %v905_v56 = vsel %vm854_vm3, %v904_v53, -inf }
 0x2bd   : > { %906 = vmax.xlane.f32.xlu0 %v905_v56  ;;  %v1705_v57 = vpop.f32.mrb[7].mxu1 }
 0x32d   : > { %v1014_v59 = vpop.f32.mrb[8].mxu1 }
 0x32e   : > { %v1020_v60 = vsel %vm2691_vm6, %v1014_v59, -1e+09  ;;  %v1716_v61 = vpop.f32.mrb[9].mxu1 }
 0x32f   : > { %v1017_v62 = vpop.f32.mrb[10].mxu1  ;;  %v1021_v63 = vsel %vm854_vm3, %v1020_v60, -inf }
 0x330   : > { %1022 = vmax.xlane.f32.xlu1 %v1021_v63  ;;  %v1717_v1 = vpop.f32.mrb[11].mxu1 }
 0x331   : > { %v1881_v1 = vld [vmem:[%s2874_s14] sm:$0xff]  }
 0x332   : > { %1749 = vmatpush3.bf16.msra.mxu1 %v1881_v1 }
 0x333   : > { %1750 = vmatprep.subr.bf16.mxu1 %v2212_v0 }
 0x335   : > { %v1134_v2 = vpop.f32.mrb[12].mxu1 }
 0x336   : > { %v1140_v3 = vsel %vm2691_vm6, %v1134_v2, -1e+09  ;;  %v1728_v4 = vpop.f32.mrb[13].mxu1 }
 0x337   : > { %v1137_v5 = vpop.f32.mrb[14].mxu1  ;;  %v1141_v6 = vsel %vm854_vm3, %v1140_v3, -inf }
 0x338   : > { %1142 = vmax.xlane.f32.xlu0 %v1141_v6  ;;  %v1729_v7 = vpop.f32.mrb[15].mxu1  ;;  %v1882_v6 = vld [vmem:[%s2874_s14 + $0x8] sm:$0xff]  }
 0x339   : > { %1751 = vmatpush3.bf16.msra.mxu1 %v1882_v6 }
 0x33d   : > { %v1254_v8 = vpop.f32.mrb[16].mxu1 }
 0x33e   : > { %v1260_v9 = vsel %vm2691_vm6, %v1254_v8, -1e+09  ;;  %v1740_v10 = vpop.f32.mrb[17].mxu1 }
 0x33f   : > { %v1257_v11 = vpop.f32.mrb[18].mxu1  ;;  %v1261_v12 = vsel %vm854_vm3, %v1260_v9, -inf }
 0x340   : > { %1262 = vmax.xlane.f32.xlu0 %v1261_v12  ;;  %v1741_v13 = vpop.f32.mrb[19].mxu1 }
 0x341   : > { %776 = vrot.lane.b32.xlu1 %v2665_v31, %s2214_s10  ;;  %s1411_s10 = sshll.u32 %s597_s4, 4  ;;  %s2752_s10 = int_to_ptr.vmem [resolvable:$true] %s1411_s10 }
 0x342   : > { %p2110_p11 = scmp.lt.s32.totalorder %s2752_s10, %s2108_s13 }
 0x34a   : > { %v907_v14 = vpop.xlane.xlu0 %906 }
 0x34b   : > { %v908_v15 = vsub.f32 %v904_v53, %v907_v14 }
 0x34d   : > { %v909_v16 = vmul.f32 1.442695, %v908_v15 }
 0x34f   : > { %1883 = vpow2.f32 %v909_v16 }
 0x356   : > { %766 = vrot.lane.b32.xlu0 %v2665_v31, %s2216_s21  ;;  %s1397_s21 = scalar_lea.sflag [#allocation7], %s2585_s24 }
 0x359   : > { %v1884_v18 = vpop.eup %1883 }
 0x35a   : > { %v914_v19 = vpack.c.bf16 %v1884_v18, %v1884_v18  ;;  %v911_v35 = vsel %vm854_vm3, %v1884_v18, 0.0 }
 0x35c   : > { %1709 = vmatmul.mubr.msk.bf16.vlgmr.msra.gmra.mrb[8].mxu0 %vm854_vm3, %v914_v19 }
 0x35d   : > { %1719 = vmatpush3.bf16.msra.mxu0 %v1035_v20  ;;  %1720 = vmatprep.mubr.msk.bf16.mxu0 %vm2213_vm0, %v2212_v0  ;;  %v1635_v20 = vld [vmem:[%s2876_s8] ss:$0 sm:$0xff] }
 0x35e   : > { %1730 = vmatprep.subr.bf16.mxu0 %v2212_v0 }
 0x3bd   : > { %v1023_v21 = vpop.xlane.xlu1 %1022 }
 0x3be   : > { %v1024_v22 = vsub.f32 %v1020_v60, %v1023_v21 }
 0x3c0   : > { %v1025_v23 = vmul.f32 1.442695, %v1024_v22 }
 0x3c1   : > { %v777_v24 = vpop.permute.xlu1 %776 }
 0x3c2   : > { %1885 = vpow2.f32 %v1025_v23  ;;  %780 = vst.msk [vmem:[#allocation3 + $0xc] sm:$0xf] %vm742_vm2, %v777_v24 }
 0x3c5   : > { %v1143_v25 = vpop.xlane.xlu0 %1142 }
 0x3c6   : > { %v1144_v26 = vsub.f32 %v1140_v3, %v1143_v25 }
 0x3c8   : > { %v1145_v27 = vmul.f32 1.442695, %v1144_v26 }
 0x3c9   : > { %v1211_v40 = vld [vmem:[#allocation3 + $0xc] sm:$0xf] }
 0x3ca   : > { %1887 = vpow2.f32 %v1145_v27  ;;  %v1275_v44 = vsel %vm918_vm4, %v1211_v40, 0 }
 0x3cc   : > { %v1886_v28 = vpop.eup %1885 }
 0x3cd   : > { %v1263_v29 = vpop.xlane.xlu0 %1262  ;;  %v1027_v30 = vsel %vm854_vm3, %v1886_v28, 0.0  ;;  %v1030_v31 = vpack.c.bf16 %v1886_v28, %v1886_v28 }
 0x3ce   : > { %v1264_v32 = vsub.f32 %v1260_v9, %v1263_v29  ;;  %1028 = vadd.xlane.f32.xlu1 %v1027_v30 }
 0x3cf   : > { %1721 = vmatmul.mubr.msk.bf16.vlgmr.msra.gmra.mrb[12].mxu0 %vm854_vm3, %v1030_v31 }
 0x3d0   : > { %v1265_v33 = vmul.f32 1.442695, %v1264_v32  ;;  %1732 = vmatprep.mubr.msk.bf16.mxu0 %vm2213_vm0, %v2212_v0 }
 0x3d1   : > { %v767_v34 = vpop.permute.xlu0 %766 }
 0x3d2   : > { %1889 = vpow2.f32 %v1265_v33  ;;  %770 = vst.msk [vmem:[#allocation3 + $0x8] sm:$0xf] %vm742_vm2, %v767_v34  ;;  %912 = vadd.xlane.f32.xlu1 %v911_v35 }
 0x3d4   : > { %v1888_v36 = vpop.eup %1887 }
 0x3d5   : > { %v1147_v37 = vsel %vm854_vm3, %v1888_v36, 0.0  ;;  %v1150_v42 = vpack.c.bf16 %v1888_v36, %v1888_v36 }
 0x3d6   : > { %1148 = vadd.xlane.f32.xlu0 %v1147_v37 }
 0x3d9   : > { %v1091_v38 = vld [vmem:[#allocation3 + $0x8] sm:$0xf] }
 0x3da   : > { %v1155_v39 = vsel %vm918_vm4, %v1091_v38, 0 }
 0x3db   : > { %1731 = vmatpush3.bf16.msra.mxu0 %v1155_v39 }
 0x3dc   : > { %v1890_v41 = vpop.eup %1889  ;;  %1742 = vmatprep.subr.bf16.mxu0 %v2212_v0 }
 0x3dd   : > { %v1267_v43 = vsel %vm854_vm3, %v1890_v41, 0.0  ;;  %v1270_v45 = vpack.c.bf16 %v1890_v41, %v1890_v41 }
 0x3de   : > { %1268 = vadd.xlane.f32.xlu0 %v1267_v43  ;;  %1733 = vmatmul.mubr.msk.bf16.vlgmr.msra.gmra.mrb[16].mxu0 %vm854_vm3, %v1150_v42 }
 0x3df   : > { %1743 = vmatpush3.bf16.msra.mxu0 %v1275_v44  ;;  %1744 = vmatprep.mubr.msk.bf16.mxu0 %vm2213_vm0, %v2212_v0 }
 0x3e6   : > { %1745 = vmatmul.mubr.msk.bf16.vlgmr.msra.gmra.mrb[20].mxu0 %vm854_vm3, %v1270_v45 }
 0x42f   : > { %v956_v46 = vpop.f32.mrb[8].mxu0 }
 0x430   : > { %v1710_v47 = vpop.f32.mrb[9].mxu0 }
 0x431   : > { %v959_v48 = vpop.f32.mrb[10].mxu0 }
 0x432   : > { %v1711_v49 = vpop.f32.mrb[11].mxu0 }
 0x45b   : > { %v1029_v50 = vpop.xlane.xlu1 %1028 }
 0x45f   : > { %v913_v51 = vpop.xlane.xlu1 %912 }
 0x460   : > { %1891 = vrcp.f32 %v913_v51 }
 0x461   : > { %1893 = vrcp.f32 %v1029_v50 }
 0x463   : > { %v1149_v59 = vpop.xlane.xlu0 %1148 }
 0x464   : > { %1895 = vrcp.f32 %v1149_v59 }
 0x46a   : > { %v1892_v52 = vpop.eup %1891 }
 0x46b   : > { %v963_v53 = vmul.f32 %v1892_v52, %v956_v46  ;;  %v1894_v55 = vpop.eup %1893  ;;  %v1269_v63 = vpop.xlane.xlu0 %1268 }
 0x46c   : > { %1897 = vrcp.f32 %v1269_v63 }
 0x46d   : > { %v964_v54 = vpack.c.bf16 %v963_v53, %v963_v53 }
 0x46e   : > { %v1896_v2 = vpop.eup %1895 }
 0x46f   : > { %966 = vst.msk [vmem:[#allocation4] sm:$0xf] %vm742_vm2, %v964_v54 }
 0x476   : > { %v1898_v10 = vpop.eup %1897 }
 0x4a2   : > { %v1071_v56 = vpop.f32.mrb[12].mxu0 }
 0x4a3   : > { %v1078_v57 = vmul.f32 %v1894_v55, %v1071_v56  ;;  %v1722_v58 = vpop.f32.mrb[13].mxu0 }
 0x4a4   : > { %v1074_v60 = vpop.f32.mrb[14].mxu0 }
 0x4a5   : > { %v1645_v61 = vpack.c.bf16 %v1078_v57, %v1078_v57  ;;  %v1723_v62 = vpop.f32.mrb[15].mxu0 }
 0x4a7   : > { %1083 = vrot.lane.b32.xlu0 %v1645_v61, %s2218_s30  ;;  %s2103_s30 = scalar_lea.vmem %s2752_s10, 128 }
 0x4a8   : > { %p2104_p13 = scmp.ne.s32.totalorder %s2752_s10, %s2103_s30  ;;  %p2111_p9 = scmp.lt.s32.totalorder %s2109_s5, %s2103_s30 }
 0x4aa   : > { %p2105_p3 = pnand %p2104_p13, %p2879_p12  ;;  %p2112_p5 = por %p2111_p9, %p2110_p11 }
 0x4ac   : > { %p2106_p0 = pneg %p2105_p3 }
 0x4ae   : > { %p2113_p7 = pnand %p2112_p5, %p2106_p0 }
 0x4b1   : > { %v1191_v3 = vpop.f32.mrb[16].mxu0 }
 0x4b2   : > { %v1198_v4 = vmul.f32 %v1896_v2, %v1191_v3  ;;  %v1734_v5 = vpop.f32.mrb[17].mxu0 }
 0x4b3   : > { %v1194_v7 = vpop.f32.mrb[18].mxu0 }
 0x4b4   : > { %v1646_v8 = vpack.c.bf16 %v1198_v4, %v1198_v4  ;;  %v1735_v9 = vpop.f32.mrb[19].mxu0 }
 0x4b6   : > { %1203 = vrot.lane.b32.xlu1 %v1646_v8, %s2219_s17 }
 0x4b9   : > { %v1311_v11 = vpop.f32.mrb[20].mxu0 }
 0x4ba   : > { %v1318_v12 = vmul.f32 %v1898_v10, %v1311_v11  ;;  %v1746_v13 = vpop.f32.mrb[21].mxu0 }
 0x4bb   : > { %v1314_v14 = vpop.f32.mrb[22].mxu0 }
 0x4bc   : > { %v1647_v15 = vpack.c.bf16 %v1318_v12, %v1318_v12  ;;  %v1747_v16 = vpop.f32.mrb[23].mxu0 }
 0x4be   : > { %1323 = vrot.lane.b32.xlu1 %v1647_v15, %s2220_s12 }
 0x519   : > { %v1084_v17 = vpop.permute.xlu0 %1083 }
 0x51a   : > { %1087 = vst.msk [vmem:[#allocation4] sm:$0xf] %vm1086_vm7, %v1084_v17 }
 0x528   : > { %v1204_v0 = vpop.permute.xlu1 %1203 }
 0x529   : > { %1207 = vst.msk [vmem:[#allocation4] sm:$0xf] %vm1206_vm8, %v1204_v0 }
 0x530   : > { %v1324_v18 = vpop.permute.xlu1 %1323 }
 0x531   : > { %1327 = vst.msk [vmem:[#allocation4] sm:$0xf] %vm1326_vm9, %v1324_v18 }
 0x538   : > { %v1328_v19 = vld [vmem:[#allocation4] sm:$0xf] }
 0x539   : > { %1753 = vmatmul.mubr.msk.bf16.vlgmr.msra.gmra.mrb[20].mxu1 %vm629_vm1, %v1328_v19 }
 0x60c   : > { %v1389_v21 = vpop.f32.mrb[20].mxu1 }
 0x60d   : > { %v1390_v22 = vadd.f32 %v1635_v20, %v1389_v21  ;;  %v1754_v23 = vpop.f32.mrb[21].mxu1 }
 0x60e   : > { %v1392_v24 = vpop.f32.mrb[22].mxu1 }
 0x60f   : > { %v1755_v25 = vpop.f32.mrb[23].mxu1  ;;  %1395 = vst.msk [vmem:[%s597_s4] sm:$0xff] %vm629_vm1, %v1390_v22 }
 0x610   : > { %2116 = shalt.err (!%p2113_p7)
}
 0x611   : > { %s2117_s24 = scalar_lea.hbm %s2750_s23, 128  ;;  %s2121_s7 = scalar_lea.hbm %s2878_s15, 256 }
 0x612   : > { %p2118_p10 = scmp.ne.s32.totalorder %s2750_s23, %s2117_s24  ;;  %p2122_p4 = scmp.lt.u32.totalorder %s2750_s23, %s2878_s15 }
 0x613   : > { %p2123_p2 = scmp.lt.u32.totalorder %s2121_s7, %s2117_s24  ;;  %p2125_p13 = scmp.lt.u32.totalorder %s2117_s24, %s2750_s23 }
 0x614   : > { %p2119_p6 = pnand %p2118_p10, %p2879_p12 }
 0x615   : > { %p2124_p8 = por %p2123_p2, %p2122_p4 }
 0x616   : > { %p2120_p1 = pneg %p2119_p6 }
 0x617   : > { %p2126_p3 = por %p2125_p13, %p2124_p8 }
 0x619   : > { %p2127_p0 = pnand %p2126_p3, %p2120_p1 }
 0x61b   : > { %2130 = shalt.err (!%p2127_p0)
}
 0x61c   : > { %1776 = dma.vmem_to_hbm [thread:$0]  (%p2879_p12), %s2752_s10, 128, %s2750_s23, %s1397_s21  }
 0x61d PF: > { %s2880_s20 = sld [smem:[#allocation24_spill]]  ;;  %s2881_s27 = sld [smem:[#allocation27_spill]] }
 0x61e   : > { %p2883_p9 = scmp.ge.s32.totalorder %s2201_s26, 2 }
 0x623   : > { %s1423_s8 = sand.u32 1, %s2880_s20   ;;  %p2882_p11 = scmp.ne.s32.totalorder %s2881_s27, 0 }
 0x624   : > { %s1424_s16 = scalar_lea.sflag [#allocation7], %s1423_s8 }
 0x625   : > { %p1802_p5 = pnand %p2883_p9, %p2882_p11 }
 0x627   : > { %2176 = dma.done.wait (!%p1802_p5), %s1424_s16, 128  }
 0x628   : > { %2178 = vsyncadd (!%p1802_p5), %s1424_s16, 4294967168  ;;  %s35_s26 = sadd.s32 1, %s2201_s26   ;;  %s2884_s4 = sld [smem:[#allocation25_spill]] }
 0x629   : > { %p32_p7 = scmp.ge.s32.totalorder %s35_s26, 4   ;;  %s2885_s23 = sld [smem:[#allocation30_spill]] }
 0x62a   : > { %s2886_s18 = sld [smem:[#allocation28_spill]]  ;;  %s2887_s21 = smov %s2185_s22 }
 0x62b   : > { %s2889_s24 = smov %s2197_s25  ;;  %34 = sbr.rel (!%p32_p7) target bundleno = 20 (0x14), region = 178 }
 0x62e   : > { %s2888_s22 = smov %s2884_s4 }
 0x630   : > { %s2890_s25 = smov %s2886_s18 }
 0x632   :  { %1429 = vsyncpa [#allocation6], 1 }
 0x633   :  { %1431 = vsyncpa [#allocation6 + $0x1], 1 }
 0x634   :  { %1432 = vsyncpa [#allocation9], 1 }
 0x635   :  { %1434 = vsyncpa [#allocation9 + $0x1], 1 }
 0x636   :  { %1435 = vsyncpa [#allocation12], 1 }
 0x637   :  { %1437 = vsyncpa [#allocation12 + $0x1], 1 }
 0x638   :  { %1438 = vsyncpa [#allocation15], 1 }
 0x639   :  { %1439 = vsyncpa [#allocation7], 1 }
 0x63a   :  { %1441 = vsyncpa [#allocation7 + $0x1], 1 }

</bundles_post_ra>
